<compile_context>
chip_gen: v6e
topology: v6e:2x2x1
jax: 0.10.0
libtpu: 0.0.40
codegen_flags: <defaults>
</compile_context>

<pallas_src>
import jax
import jax.numpy as jnp
from jax.experimental import pallas as pl
from jax.experimental.pallas import tpu as pltpu

OUT_PAD = 128  # lane-dense padded output width (true n_out = 12)


# ----------------------------------------------------------------------------
# Fused kernel: 3x (conv1d + ReLU) -> max/avg pool -> 3-layer MLP
# ----------------------------------------------------------------------------
def vgg1d_fused_kernel(x_ref,
                       wc1_ref, bc1_ref, wc2_ref, bc2_ref, wc3_ref, bc3_ref,
                       w1a_hbm, w1b_hbm, b1_ref, w2_hbm, b2_ref,
                       w3_hbm, b3_ref,
                       out_ref,
                       w1a_buf, w1b_buf, w2_buf, w3_buf, sem):
    """x_ref: (N, L, 4) f32 channels-last input (VMEM).
    wc*_ref: (3, Cin, Cout) bf16 conv weights (VMEM), bc*: (1, Cout) f32.
    w1a/w1b/w2/w3 arrive as raw HBM refs (pl.ANY) and are DMA'd into the
    w*_buf VMEM scratch here, overlapping the conv/pool phase.
    b*_ref: (1, out) f32 biases (VMEM).  out_ref: (N, 128) f32 (lane-dense).
    """
    # Kick off the FC-weight DMAs immediately; they overlap the conv phase.
    copies = (pltpu.make_async_copy(w1a_hbm, w1a_buf, sem.at[0]),
              pltpu.make_async_copy(w1b_hbm, w1b_buf, sem.at[1]),
              pltpu.make_async_copy(w2_hbm, w2_buf, sem.at[2]),
              pltpu.make_async_copy(w3_hbm, w3_buf, sem.at[3]))
    for cp in copies:
        cp.start()

    def conv_relu(h, w_ref, b_ref):
        # h: (N, L, Cin) f32 -> (N, L, Cout) f32; 'same' conv, K=3, stride 1.
        # Three shifted matmuls accumulated in f32 (no lane-axis im2col concat).
        N, L, Cin = h.shape
        Cout = w_ref.shape[-1]
        z = jnp.zeros((N, 1, Cin), jnp.float32)
        hp = jnp.concatenate([z, h, z], axis=1).astype(jnp.bfloat16)  # (N,L+2,Cin)
        acc = jnp.zeros((N * L, Cout), jnp.float32)
        for k in range(3):                                   # static unroll
            tap = hp[:, k:k + L, :].reshape(N * L, Cin)
            acc = acc + jnp.dot(tap, w_ref[k],
                                preferred_element_type=jnp.float32)
        acc = jnp.maximum(acc + b_ref[...], 0.0)             # bias+ReLU in f32
        return acc.reshape(N, L, Cout)

    h = x_ref[...]                                           # already f32
    h = conv_relu(h, wc1_ref, bc1_ref)                       # (N, L, 64)
    h = conv_relu(h, wc2_ref, bc2_ref)                       # (N, L, 128)
    h = conv_relu(h, wc3_ref, bc3_ref)                       # (N, L, 256)

    # adaptive_max_pool1d(1) / adaptive_avg_pool1d(1) -> (N, 256) each.
    mx = jnp.max(h, axis=1)
    av = jnp.mean(h, axis=1)

    # FC weights must have landed by now.
    for cp in copies:
        cp.wait()

    # cat([max, avg]) @ w1  ==  mx @ w1[:256] + av @ w1[256:]
    f = (jnp.dot(mx.astype(jnp.bfloat16), w1a_buf[...],
                 preferred_element_type=jnp.float32)
         + jnp.dot(av.astype(jnp.bfloat16), w1b_buf[...],
                   preferred_element_type=jnp.float32))
    f = jnp.maximum(f + b1_ref[...], 0.0)
    # TODO(synk): Dropout(0.5) = identity (eval mode).
    f = jnp.dot(f.astype(jnp.bfloat16), w2_buf[...],
                preferred_element_type=jnp.float32)
    f = jnp.maximum(f + b2_ref[...], 0.0)
    # TODO(synk): Dropout(0.5) = identity (eval mode).
    o = jnp.dot(f.astype(jnp.bfloat16), w3_buf[...],
                preferred_element_type=jnp.float32) + b3_ref[...]
    out_ref[...] = o.astype(out_ref.dtype)                   # (N, 128) lane-dense


# ----------------------------------------------------------------------------
# One-time parameter preparation (NOT in the per-call path)
# ----------------------------------------------------------------------------
def prepare_params(conv_params, fc_params):
    """bf16 casts, w1 split, bias reshapes, w3 lane padding -- done once."""
    prepped = []
    for w, b in conv_params:                          # w: (K, Cin, Cout)
        prepped += [w.astype(jnp.bfloat16),
                    b.reshape(1, -1).astype(jnp.float32)]
    (w1, b1), (w2, b2), (w3, b3) = fc_params
    half = w1.shape[0] // 2                           # 256
    n_out = w3.shape[1]                               # 12
    pad = OUT_PAD - n_out
    w3p = jnp.pad(w3, ((0, 0), (0, pad))).astype(jnp.bfloat16)
    b3p = jnp.pad(b3, (0, pad)).reshape(1, -1).astype(jnp.float32)
    prepped += [w1[:half].astype(jnp.bfloat16),       # multiplies max-pooled feats
                w1[half:].astype(jnp.bfloat16),       # multiplies avg-pooled feats
                b1.reshape(1, -1).astype(jnp.float32),
                w2.astype(jnp.bfloat16),
                b2.reshape(1, -1).astype(jnp.float32),
                w3p, b3p]
    return tuple(jax.device_put(p) for p in prepped), n_out


# ----------------------------------------------------------------------------
# Forward wrapper (hot path: transpose x + one pallas_call + output slice)
# ----------------------------------------------------------------------------
def vgg1d_forward(x_ncl, prepped, n_out=12):
    """x_ncl: (N, C, L) as in PyTorch -> logits (N, 12)."""
    x_nlc = jnp.transpose(x_ncl, (0, 2, 1))           # NCL -> NLC (tiny)
    N, L, _ = x_nlc.shape
    (wc1, bc1, wc2, bc2, wc3, bc3,
     w1a, w1b, b1, w2, b2, w3p, b3p) = prepped

    vmem = pl.BlockSpec(memory_space=pltpu.MemorySpace.VMEM)
    hbm = pl.BlockSpec(memory_space=pl.ANY)           # stays in HBM, manual DMA

    # Advisory cost estimate so XLA can schedule around the custom call.
    flops = 0
    for w in (wc1, wc2, wc3):
        K, Cin, Cout = w.shape
        flops += 2 * N * L * K * Cin * Cout
    flops += 2 * N * (2 * w1a.shape[0] * w1a.shape[1]
                      + w2.shape[0] * w2.shape[1]
                      + w3p.shape[0] * w3p.shape[1])
    args = (x_nlc, wc1, bc1, wc2, bc2, wc3, bc3,
            w1a, w1b, b1, w2, b2, w3p, b3p)
    bytes_accessed = int(sum(int(a.size) * a.dtype.itemsize for a in args)
                         + N * OUT_PAD * 4)

    out_padded = pl.pallas_call(
        vgg1d_fused_kernel,
        out_shape=jax.ShapeDtypeStruct((N, OUT_PAD), jnp.float32),
        in_specs=[
            vmem,              # x
            vmem, vmem,        # wc1, bc1
            vmem, vmem,        # wc2, bc2
            vmem, vmem,        # wc3, bc3
            hbm, hbm, vmem,    # w1a, w1b (HBM), b1
            hbm, vmem,         # w2 (HBM), b2
            hbm, vmem,         # w3 padded (HBM), b3 padded
        ],
        out_specs=pl.BlockSpec(memory_space=pltpu.MemorySpace.VMEM),
        scratch_shapes=[
            pltpu.VMEM(w1a.shape, jnp.bfloat16),
            pltpu.VMEM(w1b.shape, jnp.bfloat16),
            pltpu.VMEM(w2.shape, jnp.bfloat16),
            pltpu.VMEM(w3p.shape, jnp.bfloat16),
            pltpu.SemaphoreType.DMA((4,)),
        ],
        compiler_params=pltpu.CompilerParams(
            vmem_limit_bytes=32 * 1024 * 1024),
        cost_estimate=pl.CostEstimate(flops=flops, transcendentals=0,
                                      bytes_accessed=bytes_accessed),
    )(*args)
    return out_padded[:, :n_out]


# ----------------------------------------------------------------------------
# Deterministic parameter init
# ----------------------------------------------------------------------------
def init_params(key):
    conv_dims = [(4, 64), (64, 128), (128, 256)]
    fc_dims = [(512, 1024), (1024, 1024), (1024, 12)]
    conv_params, fc_params = [], []
    keys = jax.random.split(key, len(conv_dims) + len(fc_dims))
    for i, (cin, cout) in enumerate(conv_dims):
        w = jax.random.normal(keys[i], (3, cin, cout), jnp.float32) * 0.05
        b = jnp.full((cout,), 0.01, jnp.float32)
        conv_params.append((w, b))
    for j, (fin, fout) in enumerate(fc_dims):
        w = jax.random.normal(keys[len(conv_dims) + j], (fin, fout),
                              jnp.float32) * 0.02
        b = jnp.full((fout,), 0.01, jnp.float32)
        fc_params.append((w, b))
    return conv_params, fc_params


# ----------------------------------------------------------------------------
# Pure-JAX reference mirroring the kernel math (bf16 matmul operands,
# f32 accumulation / elementwise, per-tap conv accumulation) for a tight
# correctness check.  vs. a pure-f32 PyTorch reference the bf16 weight cast
# gives ~1e-2 relative deviation, expected and intentional (HBM win).
# ----------------------------------------------------------------------------
def reference_forward(x_ncl, conv_params, fc_params):
    h = jnp.transpose(x_ncl, (0, 2, 1)).astype(jnp.float32)
    N, L, _ = h.shape
    for w, b in conv_params:
        K, Cin, Cout = w.shape
        hp = jnp.pad(h, ((0, 0), (1, 1), (0, 0))).astype(jnp.bfloat16)
        acc = jnp.zeros((N * L, Cout), jnp.float32)
        for k in range(K):
            acc = acc + jnp.dot(hp[:, k:k + L, :].reshape(N * L, Cin),
                                w[k].astype(jnp.bfloat16),
                                preferred_element_type=jnp.float32)
        h = jnp.maximum(acc + b, 0.0).reshape(N, L, Cout)
    mx = jnp.max(h, axis=1)
    av = jnp.mean(h, axis=1)
    (w1, b1), (w2, b2), (w3, b3) = fc_params
    half = w1.shape[0] // 2
    f = (jnp.dot(mx.astype(jnp.bfloat16), w1[:half].astype(jnp.bfloat16),
                 preferred_element_type=jnp.float32)
         + jnp.dot(av.astype(jnp.bfloat16), w1[half:].astype(jnp.bfloat16),
                   preferred_element_type=jnp.float32))
    f = jnp.maximum(f + b1, 0.0)
    f = jnp.maximum(
        jnp.dot(f.astype(jnp.bfloat16), w2.astype(jnp.bfloat16),
                preferred_element_type=jnp.float32) + b2, 0.0)
    return jnp.dot(f.astype(jnp.bfloat16), w3.astype(jnp.bfloat16),
                   preferred_element_type=jnp.float32) + b3


if __name__ == "__main__":
    key = jax.random.PRNGKey(0)
    k_x, k_p = jax.random.split(key)

    # Input as PyTorch would see it: (batch, channels, length) = (2, 4, 16)
    x = jax.random.normal(k_x, (2, 4, 16), jnp.float32)
    conv_params, fc_params = init_params(k_p)

    # One-time preprocessing (outside the per-call hot path).
    prepped, n_out = prepare_params(conv_params, fc_params)

    forward = jax.jit(vgg1d_forward)
    out = forward(x, prepped)
    out = jax.block_until_ready(out)

    ref = reference_forward(x, conv_params, fc_params)
    assert out.shape == (2, 12), out.shape
    assert jnp.allclose(out, ref, atol=1e-4, rtol=1e-3), (
        float(jnp.max(jnp.abs(out - ref))))

    print("KERNEL_OK")
</pallas_src>

<mosaic_0001>
module attributes {stable_mosaic.version = 11 : i64} {
  func.func @vgg1d_fused_kernel(%arg0: memref<2x16x4xf32, #tpu.memory_space<vmem>>, %arg1: memref<3x4x64xbf16, #tpu.memory_space<vmem>>, %arg2: memref<1x64xf32, #tpu.memory_space<vmem>>, %arg3: memref<3x64x128xbf16, #tpu.memory_space<vmem>>, %arg4: memref<1x128xf32, #tpu.memory_space<vmem>>, %arg5: memref<3x128x256xbf16, #tpu.memory_space<vmem>>, %arg6: memref<1x256xf32, #tpu.memory_space<vmem>>, %arg7: memref<256x1024xbf16, #tpu.memory_space<any>>, %arg8: memref<256x1024xbf16, #tpu.memory_space<any>>, %arg9: memref<1x1024xf32, #tpu.memory_space<vmem>>, %arg10: memref<1024x1024xbf16, #tpu.memory_space<any>>, %arg11: memref<1x1024xf32, #tpu.memory_space<vmem>>, %arg12: memref<1024x128xbf16, #tpu.memory_space<any>>, %arg13: memref<1x128xf32, #tpu.memory_space<vmem>>, %arg14: memref<2x128xf32, #tpu.memory_space<vmem>>, %arg15: memref<256x1024xbf16, #tpu.memory_space<vmem>>, %arg16: memref<256x1024xbf16, #tpu.memory_space<vmem>>, %arg17: memref<1024x1024xbf16, #tpu.memory_space<vmem>>, %arg18: memref<1024x128xbf16, #tpu.memory_space<vmem>>, %arg19: memref<4x!tpu.dma_semaphore, #tpu.memory_space<semaphore_mem>>) attributes {dimension_semantics = [], scalar_prefetch = 0 : i64, scratch_operands = 5 : i64, tpu.core_type = #tpu.core_type<tc>} {
    %c0_i32 = arith.constant 0 : i32
    %0 = tpu.memref_slice %arg19[%c0_i32] : memref<4x!tpu.dma_semaphore, #tpu.memory_space<semaphore_mem>> -> memref<1x!tpu.dma_semaphore, #tpu.memory_space<semaphore_mem>>
    %1 = tpu.memref_squeeze %0 : memref<1x!tpu.dma_semaphore, #tpu.memory_space<semaphore_mem>> -> memref<!tpu.dma_semaphore, #tpu.memory_space<semaphore_mem>>
    tpu.enqueue_dma source(%arg7 : memref<256x1024xbf16, #tpu.memory_space<any>>) target(%arg15 : memref<256x1024xbf16, #tpu.memory_space<vmem>>) target_semaphore(%1 : memref<!tpu.dma_semaphore, #tpu.memory_space<semaphore_mem>>)
    %c1_i32 = arith.constant 1 : i32
    %2 = tpu.memref_slice %arg19[%c1_i32] : memref<4x!tpu.dma_semaphore, #tpu.memory_space<semaphore_mem>> -> memref<1x!tpu.dma_semaphore, #tpu.memory_space<semaphore_mem>>
    %3 = tpu.memref_squeeze %2 : memref<1x!tpu.dma_semaphore, #tpu.memory_space<semaphore_mem>> -> memref<!tpu.dma_semaphore, #tpu.memory_space<semaphore_mem>>
    tpu.enqueue_dma source(%arg8 : memref<256x1024xbf16, #tpu.memory_space<any>>) target(%arg16 : memref<256x1024xbf16, #tpu.memory_space<vmem>>) target_semaphore(%3 : memref<!tpu.dma_semaphore, #tpu.memory_space<semaphore_mem>>)
    %c2_i32 = arith.constant 2 : i32
    %4 = tpu.memref_slice %arg19[%c2_i32] : memref<4x!tpu.dma_semaphore, #tpu.memory_space<semaphore_mem>> -> memref<1x!tpu.dma_semaphore, #tpu.memory_space<semaphore_mem>>
    %5 = tpu.memref_squeeze %4 : memref<1x!tpu.dma_semaphore, #tpu.memory_space<semaphore_mem>> -> memref<!tpu.dma_semaphore, #tpu.memory_space<semaphore_mem>>
    tpu.enqueue_dma source(%arg10 : memref<1024x1024xbf16, #tpu.memory_space<any>>) target(%arg17 : memref<1024x1024xbf16, #tpu.memory_space<vmem>>) target_semaphore(%5 : memref<!tpu.dma_semaphore, #tpu.memory_space<semaphore_mem>>)
    %c3_i32 = arith.constant 3 : i32
    %6 = tpu.memref_slice %arg19[%c3_i32] : memref<4x!tpu.dma_semaphore, #tpu.memory_space<semaphore_mem>> -> memref<1x!tpu.dma_semaphore, #tpu.memory_space<semaphore_mem>>
    %7 = tpu.memref_squeeze %6 : memref<1x!tpu.dma_semaphore, #tpu.memory_space<semaphore_mem>> -> memref<!tpu.dma_semaphore, #tpu.memory_space<semaphore_mem>>
    tpu.enqueue_dma source(%arg12 : memref<1024x128xbf16, #tpu.memory_space<any>>) target(%arg18 : memref<1024x128xbf16, #tpu.memory_space<vmem>>) target_semaphore(%7 : memref<!tpu.dma_semaphore, #tpu.memory_space<semaphore_mem>>)
    %c0 = arith.constant 0 : index
    %c0_0 = arith.constant 0 : index
    %c0_1 = arith.constant 0 : index
    %8 = vector.load %arg0[%c0, %c0_0, %c0_1] : memref<2x16x4xf32, #tpu.memory_space<vmem>>, vector<2x16x4xf32>
    %cst = arith.constant 0.000000e+00 : f32
    %9 = vector.broadcast %cst : f32 to vector<2x1x4xf32>
    %10 = tpu.concatenate %9, %8, %9 in 1 : vector<2x1x4xf32>, vector<2x16x4xf32>, vector<2x1x4xf32> -> vector<2x18x4xf32>
    %11 = arith.truncf %10 : vector<2x18x4xf32> to vector<2x18x4xbf16>
    %cst_2 = arith.constant 0.000000e+00 : f32
    %12 = vector.broadcast %cst_2 : f32 to vector<32x64xf32>
    %13 = vector.extract_strided_slice %11 {offsets = [0, 0, 0], sizes = [2, 16, 4], strides = [1, 1, 1]} : vector<2x18x4xbf16> to vector<2x16x4xbf16>
    %14 = vector.shape_cast %13 : vector<2x16x4xbf16> to vector<32x4xbf16>
    %c0_3 = arith.constant 0 : index
    %c0_4 = arith.constant 0 : index
    %c0_5 = arith.constant 0 : index
    %15 = vector.load %arg1[%c0_3, %c0_4, %c0_5] : memref<3x4x64xbf16, #tpu.memory_space<vmem>>, vector<1x4x64xbf16>
    %16 = vector.shape_cast %15 : vector<1x4x64xbf16> to vector<4x64xbf16>
    %cst_6 = arith.constant dense<0.000000e+00> : vector<32x64xf32>
    %17 = tpu.matmul %14, %16, %cst_6 {dimension_numbers = #tpu.dot_dimension_numbers<[1], [0], [0], [1], [0, 0, 1, 1], [], []>} : vector<32x4xbf16>, vector<4x64xbf16>, vector<32x64xf32> -> vector<32x64xf32>
    %18 = arith.addf %12, %17 : vector<32x64xf32>
    %19 = vector.extract_strided_slice %11 {offsets = [0, 1, 0], sizes = [2, 16, 4], strides = [1, 1, 1]} : vector<2x18x4xbf16> to vector<2x16x4xbf16>
    %20 = vector.shape_cast %19 : vector<2x16x4xbf16> to vector<32x4xbf16>
    %c1 = arith.constant 1 : index
    %c0_7 = arith.constant 0 : index
    %c0_8 = arith.constant 0 : index
    %21 = vector.load %arg1[%c1, %c0_7, %c0_8] : memref<3x4x64xbf16, #tpu.memory_space<vmem>>, vector<1x4x64xbf16>
    %22 = vector.shape_cast %21 : vector<1x4x64xbf16> to vector<4x64xbf16>
    %cst_9 = arith.constant dense<0.000000e+00> : vector<32x64xf32>
    %23 = tpu.matmul %20, %22, %cst_9 {dimension_numbers = #tpu.dot_dimension_numbers<[1], [0], [0], [1], [0, 0, 1, 1], [], []>} : vector<32x4xbf16>, vector<4x64xbf16>, vector<32x64xf32> -> vector<32x64xf32>
    %24 = arith.addf %18, %23 : vector<32x64xf32>
    %25 = vector.extract_strided_slice %11 {offsets = [0, 2, 0], sizes = [2, 16, 4], strides = [1, 1, 1]} : vector<2x18x4xbf16> to vector<2x16x4xbf16>
    %26 = vector.shape_cast %25 : vector<2x16x4xbf16> to vector<32x4xbf16>
    %c2 = arith.constant 2 : index
    %c0_10 = arith.constant 0 : index
    %c0_11 = arith.constant 0 : index
    %27 = vector.load %arg1[%c2, %c0_10, %c0_11] : memref<3x4x64xbf16, #tpu.memory_space<vmem>>, vector<1x4x64xbf16>
    %28 = vector.shape_cast %27 : vector<1x4x64xbf16> to vector<4x64xbf16>
    %cst_12 = arith.constant dense<0.000000e+00> : vector<32x64xf32>
    %29 = tpu.matmul %26, %28, %cst_12 {dimension_numbers = #tpu.dot_dimension_numbers<[1], [0], [0], [1], [0, 0, 1, 1], [], []>} : vector<32x4xbf16>, vector<4x64xbf16>, vector<32x64xf32> -> vector<32x64xf32>
    %30 = arith.addf %24, %29 : vector<32x64xf32>
    %c0_13 = arith.constant 0 : index
    %c0_14 = arith.constant 0 : index
    %31 = vector.load %arg2[%c0_13, %c0_14] : memref<1x64xf32, #tpu.memory_space<vmem>>, vector<1x64xf32>
    %32 = vector.broadcast %31 : vector<1x64xf32> to vector<32x64xf32>
    %33 = arith.addf %30, %32 : vector<32x64xf32>
    %cst_15 = arith.constant 0.000000e+00 : f32
    %34 = vector.broadcast %cst_15 : f32 to vector<32x64xf32>
    %35 = arith.maximumf %33, %34 : vector<32x64xf32>
    %36 = vector.shape_cast %35 : vector<32x64xf32> to vector<2x16x64xf32>
    %cst_16 = arith.constant 0.000000e+00 : f32
    %37 = vector.broadcast %cst_16 : f32 to vector<2x1x64xf32>
    %38 = tpu.concatenate %37, %36, %37 in 1 : vector<2x1x64xf32>, vector<2x16x64xf32>, vector<2x1x64xf32> -> vector<2x18x64xf32>
    %39 = arith.truncf %38 : vector<2x18x64xf32> to vector<2x18x64xbf16>
    %cst_17 = arith.constant 0.000000e+00 : f32
    %40 = vector.broadcast %cst_17 : f32 to vector<32x128xf32>
    %41 = vector.extract_strided_slice %39 {offsets = [0, 0, 0], sizes = [2, 16, 64], strides = [1, 1, 1]} : vector<2x18x64xbf16> to vector<2x16x64xbf16>
    %42 = vector.shape_cast %41 : vector<2x16x64xbf16> to vector<32x64xbf16>
    %c0_18 = arith.constant 0 : index
    %c0_19 = arith.constant 0 : index
    %c0_20 = arith.constant 0 : index
    %43 = vector.load %arg3[%c0_18, %c0_19, %c0_20] : memref<3x64x128xbf16, #tpu.memory_space<vmem>>, vector<1x64x128xbf16>
    %44 = vector.shape_cast %43 : vector<1x64x128xbf16> to vector<64x128xbf16>
    %cst_21 = arith.constant dense<0.000000e+00> : vector<32x128xf32>
    %45 = tpu.matmul %42, %44, %cst_21 {dimension_numbers = #tpu.dot_dimension_numbers<[1], [0], [0], [1], [0, 0, 1, 1], [], []>} : vector<32x64xbf16>, vector<64x128xbf16>, vector<32x128xf32> -> vector<32x128xf32>
    %46 = arith.addf %40, %45 : vector<32x128xf32>
    %47 = vector.extract_strided_slice %39 {offsets = [0, 1, 0], sizes = [2, 16, 64], strides = [1, 1, 1]} : vector<2x18x64xbf16> to vector<2x16x64xbf16>
    %48 = vector.shape_cast %47 : vector<2x16x64xbf16> to vector<32x64xbf16>
    %c1_22 = arith.constant 1 : index
    %c0_23 = arith.constant 0 : index
    %c0_24 = arith.constant 0 : index
    %49 = vector.load %arg3[%c1_22, %c0_23, %c0_24] : memref<3x64x128xbf16, #tpu.memory_space<vmem>>, vector<1x64x128xbf16>
    %50 = vector.shape_cast %49 : vector<1x64x128xbf16> to vector<64x128xbf16>
    %cst_25 = arith.constant dense<0.000000e+00> : vector<32x128xf32>
    %51 = tpu.matmul %48, %50, %cst_25 {dimension_numbers = #tpu.dot_dimension_numbers<[1], [0], [0], [1], [0, 0, 1, 1], [], []>} : vector<32x64xbf16>, vector<64x128xbf16>, vector<32x128xf32> -> vector<32x128xf32>
    %52 = arith.addf %46, %51 : vector<32x128xf32>
    %53 = vector.extract_strided_slice %39 {offsets = [0, 2, 0], sizes = [2, 16, 64], strides = [1, 1, 1]} : vector<2x18x64xbf16> to vector<2x16x64xbf16>
    %54 = vector.shape_cast %53 : vector<2x16x64xbf16> to vector<32x64xbf16>
    %c2_26 = arith.constant 2 : index
    %c0_27 = arith.constant 0 : index
    %c0_28 = arith.constant 0 : index
    %55 = vector.load %arg3[%c2_26, %c0_27, %c0_28] : memref<3x64x128xbf16, #tpu.memory_space<vmem>>, vector<1x64x128xbf16>
    %56 = vector.shape_cast %55 : vector<1x64x128xbf16> to vector<64x128xbf16>
    %cst_29 = arith.constant dense<0.000000e+00> : vector<32x128xf32>
    %57 = tpu.matmul %54, %56, %cst_29 {dimension_numbers = #tpu.dot_dimension_numbers<[1], [0], [0], [1], [0, 0, 1, 1], [], []>} : vector<32x64xbf16>, vector<64x128xbf16>, vector<32x128xf32> -> vector<32x128xf32>
    %58 = arith.addf %52, %57 : vector<32x128xf32>
    %c0_30 = arith.constant 0 : index
    %c0_31 = arith.constant 0 : index
    %59 = vector.load %arg4[%c0_30, %c0_31] : memref<1x128xf32, #tpu.memory_space<vmem>>, vector<1x128xf32>
    %60 = vector.broadcast %59 : vector<1x128xf32> to vector<32x128xf32>
    %61 = arith.addf %58, %60 : vector<32x128xf32>
    %cst_32 = arith.constant 0.000000e+00 : f32
    %62 = vector.broadcast %cst_32 : f32 to vector<32x128xf32>
    %63 = arith.maximumf %61, %62 : vector<32x128xf32>
    %64 = vector.shape_cast %63 : vector<32x128xf32> to vector<2x16x128xf32>
    %cst_33 = arith.constant 0.000000e+00 : f32
    %65 = vector.broadcast %cst_33 : f32 to vector<2x1x128xf32>
    %66 = tpu.concatenate %65, %64, %65 in 1 : vector<2x1x128xf32>, vector<2x16x128xf32>, vector<2x1x128xf32> -> vector<2x18x128xf32>
    %67 = arith.truncf %66 : vector<2x18x128xf32> to vector<2x18x128xbf16>
    %cst_34 = arith.constant 0.000000e+00 : f32
    %68 = vector.broadcast %cst_34 : f32 to vector<32x256xf32>
    %69 = vector.extract_strided_slice %67 {offsets = [0, 0, 0], sizes = [2, 16, 128], strides = [1, 1, 1]} : vector<2x18x128xbf16> to vector<2x16x128xbf16>
    %70 = vector.shape_cast %69 : vector<2x16x128xbf16> to vector<32x128xbf16>
    %c0_35 = arith.constant 0 : index
    %c0_36 = arith.constant 0 : index
    %c0_37 = arith.constant 0 : index
    %71 = vector.load %arg5[%c0_35, %c0_36, %c0_37] : memref<3x128x256xbf16, #tpu.memory_space<vmem>>, vector<1x128x256xbf16>
    %72 = vector.shape_cast %71 : vector<1x128x256xbf16> to vector<128x256xbf16>
    %cst_38 = arith.constant dense<0.000000e+00> : vector<32x256xf32>
    %73 = tpu.matmul %70, %72, %cst_38 {dimension_numbers = #tpu.dot_dimension_numbers<[1], [0], [0], [1], [0, 0, 1, 1], [], []>} : vector<32x128xbf16>, vector<128x256xbf16>, vector<32x256xf32> -> vector<32x256xf32>
    %74 = arith.addf %68, %73 : vector<32x256xf32>
    %75 = vector.extract_strided_slice %67 {offsets = [0, 1, 0], sizes = [2, 16, 128], strides = [1, 1, 1]} : vector<2x18x128xbf16> to vector<2x16x128xbf16>
    %76 = vector.shape_cast %75 : vector<2x16x128xbf16> to vector<32x128xbf16>
    %c1_39 = arith.constant 1 : index
    %c0_40 = arith.constant 0 : index
    %c0_41 = arith.constant 0 : index
    %77 = vector.load %arg5[%c1_39, %c0_40, %c0_41] : memref<3x128x256xbf16, #tpu.memory_space<vmem>>, vector<1x128x256xbf16>
    %78 = vector.shape_cast %77 : vector<1x128x256xbf16> to vector<128x256xbf16>
    %cst_42 = arith.constant dense<0.000000e+00> : vector<32x256xf32>
    %79 = tpu.matmul %76, %78, %cst_42 {dimension_numbers = #tpu.dot_dimension_numbers<[1], [0], [0], [1], [0, 0, 1, 1], [], []>} : vector<32x128xbf16>, vector<128x256xbf16>, vector<32x256xf32> -> vector<32x256xf32>
    %80 = arith.addf %74, %79 : vector<32x256xf32>
    %81 = vector.extract_strided_slice %67 {offsets = [0, 2, 0], sizes = [2, 16, 128], strides = [1, 1, 1]} : vector<2x18x128xbf16> to vector<2x16x128xbf16>
    %82 = vector.shape_cast %81 : vector<2x16x128xbf16> to vector<32x128xbf16>
    %c2_43 = arith.constant 2 : index
    %c0_44 = arith.constant 0 : index
    %c0_45 = arith.constant 0 : index
    %83 = vector.load %arg5[%c2_43, %c0_44, %c0_45] : memref<3x128x256xbf16, #tpu.memory_space<vmem>>, vector<1x128x256xbf16>
    %84 = vector.shape_cast %83 : vector<1x128x256xbf16> to vector<128x256xbf16>
    %cst_46 = arith.constant dense<0.000000e+00> : vector<32x256xf32>
    %85 = tpu.matmul %82, %84, %cst_46 {dimension_numbers = #tpu.dot_dimension_numbers<[1], [0], [0], [1], [0, 0, 1, 1], [], []>} : vector<32x128xbf16>, vector<128x256xbf16>, vector<32x256xf32> -> vector<32x256xf32>
    %86 = arith.addf %80, %85 : vector<32x256xf32>
    %c0_47 = arith.constant 0 : index
    %c0_48 = arith.constant 0 : index
    %87 = vector.load %arg6[%c0_47, %c0_48] : memref<1x256xf32, #tpu.memory_space<vmem>>, vector<1x256xf32>
    %88 = vector.broadcast %87 : vector<1x256xf32> to vector<32x256xf32>
    %89 = arith.addf %86, %88 : vector<32x256xf32>
    %cst_49 = arith.constant 0.000000e+00 : f32
    %90 = vector.broadcast %cst_49 : f32 to vector<32x256xf32>
    %91 = arith.maximumf %89, %90 : vector<32x256xf32>
    %92 = vector.shape_cast %91 : vector<32x256xf32> to vector<2x16x256xf32>
    %cst_50 = arith.constant dense<0xFF800000> : vector<2x256xf32>
    %93 = vector.multi_reduction <maximumf>, %92, %cst_50 [1] : vector<2x16x256xf32> to vector<2x256xf32>
    %cst_51 = arith.constant dense<0.000000e+00> : vector<2x256xf32>
    %94 = vector.multi_reduction <add>, %92, %cst_51 [1] : vector<2x16x256xf32> to vector<2x256xf32>
    %cst_52 = arith.constant 1.600000e+01 : f32
    %95 = vector.broadcast %cst_52 : f32 to vector<2x256xf32>
    %96 = arith.divf %94, %95 : vector<2x256xf32>
    %c0_i32_53 = arith.constant 0 : i32
    %97 = tpu.memref_slice %arg19[%c0_i32_53] : memref<4x!tpu.dma_semaphore, #tpu.memory_space<semaphore_mem>> -> memref<1x!tpu.dma_semaphore, #tpu.memory_space<semaphore_mem>>
    %98 = tpu.memref_squeeze %97 : memref<1x!tpu.dma_semaphore, #tpu.memory_space<semaphore_mem>> -> memref<!tpu.dma_semaphore, #tpu.memory_space<semaphore_mem>>
    tpu.wait_dma2 semaphore(%98 : memref<!tpu.dma_semaphore, #tpu.memory_space<semaphore_mem>>) src(%arg7 : memref<256x1024xbf16, #tpu.memory_space<any>>) dst(%arg15 : memref<256x1024xbf16, #tpu.memory_space<vmem>>)
    %c1_i32_54 = arith.constant 1 : i32
    %99 = tpu.memref_slice %arg19[%c1_i32_54] : memref<4x!tpu.dma_semaphore, #tpu.memory_space<semaphore_mem>> -> memref<1x!tpu.dma_semaphore, #tpu.memory_space<semaphore_mem>>
    %100 = tpu.memref_squeeze %99 : memref<1x!tpu.dma_semaphore, #tpu.memory_space<semaphore_mem>> -> memref<!tpu.dma_semaphore, #tpu.memory_space<semaphore_mem>>
    tpu.wait_dma2 semaphore(%100 : memref<!tpu.dma_semaphore, #tpu.memory_space<semaphore_mem>>) src(%arg8 : memref<256x1024xbf16, #tpu.memory_space<any>>) dst(%arg16 : memref<256x1024xbf16, #tpu.memory_space<vmem>>)
    %c2_i32_55 = arith.constant 2 : i32
    %101 = tpu.memref_slice %arg19[%c2_i32_55] : memref<4x!tpu.dma_semaphore, #tpu.memory_space<semaphore_mem>> -> memref<1x!tpu.dma_semaphore, #tpu.memory_space<semaphore_mem>>
    %102 = tpu.memref_squeeze %101 : memref<1x!tpu.dma_semaphore, #tpu.memory_space<semaphore_mem>> -> memref<!tpu.dma_semaphore, #tpu.memory_space<semaphore_mem>>
    tpu.wait_dma2 semaphore(%102 : memref<!tpu.dma_semaphore, #tpu.memory_space<semaphore_mem>>) src(%arg10 : memref<1024x1024xbf16, #tpu.memory_space<any>>) dst(%arg17 : memref<1024x1024xbf16, #tpu.memory_space<vmem>>)
    %c3_i32_56 = arith.constant 3 : i32
    %103 = tpu.memref_slice %arg19[%c3_i32_56] : memref<4x!tpu.dma_semaphore, #tpu.memory_space<semaphore_mem>> -> memref<1x!tpu.dma_semaphore, #tpu.memory_space<semaphore_mem>>
    %104 = tpu.memref_squeeze %103 : memref<1x!tpu.dma_semaphore, #tpu.memory_space<semaphore_mem>> -> memref<!tpu.dma_semaphore, #tpu.memory_space<semaphore_mem>>
    tpu.wait_dma2 semaphore(%104 : memref<!tpu.dma_semaphore, #tpu.memory_space<semaphore_mem>>) src(%arg12 : memref<1024x128xbf16, #tpu.memory_space<any>>) dst(%arg18 : memref<1024x128xbf16, #tpu.memory_space<vmem>>)
    %105 = arith.truncf %93 : vector<2x256xf32> to vector<2x256xbf16>
    %c0_57 = arith.constant 0 : index
    %c0_58 = arith.constant 0 : index
    %106 = vector.load %arg15[%c0_57, %c0_58] : memref<256x1024xbf16, #tpu.memory_space<vmem>>, vector<256x1024xbf16>
    %cst_59 = arith.constant dense<0.000000e+00> : vector<2x1024xf32>
    %107 = tpu.matmul %105, %106, %cst_59 {dimension_numbers = #tpu.dot_dimension_numbers<[1], [0], [0], [1], [0, 0, 1, 1], [], []>} : vector<2x256xbf16>, vector<256x1024xbf16>, vector<2x1024xf32> -> vector<2x1024xf32>
    %108 = arith.truncf %96 : vector<2x256xf32> to vector<2x256xbf16>
    %c0_60 = arith.constant 0 : index
    %c0_61 = arith.constant 0 : index
    %109 = vector.load %arg16[%c0_60, %c0_61] : memref<256x1024xbf16, #tpu.memory_space<vmem>>, vector<256x1024xbf16>
    %cst_62 = arith.constant dense<0.000000e+00> : vector<2x1024xf32>
    %110 = tpu.matmul %108, %109, %cst_62 {dimension_numbers = #tpu.dot_dimension_numbers<[1], [0], [0], [1], [0, 0, 1, 1], [], []>} : vector<2x256xbf16>, vector<256x1024xbf16>, vector<2x1024xf32> -> vector<2x1024xf32>
    %111 = arith.addf %107, %110 : vector<2x1024xf32>
    %c0_63 = arith.constant 0 : index
    %c0_64 = arith.constant 0 : index
    %112 = vector.load %arg9[%c0_63, %c0_64] : memref<1x1024xf32, #tpu.memory_space<vmem>>, vector<1x1024xf32>
    %113 = vector.broadcast %112 : vector<1x1024xf32> to vector<2x1024xf32>
    %114 = arith.addf %111, %113 : vector<2x1024xf32>
    %cst_65 = arith.constant 0.000000e+00 : f32
    %115 = vector.broadcast %cst_65 : f32 to vector<2x1024xf32>
    %116 = arith.maximumf %114, %115 : vector<2x1024xf32>
    %117 = arith.truncf %116 : vector<2x1024xf32> to vector<2x1024xbf16>
    %c0_66 = arith.constant 0 : index
    %c0_67 = arith.constant 0 : index
    %118 = vector.load %arg17[%c0_66, %c0_67] : memref<1024x1024xbf16, #tpu.memory_space<vmem>>, vector<1024x1024xbf16>
    %cst_68 = arith.constant dense<0.000000e+00> : vector<2x1024xf32>
    %119 = tpu.matmul %117, %118, %cst_68 {dimension_numbers = #tpu.dot_dimension_numbers<[1], [0], [0], [1], [0, 0, 1, 1], [], []>} : vector<2x1024xbf16>, vector<1024x1024xbf16>, vector<2x1024xf32> -> vector<2x1024xf32>
    %c0_69 = arith.constant 0 : index
    %c0_70 = arith.constant 0 : index
    %120 = vector.load %arg11[%c0_69, %c0_70] : memref<1x1024xf32, #tpu.memory_space<vmem>>, vector<1x1024xf32>
    %121 = vector.broadcast %120 : vector<1x1024xf32> to vector<2x1024xf32>
    %122 = arith.addf %119, %121 : vector<2x1024xf32>
    %cst_71 = arith.constant 0.000000e+00 : f32
    %123 = vector.broadcast %cst_71 : f32 to vector<2x1024xf32>
    %124 = arith.maximumf %122, %123 : vector<2x1024xf32>
    %125 = arith.truncf %124 : vector<2x1024xf32> to vector<2x1024xbf16>
    %c0_72 = arith.constant 0 : index
    %c0_73 = arith.constant 0 : index
    %126 = vector.load %arg18[%c0_72, %c0_73] : memref<1024x128xbf16, #tpu.memory_space<vmem>>, vector<1024x128xbf16>
    %cst_74 = arith.constant dense<0.000000e+00> : vector<2x128xf32>
    %127 = tpu.matmul %125, %126, %cst_74 {dimension_numbers = #tpu.dot_dimension_numbers<[1], [0], [0], [1], [0, 0, 1, 1], [], []>} : vector<2x1024xbf16>, vector<1024x128xbf16>, vector<2x128xf32> -> vector<2x128xf32>
    %c0_75 = arith.constant 0 : index
    %c0_76 = arith.constant 0 : index
    %128 = vector.load %arg13[%c0_75, %c0_76] : memref<1x128xf32, #tpu.memory_space<vmem>>, vector<1x128xf32>
    %129 = vector.broadcast %128 : vector<1x128xf32> to vector<2x128xf32>
    %130 = arith.addf %127, %129 : vector<2x128xf32>
    %c0_77 = arith.constant 0 : index
    %c0_78 = arith.constant 0 : index
    %131 = vector.load %arg14[%c0_77, %c0_78] : memref<2x128xf32, #tpu.memory_space<vmem>>, vector<2x128xf32>
    tpu.vector_store %arg14[%c0_77, %c0_78], %130 {strides = array<i32>} : memref<2x128xf32, #tpu.memory_space<vmem>>, vector<2x128xf32>,
    return
  }
}

</mosaic_0001>

<bundles_post_ra>
// kernel: vgg1d_forward.1
= control target key start
LH: loop header
LB: loop body
LE: loop exit
PB: predicated region body
PF: predicated region fallthrough
CT: control target
= control target key end

     0   :  { %19 = vsyncpa [#allocation8], 0  ;;  %s9930_s0 = inlined_call_operand.vmem [shape: f32[2,16,4], index: 0, kind: input, shape index: {}]   ;;  %s9931_s1 = inlined_call_operand.hbm [shape: bf16[3,4,64], index: 1, kind: input, shape index: {}]   ;;  %s9932_s2 = inlined_call_operand.hbm [shape: f32[1,64], index: 2, kind: input, shape index: {}]   ;;  %s9933_s3 = inlined_call_operand.hbm [shape: bf16[3,64,128], index: 3, kind: input, shape index: {}]   ;;  %s9934_s4 = inlined_call_operand.hbm [shape: f32[1,128], index: 4, kind: input, shape index: {}]   ;;  %s9935_s5 = inlined_call_operand.hbm [shape: bf16[3,128,256], index: 5, kind: input, shape index: {}]   ;;  %s9936_s6 = inlined_call_operand.hbm [shape: f32[1,256], index: 6, kind: input, shape index: {}]   ;;  %s9937_s7 = inlined_call_operand.hbm [shape: bf16[256,1024], index: 7, kind: input, shape index: {}]   ;;  %s9938_s8 = inlined_call_operand.hbm [shape: bf16[256,1024], index: 8, kind: input, shape index: {}]   ;;  %s9939_s9 = inlined_call_operand.hbm [shape: f32[1,1024], index: 9, kind: input, shape index: {}]   ;;  %s9940_s10 = inlined_call_operand.hbm [shape: bf16[1024,1024], index: 10, kind: input, shape index: {}]   ;;  %s9941_s11 = inlined_call_operand.hbm [shape: f32[1,1024], index: 11, kind: input, shape index: {}]   ;;  %s9942_s12 = inlined_call_operand.hbm [shape: bf16[1024,128], index: 12, kind: input, shape index: {}]   ;;  %s9943_s13 = inlined_call_operand.hbm [shape: f32[1,128], index: 13, kind: input, shape index: {}]   ;;  %s9944_s14 = inlined_call_operand.hbm [shape: f32[2,128], index: 14, kind: output, shape index: {}]  }
   0x1   :  { %20 = vsyncpa [#allocation11], 0 }
   0x2   :  { %21 = vsyncpa [#allocation14], 0 }
   0x3   :  { %22 = vsyncpa [#allocation17], 0 }
   0x4   :  { %23 = vsyncpa [#allocation20], 0 }
   0x5   :  { %24 = vsyncpa [#allocation9], 0  ;;  %s9462_s29 = smov [#allocation10]   ;;  %s9463_s15 = smov [#allocation13]  }
   0x6   :  { %s45_s30 = sshll.u32 %s9462_s29, 4  ;;  %s67_s16 = sshll.u32 %s9463_s15, 4  ;;  %s46_s30 = int_to_ptr.vmem [resolvable:$true] %s45_s30  ;;  %s68_s16 = int_to_ptr.vmem [resolvable:$true] %s67_s16 }
   0x7   :  { %s9170_s17 = scalar_lea.vmem %s46_s30, 16  ;;  %s9174_s18 = scalar_lea.vmem %s46_s30, 32 }
   0x8   :  { %p9171_p0 = scmp.ne.s32.totalorder %s46_s30, %s9170_s17  ;;  %p9175_p1 = scmp.lt.s32.totalorder %s46_s30, %s46_s30 }
   0x9   :  { %p9176_p2 = scmp.lt.s32.totalorder %s9174_s18, %s9170_s17 }
   0xb   :  { %p9177_p3 = por %p9176_p2, %p9175_p1 }
   0xd   :  { %p9178_p4 = pnand %p9177_p3, %p9171_p0 }
   0xf   :  { %9181 = shalt.err (!%p9178_p4)
}
  0x10   :  { %48 = dma.hbm_to_vmem [thread:$0]  %s9932_s2, 16, %s46_s30, [#allocation11]  }
  0x11   :  { %s9190_s21 = scalar_lea.vmem %s68_s16, 16  ;;  %s9194_s22 = scalar_lea.vmem %s68_s16, 32 }
  0x12   :  { %p9191_p5 = scmp.ne.s32.totalorder %s68_s16, %s9190_s21  ;;  %p9195_p6 = scmp.lt.s32.totalorder %s68_s16, %s68_s16 }
  0x13   :  { %p9196_p7 = scmp.lt.s32.totalorder %s9194_s22, %s9190_s21 }
  0x15   :  { %p9197_p8 = por %p9196_p7, %p9195_p6 }
  0x17   :  { %p9198_p9 = pnand %p9197_p8, %p9191_p5 }
  0x19   :  { %9201 = shalt.err (!%p9198_p9)
}
  0x1a   :  { %70 = dma.hbm_to_vmem [thread:$0]  %s9934_s4, 16, %s68_s16, [#allocation14]  }
  0x1b   :  { %s9464_s25 = smov [#allocation16]   ;;  %s9465_s27 = smov [#allocation19]  }
  0x1c   :  { %s89_s26 = sshll.u32 %s9464_s25, 4  ;;  %s109_s28 = sshll.u32 %s9465_s27, 4  ;;  %s90_s26 = int_to_ptr.vmem [resolvable:$true] %s89_s26  ;;  %s110_s28 = int_to_ptr.vmem [resolvable:$true] %s109_s28 }
  0x1d   :  { %s9210_s29 = scalar_lea.vmem %s90_s26, 32  ;;  %p9215_p11 = scmp.lt.s32.totalorder %s90_s26, %s90_s26 }
  0x1e   :  { %p9211_p10 = scmp.ne.s32.totalorder %s90_s26, %s9210_s29  ;;  %p9216_p12 = scmp.lt.s32.totalorder %s9210_s29, %s9210_s29 }
  0x20   :  { %p9217_p13 = por %p9216_p12, %p9215_p11 }
  0x22   :  { %p9218_p0 = pnand %p9217_p13, %p9211_p10 }
  0x24   :  { %9221 = shalt.err (!%p9218_p0)
}
  0x25   :  { %92 = dma.hbm_to_vmem [thread:$0]  %s9936_s6, 32, %s90_s26, [#allocation17]  }
  0x26   :  { %s9230_s15 = scalar_lea.vmem %s110_s28, 128  ;;  %p9235_p2 = scmp.lt.s32.totalorder %s110_s28, %s110_s28 }
  0x27   :  { %p9231_p1 = scmp.ne.s32.totalorder %s110_s28, %s9230_s15  ;;  %p9236_p3 = scmp.lt.s32.totalorder %s9230_s15, %s9230_s15 }
  0x29   :  { %p9237_p4 = por %p9236_p3, %p9235_p2 }
  0x2b   :  { %p9238_p5 = pnand %p9237_p4, %p9231_p1 }
  0x2d   :  { %9241 = shalt.err (!%p9238_p5)
}
  0x2e   :  { %112 = dma.hbm_to_vmem [thread:$0]  %s9941_s11, 128, %s110_s28, [#allocation20]  }
  0x2f   :  { %s9466_s17 = smov [#allocation7]  }
  0x30   :  { %s32_s18 = sshll.u32 %s9466_s17, 4  ;;  %s33_s18 = int_to_ptr.vmem [resolvable:$true] %s32_s18 }
  0x31   :  { %s9250_s19 = scalar_lea.vmem %s33_s18, 96  ;;  %p9255_p7 = scmp.lt.s32.totalorder %s33_s18, %s33_s18 }
  0x32   :  { %p9251_p6 = scmp.ne.s32.totalorder %s33_s18, %s9250_s19  ;;  %p9256_p8 = scmp.lt.s32.totalorder %s9250_s19, %s9250_s19 }
  0x34   :  { %p9257_p9 = por %p9256_p8, %p9255_p7 }
  0x36   :  { %p9258_p10 = pnand %p9257_p9, %p9251_p6 }
  0x38   :  { %9261 = shalt.err (!%p9258_p10)
}
  0x39   :  { %s9467_s6 = smov 32   ;;  %s9468_s20 = smov 2  }
  0x3a   :  { %38 = dma.hbm_to_vmem [thread:$0]  %s9931_s1, 96, %s33_s18, [#allocation8], %s9467_s6, %s9467_s6, %s9468_s20  }
  0x3b   :  { %s9469_s23 = smov [#allocation12]  }
  0x3c   :  { %s54_s24 = sshll.u32 %s9469_s23, 4  ;;  %s55_s24 = int_to_ptr.vmem [resolvable:$true] %s54_s24 }
  0x3d   :  { %s9270_s11 = scalar_lea.vmem %s55_s24, 1536  ;;  %p9275_p12 = scmp.lt.s32.totalorder %s55_s24, %s55_s24 }
  0x3e   :  { %p9271_p11 = scmp.ne.s32.totalorder %s55_s24, %s9270_s11  ;;  %p9276_p13 = scmp.lt.s32.totalorder %s9270_s11, %s9270_s11 }
  0x40   :  { %p9277_p0 = por %p9276_p13, %p9275_p12 }
  0x42   :  { %p9278_p1 = pnand %p9277_p0, %p9271_p11 }
  0x44   :  { %9281 = shalt.err (!%p9278_p1)
}
  0x45   :  { %s9470_s25 = smov 64   ;;  %s9471_s26 = smov 4  }
  0x46   :  { %60 = dma.hbm_to_vmem [thread:$0]  %s9933_s3, 1536, %s55_s24, [#allocation11], %s9470_s25, %s9470_s25, %s9471_s26  }
  0x47   :  { %s9472_s29 = smov [#allocation15]  }
  0x48   :  { %s76_s2 = sshll.u32 %s9472_s29, 4  ;;  %s77_s2 = int_to_ptr.vmem [resolvable:$true] %s76_s2 }
  0x49   :  { %s9290_s1 = scalar_lea.vmem %s77_s2, 6144  ;;  %p9295_p3 = scmp.lt.s32.totalorder %s77_s2, %s77_s2 }
  0x4a   :  { %p9291_p2 = scmp.ne.s32.totalorder %s77_s2, %s9290_s1  ;;  %p9296_p4 = scmp.lt.s32.totalorder %s9290_s1, %s9290_s1 }
  0x4c   :  { %p9297_p5 = por %p9296_p4, %p9295_p3 }
  0x4e   :  { %p9298_p6 = pnand %p9297_p5, %p9291_p2 }
  0x50   :  { %9301 = shalt.err (!%p9298_p6)
}
  0x51   :  { %s9473_s30 = smov 128   ;;  %s9474_s15 = smov 8  }
  0x52   :  { %82 = dma.hbm_to_vmem [thread:$0]  %s9935_s5, 6144, %s77_s2, [#allocation14], %s9473_s30, %s9473_s30, %s9474_s15  }
  0x53   :  { %s9475_s17 = smov [#allocation18]   ;;  %s9476_s3 = smov [#allocation21]  }
  0x54   :  { %s99_s18 = sshll.u32 %s9475_s17, 4  ;;  %s119_s19 = sshll.u32 %s9476_s3, 4  ;;  %s100_s18 = int_to_ptr.vmem [resolvable:$true] %s99_s18  ;;  %s120_s19 = int_to_ptr.vmem [resolvable:$true] %s119_s19 }
  0x55   :  { %s9310_s6 = scalar_lea.vmem %s100_s18, 128  ;;  %p9315_p8 = scmp.lt.s32.totalorder %s100_s18, %s100_s18 }
  0x56   :  { %p9311_p7 = scmp.ne.s32.totalorder %s100_s18, %s9310_s6  ;;  %p9316_p9 = scmp.lt.s32.totalorder %s9310_s6, %s9310_s6 }
  0x58   :  { %p9317_p10 = por %p9316_p9, %p9315_p8 }
  0x5a   :  { %p9318_p11 = pnand %p9317_p10, %p9311_p7 }
  0x5c   :  { %9321 = shalt.err (!%p9318_p11)
}
  0x5d   :  { %102 = dma.hbm_to_vmem [thread:$0]  %s9939_s9, 128, %s100_s18, [#allocation17]  }
  0x5e   :  { %s9330_s22 = scalar_lea.vmem %s120_s19, 16  ;;  %s9334_s5 = scalar_lea.vmem %s120_s19, 32 }
  0x5f   :  { %p9331_p12 = scmp.ne.s32.totalorder %s120_s19, %s9330_s22  ;;  %p9335_p13 = scmp.lt.s32.totalorder %s120_s19, %s120_s19 }
  0x60   :  { %p9336_p0 = scmp.lt.s32.totalorder %s9334_s5, %s9330_s22 }
  0x62   :  { %p9337_p1 = por %p9336_p0, %p9335_p13 }
  0x64   :  { %p9338_p2 = pnand %p9337_p1, %p9331_p12 }
  0x66   :  { %9341 = shalt.err (!%p9338_p2)
}
  0x67   :  { %122 = dma.hbm_to_vmem [thread:$0]  %s9943_s13, 16, %s120_s19, [#allocation20]  }
  0x68   :  { %9442 = dma.done.wait [#allocation8], 96  }
  0x69   :  { %9443 = vsyncadd [#allocation8], 4294967200 }
  0x6a   :  { %9444 = dma.done.wait [#allocation11], 1552  }
  0x6b   :  { %9445 = vsyncadd [#allocation11], 4294965744 }
  0x6c   :  { %9446 = dma.done.wait [#allocation14], 6160  }
  0x6d   :  { %9447 = vsyncadd [#allocation14], 4294961136 }
  0x6e   :  { %9448 = dma.done.wait [#allocation17], 160  }
  0x6f   :  { %9449 = vsyncadd [#allocation17], 4294967136 }
  0x70   :  { %9450 = dma.done.wait [#allocation20], 144  }
  0x71   :  { %9451 = vsyncadd [#allocation20], 4294967152  ;;  %vm262_vm0 = vcmask 1041408   ;;  %v254_v0 = vld [vmem:[#allocation7 + $0x2] sm:$0x3]  ;;  %v199_v2 = vld [vmem:[%s9930_s0 + $0x8] sm:$0xff] }
  0x72   :  { %v198_v1 = vld [vmem:[%s9930_s0] sm:$0xff]  ;;  %vm206_vm1 = vcmask 1040384   ;;  %vm375_vm2 = vcmask 1046528   ;;  %8988 = vmatprep.subr.msk.bf16.mxu1 %vm262_vm0, %v254_v0  ;;  %v264_v3 = vsel %vm262_vm0, %v254_v0, 0  ;;  %v208_v5 = vrot.slane %v199_v2, 7  ;;  %v200_v7 = vld [vmem:[%s9930_s0 + $0x10] sm:$0xff] }
  0x73   :  { %v207_v4 = vrot.slane %v198_v1, 7  ;;  %vm228_vm3 = vsmask.f32 7424  ;;  %vm255_vm4 = vcmask 31744   ;;  %v227_v6 = vld [vmem:[#allocation7] sm:$0x3]  ;;  %8935 = vmatpush3.bf16.msra.mxu1 %v264_v3  ;;  %vm7958_vm6 = vmneg %vm206_vm1 }
  0x74   :  { %v201_v8 = vld [vmem:[%s9930_s0 + $0x18] sm:$0xff]  ;;  %v210_v9 = vrot.slane %v200_v7, 7  ;;  %v320_v10 = vsel %vm262_vm0, %v227_v6, 0  ;;  %v383_v11 = vld [vmem:[#allocation7 + $0x4] sm:$0x3]  ;;  %v221_v14 = vsel %vm206_vm1, %v208_v5, 0.0  ;;  %8989 = vmatprep.subr.msk.bf16.mxu1 %vm262_vm0, %v227_v6 }
  0x75   :  { %v209_v12 = vsel %vm206_vm1, %v207_v4, %v208_v5  ;;  %v219_v13 = vsel %vm206_vm1, 0.0, %v207_v4  ;;  %v211_v15 = vrot.slane %v201_v8, 7  ;;  %8990 = vmatprep.subr.msk.bf16.mxu0 %vm262_vm0, %v383_v11  ;;  %v224_v17 = vpack.c.bf16 %v221_v14, %v221_v14  ;;  %v9013_v44 = vld [vmem:[#allocation12 + $0x18] sm:$0xff]   ;;  %v9014_v45 = vld [vmem:[#allocation12 + $0x10] sm:$0xff]   ;;  %v9016_v47 = vld [vmem:[#allocation12 + $0x8] sm:$0xff]   ;;  %s9479_s0 = smov [#allocation2]  }
  0x76   :  { %v223_v16 = vpack.c.bf16 %v209_v12, %v219_v13  ;;  %v220_v18 = vsel %vm206_vm1, 0.0, %v210_v9  ;;  %v391_v19 = vsel %vm262_vm0, %v383_v11, 0  ;;  %v9015_v46 = vld [vmem:[#allocation12 + $0x38] sm:$0xff]   ;;  %v9017_v48 = vld [vmem:[#allocation12 + $0x30] sm:$0xff]   ;;  %v9018_v49 = vld [vmem:[#allocation12] sm:$0xff]   ;;  %vm550_vm5 = vcmask 523264  }
  0x77   :  { %v212_v20 = vsel %vm206_vm1, %v210_v9, %v211_v15  ;;  %v222_v21 = vsel %vm206_vm1, %v211_v15, 0.0  ;;  %8947 = vmatpush3.bf16.msra.mxu0 %v391_v19  ;;  %v237_v24 = vshll.u32 %v224_v17, 16  ;;  %v377_v28 = vrot.slane %v224_v17, 1  ;;  %v9019_v50 = vld [vmem:[#allocation12 + $0x28] sm:$0xff]   ;;  %v9020_v51 = vld [vmem:[#allocation12 + $0x20] sm:$0xff]   ;;  %v9620_v52 = vld [vmem:[#allocation12 + $0x58] sm:$0xff]  }
  0x78   :  { %v230_v22 = vshrl.u32 %v223_v16, 16  ;;  %v232_v23 = vshll.u32 %v223_v16, 16  ;;  %v225_v25 = vpack.c.bf16 %v212_v20, %v220_v18  ;;  %v226_v26 = vpack.c.bf16 %v222_v21, %v222_v21  ;;  %8964 = vmatprep.subr.bf16.mxu0 %v9013_v44  ;;  %v7906_v61 = vld [vmem:[#allocation10] ss:$0 sm:$0xff]  ;;  %s158_s2 = sshll.u32 %s9479_s0, 4  ;;  %s9480_s1 = smov [#allocation3]   ;;  %s159_s2 = int_to_ptr.vmem [resolvable:$true] %s158_s2 }
  0x79   :  { %v376_v27 = vrot.slane %v223_v16, 1  ;;  %v239_v30 = vrot.slane %v237_v24, 1  ;;  %vm9478_vm7 = vmmov 1   ;;  %s170_s30 = sshll.u32 %s9480_s1, 4  ;;  %s9350_s15 = scalar_lea.vmem %s159_s2, 16384  ;;  %s171_s30 = int_to_ptr.vmem [resolvable:$true] %s170_s30 }
  0x7a   :  { %v234_v29 = vrot.slane %v232_v23, 1  ;;  %v242_v31 = vshrl.u32 %v225_v25, 16  ;;  %v244_v32 = vshll.u32 %v225_v25, 16  ;;  %v249_v33 = vshll.u32 %v226_v26, 16  ;;  %vm9648_vm8 = vmpackc.low %vm9478_vm7, %vm7958_vm6  ;;  %p9351_p3 = scmp.ne.s32.totalorder %s159_s2, %s9350_s15  ;;  %p9355_p4 = scmp.lt.s32.totalorder %s159_s2, %s159_s2 }
  0x7b   :  { %v378_v34 = vsel %vm375_vm2, %v376_v27, %v377_v28  ;;  %v379_v35 = vrot.slane %v225_v25, 1  ;;  %v380_v36 = vrot.slane %v226_v26, 1  ;;  %p9356_p5 = scmp.lt.s32.totalorder %s9350_s15, %s9350_s15 }
  0x7c   :  { %v235_v37 = vor.u32 %v234_v29, %v230_v22  ;;  %v246_v38 = vrot.slane %v244_v32, 1  ;;  %8948 = vmatprep.mubr.msk.bf16.mxu0 %vm255_vm4, %v378_v34  ;;  %v251_v39 = vrot.slane %v249_v33, 1 }
  0x7d   :  { %v381_v40 = vsel %vm375_vm2, %v379_v35, %v380_v36  ;;  %p9357_p6 = por %p9356_p5, %p9355_p4 }
  0x7e   :  { %v240_v41 = vsel %vm228_vm3, %v235_v37, %v239_v30  ;;  %v247_v42 = vor.u32 %v246_v38, %v242_v31  ;;  %8949 = vmatmul.mubr.msk.bf16.vlgmr.msra.gmra.mxu0 %vm255_vm4, %v381_v40 }
  0x7f   :  { %8936 = vmatprep.mubr.msk.bf16.mxu1 %vm255_vm4, %v240_v41  ;;  %8965 = vmatpush3.bf16.msra.mxu0 %v9013_v44  ;;  %p9358_p7 = pnand %p9357_p6, %p9351_p3 }
  0x80   :  { %v252_v43 = vsel %vm228_vm3, %v247_v42, %v251_v39  ;;  %8966 = vmatprep.subr.bf16.mxu0 %v9014_v45 }
  0x81   :  { %8937 = vmatmul.mubr.msk.bf16.vlgmr.msra.gmra.mxu1 %vm255_vm4, %v252_v43 }
  0x82   :  { %8941 = vmatpush3.bf16.msra.mxu1 %v320_v10  ;;  %8942 = vmatprep.mubr.msk.bf16.mxu1 %vm255_vm4, %v223_v16 }
  0x83   :  { %8967 = vmatpush3.bf16.msra.mxu0 %v9014_v45  ;;  %8952 = vmatprep.subr.bf16.mxu1 %v9015_v46 }
  0x84   :  { %8968 = vmatprep.subr.bf16.mxu0 %v9016_v47 }
  0x87   :  { %8969 = vmatpush3.bf16.msra.mxu0 %v9016_v47  ;;  %v9022_v47 = vld [vmem:[#allocation12 + $0x50] sm:$0xff]  }
  0x88   :  { %8970 = vmatprep.subr.bf16.mxu0 %v9018_v49 }
  0x89   :  { %8943 = vmatmul.mubr.msk.bf16.vlgmr.msra.gmra.mxu1 %vm255_vm4, %v225_v25 }
  0x8a   :  { %8953 = vmatpush3.bf16.msra.mxu1 %v9015_v46 }
  0x8b   :  { %8954 = vmatprep.subr.bf16.mxu1 %v9017_v48  ;;  %8971 = vmatpush3.bf16.msra.mxu0 %v9018_v49 }
  0x8e   :  { %8955 = vmatpush3.bf16.msra.mxu1 %v9017_v48 }
  0x8f   :  { %8956 = vmatprep.subr.bf16.mxu1 %v9019_v50 }
  0x92   :  { %8957 = vmatpush3.bf16.msra.mxu1 %v9019_v50  ;;  %v9023_v50 = vld [vmem:[#allocation12 + $0x48] sm:$0xff]  }
  0x93   :  { %8958 = vmatprep.subr.bf16.mxu1 %v9020_v51 }
  0x96   :  { %8959 = vmatpush3.bf16.msra.mxu1 %v9020_v51  ;;  %v9024_v51 = vld [vmem:[#allocation12 + $0x40] sm:$0xff]  }
  0x97   :  { %8976 = vmatprep.subr.bf16.mxu1 %v9620_v52 }
 0x13e   :  { %v8950_v56 = vpop.f32.mrf.mxu0 }
 0x140   :  { %v427_v58 = vpop.f32.mrf.mxu0 }
 0x141   :  { %v8938_v53 = vpop.f32.mrf.mxu1 }
 0x142   :  { %v8951_v1 = vpop.f32.mrf.mxu0 }
 0x143   :  { %v300_v54 = vpop.f32.mrf.mxu1 }
 0x144   :  { %v430_v11 = vpop.f32.mrf.mxu0 }
 0x145   :  { %v8939_v55 = vpop.f32.mrf.mxu1 }
 0x147   :  { %v303_v57 = vpop.f32.mrf.mxu1 }
 0x149   :  { %v8944_v59 = vpop.f32.mrf.mxu1 }
 0x14a   :  { %v365_v60 = vadd.f32 %v8944_v59, %v8938_v53  ;;  %v9033_v59 = vld [vmem:[#allocation15 + $0xf4] ss:$8 sps:$4 sm:$0xff]  }
 0x14b   :  { %v356_v62 = vpop.f32.mrf.mxu1  ;;  %963 = vmatprep.subr.bf16.mxu0 %v9033_v59 }
 0x14c   :  { %v444_v63 = vadd.f32 %v8950_v56, %v365_v60  ;;  %v357_v0 = vadd.f32 %v356_v62, %v300_v54  ;;  %v9027_v56 = vld [vmem:[#allocation15 + $0x74] ss:$8 sps:$4 sm:$0xff]   ;;  %v9031_v60 = vld [vmem:[#allocation15 + $0xf0] ss:$8 sps:$4 sm:$0xff]  }
 0x14d   :  { %v8945_v2 = vpop.f32.mrf.mxu1  ;;  %v9036_v62 = vld [vmem:[#allocation15 + $0x54] ss:$8 sps:$4 sm:$0xff]  }
 0x14e   :  { %v455_v3 = vadd.f32 %v7906_v61, %v444_v63  ;;  %v442_v4 = vadd.f32 %v427_v58, %v357_v0  ;;  %v368_v5 = vadd.f32 %v8945_v2, %v8939_v55  ;;  %v9028_v58 = vld [vmem:[#allocation15 + $0x60] ss:$8 sps:$4 sm:$0xff]   ;;  %v9039_v63 = vld [vmem:[#allocation15 + $0xe4] ss:$8 sps:$4 sm:$0xff]  }
 0x14f   :  { %v359_v6 = vpop.f32.mrf.mxu1  ;;  %v9037_v0 = vld [vmem:[#allocation15 + $0xe0] ss:$8 sps:$4 sm:$0xff]  }
 0x150   :  { %v459_v7 = vmax.f32 %v455_v3, 0.0  ;;  %v453_v8 = vadd.f32 %v7906_v61, %v442_v4  ;;  %v445_v9 = vadd.f32 %v8951_v1, %v368_v5  ;;  %v360_v10 = vadd.f32 %v359_v6, %v303_v57  ;;  %v9025_v57 = vld [vmem:[#allocation15 + $0x70] ss:$8 sps:$4 sm:$0xff]   ;;  %v9042_v1 = vld [vmem:[#allocation15 + $0x44] ss:$8 sps:$4 sm:$0xff]  }
 0x151   :  { %v9040_v2 = vld [vmem:[#allocation15 + $0x40] ss:$8 sps:$4 sm:$0xff]   ;;  %v9045_v3 = vld [vmem:[#allocation15 + $0xd4] ss:$8 sps:$4 sm:$0xff]   ;;  %v9043_v4 = vld [vmem:[#allocation15 + $0xd0] ss:$8 sps:$4 sm:$0xff]  }
 0x152   :  { %v457_v12 = vmax.f32 %v453_v8, 0.0  ;;  %v456_v13 = vadd.f32 %v7906_v61, %v445_v9  ;;  %v443_v14 = vadd.f32 %v430_v11, %v360_v10  ;;  %v468_v15 = vrot.slane %v459_v7, 7  ;;  %v9048_v5 = vld [vmem:[#allocation15 + $0x34] ss:$8 sps:$4 sm:$0xff]   ;;  %v9046_v6 = vld [vmem:[#allocation15 + $0x30] ss:$8 sps:$4 sm:$0xff]  }
 0x153   :  { %v9051_v7 = vld [vmem:[#allocation15 + $0xc4] ss:$8 sps:$4 sm:$0xff]   ;;  %v9049_v8 = vld [vmem:[#allocation15 + $0xc0] ss:$8 sps:$4 sm:$0xff]   ;;  %v9057_v11 = vld [vmem:[#allocation15 + $0xb4] ss:$8 sps:$4 sm:$0xff]  }
 0x154   :  { %v460_v16 = vmax.f32 %v456_v13, 0.0  ;;  %v454_v17 = vadd.f32 %v7906_v61, %v443_v14  ;;  %v465_v18 = vrot.slane %v457_v12, 7  ;;  %v478_v21 = vsel %vm206_vm1, 0.0, %v468_v15  ;;  %v9034_v61 = vld [vmem:[#allocation15 + $0x50] ss:$8 sps:$4 sm:$0xff]  }
 0x155   :  { %v9054_v9 = vld [vmem:[#allocation15 + $0x24] ss:$8 sps:$4 sm:$0xff]   ;;  %v9052_v10 = vld [vmem:[#allocation15 + $0x20] ss:$8 sps:$4 sm:$0xff]   ;;  %v9055_v12 = vld [vmem:[#allocation15 + $0xb0] ss:$8 sps:$4 sm:$0xff]  }
 0x156   :  { %v469_v19 = vrot.slane %v460_v16, 7  ;;  %v458_v20 = vmax.f32 %v454_v17, 0.0  ;;  %v477_v26 = vsel %vm206_vm1, 0.0, %v465_v18  ;;  %v9060_v13 = vld [vmem:[#allocation15 + $0x14] ss:$8 sps:$4 sm:$0xff]  }
 0x157   :  { %v9058_v14 = vld [vmem:[#allocation15 + $0x10] ss:$8 sps:$4 sm:$0xff]   ;;  %v9061_v16 = vld [vmem:[#allocation15 + $0xa0] ss:$8 sps:$4 sm:$0xff]   ;;  %v9066_v17 = vld [vmem:[#allocation15 + $0x4] ss:$8 sps:$4 sm:$0xff]  }
 0x158   :  { %v470_v22 = vsel %vm206_vm1, %v468_v15, %v469_v19  ;;  %v480_v23 = vsel %vm206_vm1, %v469_v19, 0.0  ;;  %v466_v24 = vrot.slane %v458_v20, 7  ;;  %v9063_v15 = vld [vmem:[#allocation15 + $0xa4] ss:$8 sps:$4 sm:$0xff]   ;;  %v9069_v19 = vld [vmem:[#allocation15 + $0x94] ss:$8 sps:$4 sm:$0xff]  }
 0x159   :  { %v483_v25 = vpack.c.bf16 %v470_v22, %v478_v21  ;;  %v484_v27 = vpack.c.bf16 %v480_v23, %v480_v23  ;;  %v9067_v20 = vld [vmem:[#allocation15 + $0x90] ss:$8 sps:$4 sm:$0xff]   ;;  %v9477_v21 = vmov 0   ;;  %v9070_v22 = vld [vmem:[#allocation15 + $0x80] ss:$8 sps:$4 sm:$0xff]  }
 0x15a   :  { %v479_v28 = vsel %vm206_vm1, %v466_v24, 0.0  ;;  %v467_v29 = vsel %vm206_vm1, %v465_v18, %v466_v24  ;;  %v9064_v18 = vld [vmem:[#allocation15] ss:$8 sps:$4 sm:$0xff]   ;;  %v9072_v23 = vld [vmem:[#allocation15 + $0x84] ss:$8 sps:$4 sm:$0xff]  }
 0x15b   :  { %v482_v30 = vpack.c.bf16 %v479_v28, %v479_v28  ;;  %v481_v31 = vpack.c.bf16 %v467_v29, %v477_v26  ;;  %v508_v32 = vshll.u32 %v483_v25, 16  ;;  %v513_v35 = vshll.u32 %v484_v27, 16  ;;  %v9075_v24 = vld [vmem:[#allocation15 + $0x174] ss:$8 sps:$4 sm:$0xff]  }
 0x15c   :  { %v506_v36 = vshrl.u32 %v483_v25, 16  ;;  %v691_v53 = vrot.slane %v484_v27, 1  ;;  %v690_v54 = vrot.slane %v483_v25, 1 }
 0x15d   :  { %8972 = vmatprep.mubr.msk.bf16.mxu0 %vm550_vm5, %v481_v31  ;;  %v496_v33 = vshll.u32 %v481_v31, 16  ;;  %v501_v34 = vshll.u32 %v482_v30, 16  ;;  %v510_v37 = vrot.slane %v508_v32, 1  ;;  %v494_v38 = vshrl.u32 %v481_v31, 16 }
 0x15e   :  { %8973 = vmatmul.mubr.msk.bf16.vlgmr.msra.gmra.mxu0 %vm550_vm5, %v483_v25  ;;  %v687_v43 = vrot.slane %v481_v31, 1  ;;  %v688_v44 = vrot.slane %v482_v30, 1  ;;  %v515_v45 = vrot.slane %v513_v35, 1  ;;  %v692_v55 = vsel %vm375_vm2, %v690_v54, %v691_v53 }
 0x15f   :  { %v498_v39 = vrot.slane %v496_v33, 1  ;;  %v511_v40 = vor.u32 %v510_v37, %v506_v36  ;;  %v503_v42 = vrot.slane %v501_v34, 1  ;;  %964 = vmatpush1.bf16.msra.mxu0 %v9031_v60  ;;  %995 = vmatprep.mubr.bf16.mxu0 %v9477_v21  ;;  %v7925_v34 = vld [vmem:[#allocation13] ss:$0 sm:$0xff] }
 0x160   :  { %v689_v49 = vsel %vm375_vm2, %v687_v43, %v688_v44  ;;  %965 = vmatprep.subr.bf16.mxu0 %v9039_v63 }
 0x161   :  { %v499_v41 = vor.u32 %v498_v39, %v494_v38  ;;  %v516_v48 = vsel %vm228_vm3, %v511_v40, %v515_v45 }
 0x163   :  { %v504_v46 = vsel %vm228_vm3, %v499_v41, %v503_v42  ;;  %966 = vmatpush1.bf16.msra.mxu0 %v9037_v0 }
 0x164   :  { %8960 = vmatprep.mubr.msk.bf16.mxu1 %vm550_vm5, %v504_v46  ;;  %967 = vmatprep.subr.bf16.mxu0 %v9045_v3 }
 0x165   :  { %8961 = vmatmul.mubr.msk.bf16.vlgmr.msra.gmra.mxu1 %vm550_vm5, %v516_v48 }
 0x166   :  { %8977 = vmatpush3.bf16.msra.mxu1 %v9620_v52  ;;  %8984 = vmatprep.mubr.msk.bf16.mxu1 %vm550_vm5, %v689_v49  ;;  %v9030_v52 = vld [vmem:[#allocation15 + $0x64] ss:$8 sps:$4 sm:$0xff]  }
 0x167   :  { %8978 = vmatprep.subr.bf16.mxu1 %v9022_v47  ;;  %968 = vmatpush1.bf16.msra.mxu0 %v9043_v4 }
 0x168   :  { %969 = vmatprep.subr.bf16.mxu0 %v9051_v7 }
 0x16a   :  { %8979 = vmatpush3.bf16.msra.mxu1 %v9022_v47 }
 0x16b   :  { %8980 = vmatprep.subr.bf16.mxu1 %v9023_v50  ;;  %970 = vmatpush1.bf16.msra.mxu0 %v9049_v8 }
 0x16c   :  { %971 = vmatprep.subr.bf16.mxu0 %v9057_v11  ;;  %v9073_v11 = vld [vmem:[#allocation15 + $0x170] ss:$8 sps:$4 sm:$0xff]  }
 0x16e   :  { %8981 = vmatpush3.bf16.msra.mxu1 %v9023_v50 }
 0x16f   :  { %8982 = vmatprep.subr.bf16.mxu1 %v9024_v51  ;;  %972 = vmatpush1.bf16.msra.mxu0 %v9055_v12 }
 0x170   :  { %973 = vmatprep.subr.bf16.mxu0 %v9063_v15 }
 0x172   :  { %8983 = vmatpush3.bf16.msra.mxu1 %v9024_v51 }
 0x173   :  { %1096 = vmatprep.subr.bf16.mxu1 %v9027_v56  ;;  %974 = vmatpush1.bf16.msra.mxu0 %v9061_v16 }
 0x174   :  { %975 = vmatprep.subr.bf16.mxu0 %v9069_v19 }
 0x175   :  { %8985 = vmatmul.mubr.msk.bf16.vlgmr.msra.gmra.mxu1 %vm550_vm5, %v692_v55 }
 0x176   :  { %1097 = vmatpush1.bf16.msra.mxu1 %v9025_v57  ;;  %1128 = vmatprep.mubr.bf16.mxu1 %v9477_v21 }
 0x177   :  { %1098 = vmatprep.subr.bf16.mxu1 %v9030_v52  ;;  %976 = vmatpush1.bf16.msra.mxu0 %v9067_v20 }
 0x178   :  { %977 = vmatprep.subr.bf16.mxu0 %v9072_v23 }
 0x17a   :  { %1099 = vmatpush1.bf16.msra.mxu1 %v9028_v58 }
 0x17b   :  { %1100 = vmatprep.subr.bf16.mxu1 %v9036_v62  ;;  %978 = vmatpush1.bf16.msra.mxu0 %v9070_v22  ;;  %v9081_v22 = vld [vmem:[#allocation15 + $0x154] ss:$8 sps:$4 sm:$0xff]  }
 0x17c   :  { %1258 = vmatprep.subr.bf16.mxu0 %v9075_v24  ;;  %v9079_v24 = vld [vmem:[#allocation15 + $0x150] ss:$8 sps:$4 sm:$0xff]  }
 0x17e   :  { %1101 = vmatpush1.bf16.msra.mxu1 %v9034_v61 }
 0x17f   :  { %1102 = vmatprep.subr.bf16.mxu1 %v9042_v1 }
 0x182   :  { %1103 = vmatpush1.bf16.msra.mxu1 %v9040_v2 }
 0x183   :  { %1104 = vmatprep.subr.bf16.mxu1 %v9048_v5 }
 0x186   :  { %1105 = vmatpush1.bf16.msra.mxu1 %v9046_v6 }
 0x187   :  { %1106 = vmatprep.subr.bf16.mxu1 %v9054_v9 }
 0x18a   :  { %1107 = vmatpush1.bf16.msra.mxu1 %v9052_v10 }
 0x18b   :  { %1108 = vmatprep.subr.bf16.mxu1 %v9060_v13 }
 0x18e   :  { %1109 = vmatpush1.bf16.msra.mxu1 %v9058_v14  ;;  %v9078_v14 = vld [vmem:[#allocation15 + $0x164] ss:$8 sps:$4 sm:$0xff]  }
 0x18f   :  { %1110 = vmatprep.subr.bf16.mxu1 %v9066_v17 }
 0x192   :  { %1111 = vmatpush1.bf16.msra.mxu1 %v9064_v18  ;;  %v9076_v18 = vld [vmem:[#allocation15 + $0x160] ss:$8 sps:$4 sm:$0xff]  }
 0x21e   :  { %v8974_v27 = vpop.f32.mrf.mxu0 }
 0x220   :  { %v668_v29 = vpop.f32.mrf.mxu0 }
 0x222   :  { %v8975_v32 = vpop.f32.mrf.mxu0 }
 0x224   :  { %v671_v41 = vpop.f32.mrf.mxu0 }
 0x225   :  { %v8962_v25 = vpop.f32.mrf.mxu1 }
 0x226   :  { %v677_v31 = vadd.f32 %v8974_v27, %v8962_v25 }
 0x227   :  { %v591_v26 = vpop.f32.mrf.mxu1 }
 0x228   :  { %v669_v35 = vadd.f32 %v668_v29, %v591_v26  ;;  %v9084_v26 = vld [vmem:[#allocation15 + $0x144] ss:$8 sps:$4 sm:$0xff]   ;;  %v9087_v29 = vld [vmem:[#allocation15 + $0x134] ss:$8 sps:$4 sm:$0xff]  }
 0x229   :  { %v8963_v28 = vpop.f32.mrf.mxu1 }
 0x22a   :  { %v680_v38 = vadd.f32 %v8975_v32, %v8963_v28  ;;  %v9082_v28 = vld [vmem:[#allocation15 + $0x140] ss:$8 sps:$4 sm:$0xff]  }
 0x22b   :  { %v594_v30 = vpop.f32.mrf.mxu1  ;;  %v9088_v32 = vld [vmem:[#allocation15 + $0x120] ss:$8 sps:$4 sm:$0xff]  }
 0x22c   :  { %v672_v43 = vadd.f32 %v671_v41, %v594_v30  ;;  %v9085_v30 = vld [vmem:[#allocation15 + $0x130] ss:$8 sps:$4 sm:$0xff]  }
 0x235   :  { %v8986_v33 = vpop.f32.mrf.mxu1 }
 0x236   :  { %v783_v36 = vadd.f32 %v8986_v33, %v677_v31  ;;  %v9090_v31 = vld [vmem:[#allocation15 + $0x124] ss:$8 sps:$4 sm:$0xff]   ;;  %v9093_v33 = vld [vmem:[#allocation15 + $0x114] ss:$8 sps:$4 sm:$0xff]  }
 0x237   :  { %v766_v37 = vpop.f32.mrf.mxu1 }
 0x238   :  { %v794_v39 = vadd.f32 %v7925_v34, %v783_v36  ;;  %v781_v40 = vadd.f32 %v766_v37, %v669_v35  ;;  %v9096_v35 = vld [vmem:[#allocation15 + $0x104] ss:$8 sps:$4 sm:$0xff]   ;;  %v9094_v36 = vld [vmem:[#allocation15 + $0x100] ss:$8 sps:$4 sm:$0xff]  }
 0x239   :  { %v8987_v42 = vpop.f32.mrf.mxu1 }
 0x23a   :  { %v792_v44 = vadd.f32 %v7925_v34, %v781_v40  ;;  %v784_v45 = vadd.f32 %v8987_v42, %v680_v38  ;;  %v798_v47 = vmax.f32 %v794_v39, 0.0 }
 0x23b   :  { %v769_v46 = vpop.f32.mrf.mxu1 }
 0x23c   :  { %v796_v48 = vmax.f32 %v792_v44, 0.0  ;;  %v795_v49 = vadd.f32 %v7925_v34, %v784_v45  ;;  %v782_v50 = vadd.f32 %v769_v46, %v672_v43  ;;  %v807_v54 = vrot.slane %v798_v47, 7 }
 0x23e   :  { %v799_v51 = vmax.f32 %v795_v49, 0.0  ;;  %v793_v53 = vadd.f32 %v7925_v34, %v782_v50  ;;  %v804_v55 = vrot.slane %v796_v48, 7  ;;  %v817_v59 = vsel %vm206_vm1, 0.0, %v807_v54  ;;  %v9091_v34 = vld [vmem:[#allocation15 + $0x110] ss:$8 sps:$4 sm:$0xff]  }
 0x240   :  { %v808_v56 = vrot.slane %v799_v51, 7  ;;  %v797_v57 = vmax.f32 %v793_v53, 0.0  ;;  %v816_v60 = vsel %vm206_vm1, 0.0, %v804_v55 }
 0x242   :  { %v809_v52 = vsel %vm206_vm1, %v807_v54, %v808_v56  ;;  %v805_v58 = vrot.slane %v797_v57, 7  ;;  %v819_v6 = vsel %vm206_vm1, %v808_v56, 0.0 }
 0x243   :  { %v9652_v0 = vpack.c.bf16 %v809_v52, %v817_v59  ;;  %v823_v10 = vpack.c.bf16 %v819_v6, %v819_v6  ;;  %v7964_v16 = vpack.c.bf16 %v809_v52, %v807_v54 }
 0x244   :  { %v806_v61 = vsel %vm206_vm1, %v804_v55, %v805_v58  ;;  %v818_v62 = vsel %vm206_vm1, %v805_v58, 0.0 }
 0x245   :  { %v820_v1 = vpack.c.bf16 %v806_v61, %v816_v60  ;;  %v821_v2 = vpack.c.bf16 %v818_v62, %v818_v62  ;;  %v7960_v3 = vpack.c.bf16 %v806_v61, %v804_v55  ;;  %v855_v9 = vshll.u32 %v9652_v0, 16 }
 0x246   :  { %v853_v19 = vshrl.u32 %v9652_v0, 16  ;;  %v860_v20 = vshll.u32 %v823_v10, 16  ;;  %v1156_v40 = vrot.slane %v9652_v0, 1  ;;  %v1157_v41 = vrot.slane %v823_v10, 1 }
 0x247   :  { %v848_v4 = vshll.u32 %v821_v2, 16  ;;  %7961 = vmatmul.mubr.msk.bf16.vlgmr.msra.gmra.mxu1 %vm9648_vm8, %v7960_v3  ;;  %v843_v5 = vshll.u32 %v820_v1, 16  ;;  %v841_v7 = vshrl.u32 %v820_v1, 16  ;;  %v857_v17 = vrot.slane %v855_v9, 1 }
 0x248   :  { %1138 = vmatprep.mubr.bf16.mxu1 %v9477_v21  ;;  %v862_v25 = vrot.slane %v860_v20, 1  ;;  %v1154_v37 = vrot.slane %v821_v2, 1  ;;  %v1153_v38 = vrot.slane %v820_v1, 1  ;;  %v1158_v42 = vsel %vm375_vm2, %v1156_v40, %v1157_v41 }
 0x249   :  { %v845_v8 = vrot.slane %v843_v5, 1  ;;  %v850_v13 = vrot.slane %v848_v4, 1  ;;  %v858_v23 = vor.u32 %v857_v17, %v853_v19 }
 0x24a   :  { %v1155_v39 = vsel %vm375_vm2, %v1153_v38, %v1154_v37 }
 0x24b   :  { %v846_v12 = vor.u32 %v845_v8, %v841_v7  ;;  %v863_v27 = vsel %vm228_vm3, %v858_v23, %v862_v25 }
 0x24d   :  { %v851_v15 = vsel %vm228_vm3, %v846_v12, %v850_v13 }
 0x24e   :  { %996 = vmatmul.mubr.bf16.vlgmr.msra.gmra.mxu0 %v851_v15 }
 0x24f   :  { %1259 = vmatpush1.bf16.msra.mxu0 %v9073_v11  ;;  %7965 = vmatmul.mubr.msk.bf16.gmra.mxu1 %vm9648_vm8, %v7964_v16 }
 0x250   :  { %1260 = vmatprep.subr.bf16.mxu0 %v9078_v14  ;;  %1005 = vmatprep.mubr.bf16.mxu0 %v9477_v21 }
 0x253   :  { %1261 = vmatpush1.bf16.msra.mxu0 %v9076_v18 }
 0x254   :  { %1262 = vmatprep.subr.bf16.mxu0 %v9081_v22 }
 0x256   :  { %1006 = vmatmul.mubr.bf16.gmra.mxu0 %v863_v27 }
 0x257   :  { %1263 = vmatpush1.bf16.msra.mxu0 %v9079_v24  ;;  %1290 = vmatprep.mubr.bf16.mxu0 %v9477_v21 }
 0x258   :  { %1264 = vmatprep.subr.bf16.mxu0 %v9084_v26 }
 0x25b   :  { %1265 = vmatpush1.bf16.msra.mxu0 %v9082_v28 }
 0x25c   :  { %1266 = vmatprep.subr.bf16.mxu0 %v9087_v29 }
 0x25f   :  { %1267 = vmatpush1.bf16.msra.mxu0 %v9085_v30 }
 0x260   :  { %1268 = vmatprep.subr.bf16.mxu0 %v9090_v31 }
 0x263   :  { %1269 = vmatpush1.bf16.msra.mxu0 %v9088_v32 }
 0x264   :  { %1270 = vmatprep.subr.bf16.mxu0 %v9093_v33 }
 0x267   :  { %1271 = vmatpush1.bf16.msra.mxu0 %v9091_v34 }
 0x268   :  { %1272 = vmatprep.subr.bf16.mxu0 %v9096_v35 }
 0x26b   :  { %1273 = vmatpush1.bf16.msra.mxu0 %v9094_v36 }
 0x26e   :  { %1291 = vmatmul.mubr.bf16.vlgmr.msra.gmra.mxu0 %v1155_v39 }
 0x26f   :  { %1300 = vmatprep.mubr.bf16.mxu0 %v9477_v21 }
 0x276   :  { %1301 = vmatmul.mubr.bf16.gmra.mxu0 %v1158_v42 }
 0x277   :  { %9361 = shalt.err (!%p9358_p7)  }
 0x278   :  { %161 = dma.hbm_to_vmem [thread:$0]  %s9937_s7, 16384, %s159_s2, [#allocation6] }
 0x279   :  { %s9370_s17 = scalar_lea.vmem %s171_s30, 16384  ;;  %p9375_p9 = scmp.lt.s32.totalorder %s171_s30, %s171_s30 }
 0x27a   :  { %p9371_p8 = scmp.ne.s32.totalorder %s171_s30, %s9370_s17  ;;  %p9376_p10 = scmp.lt.s32.totalorder %s9370_s17, %s9370_s17 }
 0x27c   :  { %p9377_p11 = por %p9376_p10, %p9375_p9 }
 0x27e   :  { %p9378_p12 = pnand %p9377_p11, %p9371_p8 }
 0x280   :  { %9381 = shalt.err (!%p9378_p12)  }
 0x281   :  { %173 = dma.hbm_to_vmem [thread:$0]  %s9938_s8, 16384, %s171_s30, [#allocation6 + $0x1] }
 0x282   :  { %s9481_s19 = smov [#allocation4]   ;;  %s9482_s20 = smov [#allocation5]  }
 0x283   :  { %s182_s6 = sshll.u32 %s9481_s19, 4  ;;  %s194_s21 = sshll.u32 %s9482_s20, 4  ;;  %s183_s6 = int_to_ptr.vmem [resolvable:$true] %s182_s6  ;;  %s195_s21 = int_to_ptr.vmem [resolvable:$true] %s194_s21 }
 0x284   :  { %s9390_s22 = scalar_lea.vmem %s183_s6, 65536  ;;  %p9395_p0 = scmp.lt.s32.totalorder %s183_s6, %s183_s6 }
 0x285   :  { %p9391_p13 = scmp.ne.s32.totalorder %s183_s6, %s9390_s22  ;;  %p9396_p1 = scmp.lt.s32.totalorder %s9390_s22, %s9390_s22 }
 0x287   :  { %p9397_p2 = por %p9396_p1, %p9395_p0 }
 0x289   :  { %p9398_p3 = pnand %p9397_p2, %p9391_p13 }
 0x28b   :  { %9401 = shalt.err (!%p9398_p3)  }
 0x28c   :  { %185 = dma.hbm_to_vmem [thread:$0]  %s9940_s10, 65536, %s183_s6, [#allocation6 + $0x2] }
 0x28d   :  { %s9410_s23 = scalar_lea.vmem %s195_s21, 8192  ;;  %p9415_p5 = scmp.lt.s32.totalorder %s195_s21, %s195_s21 }
 0x28e   :  { %p9411_p4 = scmp.ne.s32.totalorder %s195_s21, %s9410_s23  ;;  %p9416_p6 = scmp.lt.s32.totalorder %s9410_s23, %s9410_s23 }
 0x290   :  { %p9417_p7 = por %p9416_p6, %p9415_p5 }
 0x292   :  { %p9418_p8 = pnand %p9417_p7, %p9411_p4 }
 0x294   :  { %9421 = shalt.err (!%p9418_p8)  }
 0x295   :  { %197 = dma.hbm_to_vmem [thread:$0]  %s9942_s12, 8192, %s195_s21, [#allocation6 + $0x3]  ;;  %v1321_v49 = vlaneseq  ;;  %v1319_v52 = vld [vmem:[#allocation16] sm:$0x3] }
 0x297   :  { %v9682_v53 = vshrl.u32 %v1321_v49, 7 }
 0x299   :  { %v9685_v56 = vsub.s32 0, %v9682_v53  ;;  %v9688_v59 = vsub.s32 1, %v9682_v53 }
 0x29b   :  { %v1324_v0 = vrot.slane %v1319_v52, %v9685_v56  ;;  %v1328_v4 = vrot.slane %v1319_v52, %v9688_v59 }
 0x307   :  { %v1130_v46 = vpop.f32.mrf.mxu1 }
 0x309   :  { %v1132_v48 = vpop.f32.mrf.mxu1 }
 0x30b   :  { %v1134_v51 = vpop.f32.mrf.mxu1 }
 0x30d   :  { %v1136_v55 = vpop.f32.mrf.mxu1 }
 0x30e   :  { %v997_v21 = vpop.f32.mrf.mxu0 }
 0x30f   :  { %v1131_v58 = vadd.f32 %v1130_v46, %v997_v21  ;;  %v1140_v61 = vpop.f32.mrf.mxu1 }
 0x310   :  { %v999_v43 = vpop.f32.mrf.mxu0 }
 0x311   :  { %v1133_v62 = vadd.f32 %v1132_v48, %v999_v43  ;;  %v1142_v6 = vpop.f32.mrf.mxu1 }
 0x312   :  { %v1001_v44 = vpop.f32.mrf.mxu0 }
 0x313   :  { %v1135_v2 = vadd.f32 %v1134_v51, %v1001_v44  ;;  %v1144_v16 = vpop.f32.mrf.mxu1 }
 0x314   :  { %v1003_v45 = vpop.f32.mrf.mxu0 }
 0x315   :  { %v1137_v7 = vadd.f32 %v1136_v55, %v1003_v45  ;;  %v1146_v31 = vpop.f32.mrf.mxu1 }
 0x316   :  { %v1007_v47 = vpop.f32.mrf.mxu0 }
 0x317   :  { %v1141_v14 = vadd.f32 %v1140_v61, %v1007_v47 }
 0x318   :  { %v1009_v50 = vpop.f32.mrf.mxu0 }
 0x319   :  { %v1143_v20 = vadd.f32 %v1142_v6, %v1009_v50 }
 0x31a   :  { %v1011_v54 = vpop.f32.mrf.mxu0 }
 0x31b   :  { %v1145_v28 = vadd.f32 %v1144_v16, %v1011_v54 }
 0x31c   :  { %v1013_v57 = vpop.f32.mrf.mxu0 }
 0x31d   :  { %v1147_v36 = vadd.f32 %v1146_v31, %v1013_v57 }
 0x32e   :  { %v1292_v60 = vpop.f32.mrf.mxu0 }
 0x32f   :  { %v1311_v63 = vadd.f32 %v1292_v60, %v1131_v58 }
 0x330   :  { %v1294_v1 = vpop.f32.mrf.mxu0 }
 0x331   :  { %v1312_v3 = vadd.f32 %v1294_v1, %v1133_v62  ;;  %v1331_v8 = vadd.f32 %v1324_v0, %v1311_v63 }
 0x332   :  { %v1296_v5 = vpop.f32.mrf.mxu0 }
 0x333   :  { %v1313_v9 = vadd.f32 %v1296_v5, %v1135_v2  ;;  %v1332_v11 = vadd.f32 %v1328_v4, %v1312_v3  ;;  %v1339_v17 = vmax.f32 %v1331_v8, 0.0 }
 0x334   :  { %v1298_v10 = vpop.f32.mrf.mxu0 }
 0x335   :  { %v1333_v12 = vadd.f32 %v1324_v0, %v1313_v9  ;;  %v1314_v13 = vadd.f32 %v1298_v10, %v1137_v7  ;;  %v1340_v24 = vmax.f32 %v1332_v11, 0.0 }
 0x336   :  { %v1302_v15 = vpop.f32.mrf.mxu0 }
 0x337   :  { %v1341_v18 = vmax.f32 %v1333_v12, 0.0  ;;  %v1334_v19 = vadd.f32 %v1328_v4, %v1314_v13  ;;  %v1315_v22 = vadd.f32 %v1302_v15, %v1141_v14 }
 0x338   :  { %v1304_v23 = vpop.f32.mrf.mxu0 }
 0x339   :  { %v1347_v25 = vmax.f32 %v1339_v17, %v1341_v18  ;;  %v1375_v26 = vadd.f32 %v1341_v18, %v1339_v17  ;;  %v1342_v27 = vmax.f32 %v1334_v19, 0.0  ;;  %v1316_v29 = vadd.f32 %v1304_v23, %v1143_v20 }
 0x33a   :  { %v1306_v30 = vpop.f32.mrf.mxu0  ;;  %v1335_v37 = vadd.f32 %v1324_v0, %v1315_v22 }
 0x33b   :  { %v1348_v32 = vrot.slane %v1347_v25, 4  ;;  %v1376_v33 = vrot.slane %v1375_v26, 4  ;;  %v1354_v34 = vmax.f32 %v1340_v24, %v1342_v27  ;;  %v1382_v35 = vadd.f32 %v1342_v27, %v1340_v24 }
 0x33c   :  { %v1317_v38 = vadd.f32 %v1306_v30, %v1145_v28  ;;  %v1308_v39 = vpop.f32.mrf.mxu0  ;;  %v1336_v43 = vadd.f32 %v1328_v4, %v1316_v29  ;;  %v1343_v50 = vmax.f32 %v1335_v37, 0.0 }
 0x33d   :  { %v1349_v40 = vmax.f32 %v1347_v25, %v1348_v32  ;;  %v1377_v41 = vadd.f32 %v1376_v33, %v1375_v26  ;;  %v1355_v42 = vrot.slane %v1354_v34, 4  ;;  %v1383_v21 = vrot.slane %v1382_v35, 4 }
 0x33e   :  { %v1337_v44 = vadd.f32 %v1324_v0, %v1317_v38  ;;  %v1318_v45 = vadd.f32 %v1308_v39, %v1147_v36  ;;  %v1344_v60 = vmax.f32 %v1336_v43, 0.0 }
 0x33f   :  { %v1350_v46 = vrot.slane %v1349_v40, 2  ;;  %v1378_v47 = vrot.slane %v1377_v41, 2  ;;  %v1356_v48 = vmax.f32 %v1354_v34, %v1355_v42  ;;  %v1384_v49 = vadd.f32 %v1383_v21, %v1382_v35 }
 0x340   :  { %v1345_v51 = vmax.f32 %v1337_v44, 0.0  ;;  %v1338_v54 = vadd.f32 %v1328_v4, %v1318_v45 }
 0x341   :  { %v1351_v55 = vmax.f32 %v1349_v40, %v1350_v46  ;;  %v1379_v52 = vadd.f32 %v1378_v47, %v1377_v41  ;;  %v1357_v57 = vrot.slane %v1356_v48, 2  ;;  %v1385_v58 = vrot.slane %v1384_v49, 2 }
 0x342   :  { %v1361_v61 = vmax.f32 %v1343_v50, %v1345_v51  ;;  %v1389_v62 = vadd.f32 %v1345_v51, %v1343_v50  ;;  %v1346_v63 = vmax.f32 %v1338_v54, 0.0 }
 0x343   :  { %v1352_v1 = vrot.slane %v1351_v55, 1  ;;  %v1380_v2 = vrot.slane %v1379_v52, 1  ;;  %v1358_v3 = vmax.f32 %v1356_v48, %v1357_v57  ;;  %v1386_v0 = vadd.f32 %v1385_v58, %v1384_v49 }
 0x344   :  { %v1362_v5 = vrot.slane %v1361_v61, 4  ;;  %v1390_v6 = vrot.slane %v1389_v62, 4  ;;  %v1368_v7 = vmax.f32 %v1344_v60, %v1346_v63  ;;  %v1396_v8 = vadd.f32 %v1346_v63, %v1344_v60 }
 0x345   :  { %v9692_v9 = vmax.f32 %v1351_v55, %v1352_v1  ;;  %v1381_v10 = vadd.f32 %v1380_v2, %v1379_v52  ;;  %v1359_v4 = vrot.slane %v1358_v3, 1  ;;  %v1387_v11 = vrot.slane %v1386_v0, 1 }
 0x346   :  { %v1363_v12 = vmax.f32 %v1361_v61, %v1362_v5  ;;  %v1391_v13 = vadd.f32 %v1390_v6, %v1389_v62  ;;  %v1369_v14 = vrot.slane %v1368_v7, 4  ;;  %v1397_v15 = vrot.slane %v1396_v8, 4 }
 0x347   :  { %v9694_v16 = vmul.f32 0.0625, %v1381_v10  ;;  %v9696_v17 = vmax.f32 %v1358_v3, %v1359_v4  ;;  %v1388_v18 = vadd.f32 %v1387_v11, %v1386_v0 }
 0x348   :  { %v1364_v19 = vrot.slane %v1363_v12, 2  ;;  %v1392_v20 = vrot.slane %v1391_v13, 2  ;;  %v1370_v22 = vmax.f32 %v1368_v7, %v1369_v14  ;;  %v1398_v23 = vadd.f32 %v1397_v15, %v1396_v8 }
 0x349   :  { %v1405_v24 = vmul.f32 0.0625, %v1388_v18 }
 0x34a   :  { %v1365_v25 = vmax.f32 %v1363_v12, %v1364_v19  ;;  %v1393_v26 = vadd.f32 %v1392_v20, %v1391_v13  ;;  %v1371_v27 = vrot.slane %v1370_v22, 2  ;;  %v1399_v28 = vrot.slane %v1398_v23, 2 }
 0x34c   :  { %v1366_v29 = vrot.slane %v1365_v25, 1  ;;  %v1394_v30 = vrot.slane %v1393_v26, 1  ;;  %v1372_v31 = vmax.f32 %v1370_v22, %v1371_v27  ;;  %v1400_v32 = vadd.f32 %v1399_v28, %v1398_v23 }
 0x34e   :  { %v9698_v33 = vmax.f32 %v1365_v25, %v1366_v29  ;;  %v1395_v34 = vadd.f32 %v1394_v30, %v1393_v26  ;;  %v1373_v35 = vrot.slane %v1372_v31, 1  ;;  %v1401_v36 = vrot.slane %v1400_v32, 1 }
 0x350   :  { %v9700_v37 = vmul.f32 0.0625, %v1395_v34  ;;  %v9702_v38 = vmax.f32 %v1372_v31, %v1373_v35  ;;  %v1402_v39 = vadd.f32 %v1401_v36, %v1400_v32 }
 0x352   :  { %v1407_v40 = vmul.f32 0.0625, %v1402_v39 }
 0x353   :  { %9452 = dma.done.wait [#allocation6], 16384 }
 0x354   :  { %9453 = vsyncadd [#allocation6], 4294950912 }
 0x355   :  { %9454 = dma.done.wait [#allocation6 + $0x1], 16384 }
 0x356   :  { %9455 = vsyncadd [#allocation6 + $0x1], 4294950912 }
 0x357   :  { %9456 = dma.done.wait [#allocation6 + $0x2], 65536 }
 0x358   :  { %9457 = vsyncadd [#allocation6 + $0x2], 4294901760 }
 0x359   :  { %9458 = dma.done.wait [#allocation6 + $0x3], 8192 }
 0x35a   :  { %9459 = vsyncadd [#allocation6 + $0x3], 4294959104  ;;  %v1554_v41 = vpack.c.bf16 %v1405_v24, %v1405_v24  ;;  %v1556_v42 = vpack.c.bf16 %v1407_v40, %v1407_v40  ;;  %vm1693_vm9 = vcmask 1041409   ;;  %v1613_v46 = vld [vmem:[#allocation3 + $0x1c0] sm:$0xff]  ;;  %v1614_v48 = vld [vmem:[#allocation3 + $0x1c8] sm:$0xff]  ;;  %s9483_s10 = smov [#allocation22]  }
 0x35b   :  { %v1617_v47 = vld [vmem:[#allocation3 + $0x1e0] sm:$0xff]  ;;  %v1618_v50 = vld [vmem:[#allocation3 + $0x1e8] sm:$0xff]  ;;  %s7860_s12 = sshll.u32 %s9483_s10, 4  ;;  %s7861_s12 = int_to_ptr.vmem [resolvable:$true] %s7860_s12 }
 0x35c   :  { %v1690_v21 = vunpack.c.l.b16 %v1554_v41  ;;  %v1692_v43 = vunpack.c.l.b16 %v1556_v42  ;;  %v8039_v49 = vcombine.high %v1613_v46, %v1617_v47  ;;  %v8038_v51 = vcombine.low %v1613_v46, %v1617_v47  ;;  %v1605_v54 = vld [vmem:[#allocation3 + $0x180] sm:$0xff]  ;;  %v1606_v60 = vld [vmem:[#allocation3 + $0x188] sm:$0xff]  ;;  %s9422_s9 = scalar_lea.vmem %s7861_s12, 32  ;;  %p9427_p10 = scmp.lt.s32.totalorder %s7861_s12, %s7861_s12 }
 0x35d   :  { %v1609_v55 = vld [vmem:[#allocation3 + $0x1a0] sm:$0xff]  ;;  %v8041_v52 = vcombine.high %v1614_v48, %v1618_v50  ;;  %v8040_v57 = vcombine.low %v1614_v48, %v1618_v50  ;;  %v1610_v61 = vld [vmem:[#allocation3 + $0x1a8] sm:$0xff]  ;;  %p9423_p9 = scmp.ne.s32.totalorder %s7861_s12, %s9422_s9  ;;  %p9428_p11 = scmp.lt.s32.totalorder %s9422_s9, %s9422_s9 }
 0x35e   :  { %v1695_v44 = vsel %vm1693_vm9, %v1692_v43, %v1690_v21  ;;  %v8031_v58 = vcombine.high %v1605_v54, %v1609_v55  ;;  %v1597_v62 = vld [vmem:[#allocation3 + $0x140] sm:$0xff]  ;;  %2340 = vmatprep.subr.bf16.mxu1 %v8039_v49  ;;  %v8033_v63 = vcombine.high %v1606_v60, %v1610_v61  ;;  %v1598_v2 = vld [vmem:[#allocation3 + $0x148] sm:$0xff]  ;;  %v8030_v0 = vcombine.low %v1605_v54, %v1609_v55 }
 0x35f   :  { %v9705_v45 = vpack.c.b16 %v1695_v44, %v1695_v44  ;;  %v1601_v1 = vld [vmem:[#allocation3 + $0x160] sm:$0xff]  ;;  %v1602_v3 = vld [vmem:[#allocation3 + $0x168] sm:$0xff]  ;;  %2381 = vmatprep.subr.bf16.mxu0 %v8041_v52  ;;  %2341 = vmatpush1.bf16.msra.mxu1 %v8038_v51  ;;  %v8032_v5 = vcombine.low %v1606_v60, %v1610_v61  ;;  %p9429_p12 = por %p9428_p11, %p9427_p10 }
 0x360   :  { %2382 = vmatpush1.bf16.msra.mxu0 %v8040_v57  ;;  %2342 = vmatprep.subr.bf16.mxu1 %v8031_v58  ;;  %v8023_v6 = vcombine.high %v1597_v62, %v1601_v1  ;;  %v8025_v7 = vcombine.high %v1598_v2, %v1602_v3  ;;  %v1589_v8 = vld [vmem:[#allocation3 + $0x100] sm:$0xff]  ;;  %v1590_v4 = vld [vmem:[#allocation3 + $0x108] sm:$0xff]  ;;  %v8022_v12 = vcombine.low %v1597_v62, %v1601_v1 }
 0x361   :  { %2372 = vmatprep.mubr.bf16.mxu1 %v9705_v45  ;;  %2413 = vmatprep.mubr.bf16.mxu0 %v9705_v45  ;;  %v1593_v10 = vld [vmem:[#allocation3 + $0x120] sm:$0xff]  ;;  %v1594_v11 = vld [vmem:[#allocation3 + $0x128] sm:$0xff]  ;;  %v8024_v13 = vcombine.low %v1598_v2, %v1602_v3  ;;  %p9430_p13 = pnand %p9429_p12, %p9423_p9 }
 0x362   :  { %2383 = vmatprep.subr.bf16.mxu0 %v8033_v63  ;;  %v8015_v14 = vcombine.high %v1589_v8, %v1593_v10  ;;  %v8017_v15 = vcombine.high %v1590_v4, %v1594_v11  ;;  %v1581_v18 = vld [vmem:[#allocation3 + $0xc0] sm:$0xff]  ;;  %v1582_v20 = vld [vmem:[#allocation3 + $0xc8] sm:$0xff]  ;;  %v8014_v23 = vcombine.low %v1589_v8, %v1593_v10  ;;  %v8016_v24 = vcombine.low %v1590_v4, %v1594_v11 }
 0x363   :  { %2343 = vmatpush1.bf16.msra.mxu1 %v8030_v0  ;;  %v1585_v19 = vld [vmem:[#allocation3 + $0xe0] sm:$0xff]  ;;  %v1586_v22 = vld [vmem:[#allocation3 + $0xe8] sm:$0xff] }
 0x364   :  { %2384 = vmatpush1.bf16.msra.mxu0 %v8032_v5  ;;  %2344 = vmatprep.subr.bf16.mxu1 %v8023_v6  ;;  %v8007_v25 = vcombine.high %v1581_v18, %v1585_v19  ;;  %v8009_v26 = vcombine.high %v1582_v20, %v1586_v22  ;;  %v1573_v27 = vld [vmem:[#allocation3 + $0x80] sm:$0xff]  ;;  %v1574_v29 = vld [vmem:[#allocation3 + $0x88] sm:$0xff]  ;;  %v8006_v31 = vcombine.low %v1581_v18, %v1585_v19 }
 0x365   :  { %2385 = vmatprep.subr.bf16.mxu0 %v8025_v7  ;;  %v1577_v28 = vld [vmem:[#allocation3 + $0xa0] sm:$0xff]  ;;  %v1578_v30 = vld [vmem:[#allocation3 + $0xa8] sm:$0xff]  ;;  %v8008_v32 = vcombine.low %v1582_v20, %v1586_v22 }
 0x366   :  { %v7999_v34 = vcombine.high %v1573_v27, %v1577_v28  ;;  %v8001_v35 = vcombine.high %v1574_v29, %v1578_v30  ;;  %v1565_v36 = vld [vmem:[#allocation3 + $0x40] sm:$0xff]  ;;  %v1566_v40 = vld [vmem:[#allocation3 + $0x48] sm:$0xff]  ;;  %v7998_v42 = vcombine.low %v1573_v27, %v1577_v28  ;;  %v8000_v21 = vcombine.low %v1574_v29, %v1578_v30 }
 0x367   :  { %2345 = vmatpush1.bf16.msra.mxu1 %v8022_v12  ;;  %v1569_v39 = vld [vmem:[#allocation3 + $0x60] sm:$0xff]  ;;  %v1570_v41 = vld [vmem:[#allocation3 + $0x68] sm:$0xff] }
 0x368   :  { %2386 = vmatpush1.bf16.msra.mxu0 %v8024_v13  ;;  %2346 = vmatprep.subr.bf16.mxu1 %v8015_v14  ;;  %v7991_v43 = vcombine.high %v1565_v36, %v1569_v39  ;;  %v7993_v44 = vcombine.high %v1566_v40, %v1570_v41  ;;  %v1557_v46 = vld [vmem:[#allocation3] sm:$0xff]  ;;  %v1558_v48 = vld [vmem:[#allocation3 + $0x8] sm:$0xff]  ;;  %v7990_v50 = vcombine.low %v1565_v36, %v1569_v39 }
 0x369   :  { %2387 = vmatprep.subr.bf16.mxu0 %v8017_v15  ;;  %v1561_v47 = vld [vmem:[#allocation3 + $0x20] sm:$0xff]  ;;  %v1562_v49 = vld [vmem:[#allocation3 + $0x28] sm:$0xff]  ;;  %v7992_v51 = vcombine.low %v1566_v40, %v1570_v41 }
 0x36a   :  { %v7983_v54 = vcombine.high %v1557_v46, %v1561_v47  ;;  %v7985_v55 = vcombine.high %v1558_v48, %v1562_v49  ;;  %v1677_v52 = vld [vmem:[#allocation3 + $0x3c0] sm:$0xff]  ;;  %v1678_v58 = vld [vmem:[#allocation3 + $0x3c8] sm:$0xff]  ;;  %v7982_v61 = vcombine.low %v1557_v46, %v1561_v47  ;;  %v7984_v62 = vcombine.low %v1558_v48, %v1562_v49 }
 0x36b   :  { %2347 = vmatpush1.bf16.msra.mxu1 %v8014_v23  ;;  %v1681_v57 = vld [vmem:[#allocation3 + $0x3e0] sm:$0xff]  ;;  %v1682_v60 = vld [vmem:[#allocation3 + $0x3e8] sm:$0xff] }
 0x36c   :  { %2388 = vmatpush1.bf16.msra.mxu0 %v8016_v24  ;;  %2348 = vmatprep.subr.bf16.mxu1 %v8007_v25  ;;  %v8103_v63 = vcombine.high %v1677_v52, %v1681_v57  ;;  %v8105_v1 = vcombine.high %v1678_v58, %v1682_v60  ;;  %v1669_v2 = vld [vmem:[#allocation3 + $0x380] sm:$0xff]  ;;  %v1670_v0 = vld [vmem:[#allocation3 + $0x388] sm:$0xff]  ;;  %v8102_v6 = vcombine.low %v1677_v52, %v1681_v57 }
 0x36d   :  { %2389 = vmatprep.subr.bf16.mxu0 %v8009_v26  ;;  %v1673_v3 = vld [vmem:[#allocation3 + $0x3a0] sm:$0xff]  ;;  %v1674_v5 = vld [vmem:[#allocation3 + $0x3a8] sm:$0xff]  ;;  %v8104_v7 = vcombine.low %v1678_v58, %v1682_v60  ;;  %v1555_v52 = vpack.c.bf16 %v9700_v37, %v9700_v37 }
 0x36e   :  { %v8095_v8 = vcombine.high %v1669_v2, %v1673_v3  ;;  %v8097_v10 = vcombine.high %v1670_v0, %v1674_v5  ;;  %v1661_v4 = vld [vmem:[#allocation3 + $0x340] sm:$0xff]  ;;  %v1662_v12 = vld [vmem:[#allocation3 + $0x348] sm:$0xff]  ;;  %v8094_v14 = vcombine.low %v1669_v2, %v1673_v3  ;;  %v8096_v15 = vcombine.low %v1670_v0, %v1674_v5 }
 0x36f   :  { %2349 = vmatpush1.bf16.msra.mxu1 %v8006_v31  ;;  %v1665_v11 = vld [vmem:[#allocation3 + $0x360] sm:$0xff]  ;;  %v1666_v13 = vld [vmem:[#allocation3 + $0x368] sm:$0xff]  ;;  %v1691_v0 = vunpack.c.l.b16 %v1555_v52  ;;  %v1576_v52 = vld [vmem:[#allocation3 + $0x98] sm:$0xff] }
 0x370   :  { %2390 = vmatpush1.bf16.msra.mxu0 %v8008_v32  ;;  %2350 = vmatprep.subr.bf16.mxu1 %v7999_v34  ;;  %v8087_v18 = vcombine.high %v1661_v4, %v1665_v11  ;;  %v8089_v19 = vcombine.high %v1662_v12, %v1666_v13  ;;  %v1653_v20 = vld [vmem:[#allocation3 + $0x300] sm:$0xff]  ;;  %v1654_v23 = vld [vmem:[#allocation3 + $0x308] sm:$0xff]  ;;  %v8086_v25 = vcombine.low %v1661_v4, %v1665_v11 }
 0x371   :  { %2391 = vmatprep.subr.bf16.mxu0 %v8001_v35  ;;  %v1657_v22 = vld [vmem:[#allocation3 + $0x320] sm:$0xff]  ;;  %v1658_v24 = vld [vmem:[#allocation3 + $0x328] sm:$0xff]  ;;  %v8088_v26 = vcombine.low %v1662_v12, %v1666_v13 }
 0x372   :  { %v8079_v27 = vcombine.high %v1653_v20, %v1657_v22  ;;  %v8081_v28 = vcombine.high %v1654_v23, %v1658_v24  ;;  %v1645_v29 = vld [vmem:[#allocation3 + $0x2c0] sm:$0xff]  ;;  %v1646_v31 = vld [vmem:[#allocation3 + $0x2c8] sm:$0xff]  ;;  %v8078_v34 = vcombine.low %v1653_v20, %v1657_v22  ;;  %v8080_v35 = vcombine.low %v1654_v23, %v1658_v24  ;;  %v1608_v20 = vld [vmem:[#allocation3 + $0x198] sm:$0xff] }
 0x373   :  { %2351 = vmatpush1.bf16.msra.mxu1 %v7998_v42  ;;  %v1649_v30 = vld [vmem:[#allocation3 + $0x2e0] sm:$0xff]  ;;  %v1650_v32 = vld [vmem:[#allocation3 + $0x2e8] sm:$0xff]  ;;  %v1612_v22 = vld [vmem:[#allocation3 + $0x1b8] sm:$0xff] }
 0x374   :  { %2392 = vmatpush1.bf16.msra.mxu0 %v8000_v21  ;;  %2352 = vmatprep.subr.bf16.mxu1 %v7991_v43  ;;  %v8071_v36 = vcombine.high %v1645_v29, %v1649_v30  ;;  %v8073_v39 = vcombine.high %v1646_v31, %v1650_v32  ;;  %v1637_v40 = vld [vmem:[#allocation3 + $0x280] sm:$0xff]  ;;  %v1638_v42 = vld [vmem:[#allocation3 + $0x288] sm:$0xff]  ;;  %v8070_v43 = vcombine.low %v1645_v29, %v1649_v30  ;;  %v1604_v30 = vld [vmem:[#allocation3 + $0x178] sm:$0xff] }
 0x375   :  { %2393 = vmatprep.subr.bf16.mxu0 %v7993_v44  ;;  %v1641_v41 = vld [vmem:[#allocation3 + $0x2a0] sm:$0xff]  ;;  %v1642_v21 = vld [vmem:[#allocation3 + $0x2a8] sm:$0xff]  ;;  %v8072_v44 = vcombine.low %v1646_v31, %v1650_v32  ;;  %v8037_v29 = vcombine.high %v1608_v20, %v1612_v22  ;;  %v8036_v32 = vcombine.low %v1608_v20, %v1612_v22  ;;  %v1684_v22 = vld [vmem:[#allocation3 + $0x3f8] sm:$0xff] }
 0x376   :  { %v8063_v46 = vcombine.high %v1637_v40, %v1641_v41  ;;  %v8065_v47 = vcombine.high %v1638_v42, %v1642_v21  ;;  %v1629_v48 = vld [vmem:[#allocation3 + $0x240] sm:$0xff]  ;;  %v8064_v57 = vcombine.low %v1638_v42, %v1642_v21 }
 0x377   :  { %2353 = vmatpush1.bf16.msra.mxu1 %v7990_v50  ;;  %v1633_v49 = vld [vmem:[#allocation3 + $0x260] sm:$0xff]  ;;  %v1630_v50 = vld [vmem:[#allocation3 + $0x248] sm:$0xff] }
 0x378   :  { %2394 = vmatpush1.bf16.msra.mxu0 %v7992_v51  ;;  %2354 = vmatprep.subr.bf16.mxu1 %v7983_v54  ;;  %v1634_v51 = vld [vmem:[#allocation3 + $0x268] sm:$0xff]  ;;  %v8062_v54 = vcombine.low %v1637_v40, %v1641_v41  ;;  %v8055_v58 = vcombine.high %v1629_v48, %v1633_v49  ;;  %v8054_v2 = vcombine.low %v1629_v48, %v1633_v49  ;;  %v1596_v41 = vld [vmem:[#allocation3 + $0x138] sm:$0xff] }
 0x379   :  { %2395 = vmatprep.subr.bf16.mxu0 %v7985_v55  ;;  %v1553_v55 = vpack.c.bf16 %v9694_v16, %v9694_v16  ;;  %v8057_v60 = vcombine.high %v1630_v50, %v1634_v51  ;;  %v8056_v16 = vcombine.low %v1630_v50, %v1634_v51  ;;  %v1588_v49 = vld [vmem:[#allocation3 + $0xf8] sm:$0xff] }
 0x37b   :  { %2355 = vmatpush1.bf16.msra.mxu1 %v7982_v61  ;;  %v1621_v61 = vld [vmem:[#allocation3 + $0x200] sm:$0xff]  ;;  %v1689_v3 = vunpack.c.l.b16 %v1553_v55  ;;  %v1575_v55 = vld [vmem:[#allocation3 + $0x90] sm:$0xff] }
 0x37c   :  { %2396 = vmatpush1.bf16.msra.mxu0 %v7984_v62  ;;  %2356 = vmatprep.subr.bf16.mxu1 %v8103_v63  ;;  %v1625_v62 = vld [vmem:[#allocation3 + $0x220] sm:$0xff]  ;;  %v1622_v63 = vld [vmem:[#allocation3 + $0x208] sm:$0xff] }
 0x37d   :  { %2397 = vmatprep.subr.bf16.mxu0 %v8105_v1  ;;  %v1626_v1 = vld [vmem:[#allocation3 + $0x228] sm:$0xff]  ;;  %v8047_v5 = vcombine.high %v1621_v61, %v1625_v62  ;;  %v8046_v4 = vcombine.low %v1621_v61, %v1625_v62  ;;  %v1694_v11 = vsel %vm1693_vm9, %v1691_v0, %v1689_v3  ;;  %v1572_v0 = vld [vmem:[#allocation3 + $0x78] sm:$0xff] }
 0x37e   :  { %v8049_v37 = vcombine.high %v1622_v63, %v1626_v1  ;;  %v8048_v12 = vcombine.low %v1622_v63, %v1626_v1  ;;  %v1567_v63 = vld [vmem:[#allocation3 + $0x50] sm:$0xff] }
 0x37f   :  { %2357 = vmatpush2.bf16.msra.mxu1 %v8102_v6  ;;  %v1615_v6 = vld [vmem:[#allocation3 + $0x1d0] sm:$0xff] }
 0x380   :  { %2398 = vmatpush2.bf16.msra.mxu0 %v8104_v7  ;;  %2358 = vmatprep.subr.bf16.mxu1 %v8095_v8  ;;  %v1619_v7 = vld [vmem:[#allocation3 + $0x1f0] sm:$0xff]  ;;  %v1616_v8 = vld [vmem:[#allocation3 + $0x1d8] sm:$0xff] }
 0x381   :  { %2399 = vmatprep.subr.bf16.mxu0 %v8097_v10  ;;  %v1620_v10 = vld [vmem:[#allocation3 + $0x1f8] sm:$0xff]  ;;  %v8043_v13 = vcombine.high %v1615_v6, %v1619_v7  ;;  %v8042_v23 = vcombine.low %v1615_v6, %v1619_v7  ;;  %v1571_v1 = vld [vmem:[#allocation3 + $0x70] sm:$0xff] }
 0x382   :  { %v8044_v24 = vcombine.low %v1616_v8, %v1620_v10  ;;  %v1559_v6 = vld [vmem:[#allocation3 + $0x10] sm:$0xff] }
 0x383   :  { %2359 = vmatpush2.bf16.msra.mxu1 %v8094_v14  ;;  %v8045_v14 = vcombine.high %v1616_v8, %v1620_v10  ;;  %v1563_v7 = vld [vmem:[#allocation3 + $0x30] sm:$0xff]  ;;  %v1560_v8 = vld [vmem:[#allocation3 + $0x18] sm:$0xff] }
 0x384   :  { %2400 = vmatpush2.bf16.msra.mxu0 %v8096_v15  ;;  %2360 = vmatprep.subr.bf16.mxu1 %v8087_v18  ;;  %v1607_v15 = vld [vmem:[#allocation3 + $0x190] sm:$0xff] }
 0x385   :  { %2401 = vmatprep.subr.bf16.mxu0 %v8089_v19  ;;  %v1611_v18 = vld [vmem:[#allocation3 + $0x1b0] sm:$0xff]  ;;  %v9714_v19 = vpack.c.b16 %v1694_v11, %v1694_v11  ;;  %v7994_v11 = vcombine.low %v1567_v63, %v1571_v1 }
 0x386   :  { %v8034_v31 = vcombine.low %v1607_v15, %v1611_v18 }
 0x387   :  { %2361 = vmatpush2.bf16.msra.mxu1 %v8086_v25  ;;  %v8035_v25 = vcombine.high %v1607_v15, %v1611_v18  ;;  %v1683_v15 = vld [vmem:[#allocation3 + $0x3f0] sm:$0xff]  ;;  %v1680_v18 = vld [vmem:[#allocation3 + $0x3d8] sm:$0xff] }
 0x388   :  { %2402 = vmatpush2.bf16.msra.mxu0 %v8088_v26  ;;  %2362 = vmatprep.subr.bf16.mxu1 %v8079_v27  ;;  %v1599_v26 = vld [vmem:[#allocation3 + $0x150] sm:$0xff] }
 0x389   :  { %2403 = vmatprep.subr.bf16.mxu0 %v8081_v28  ;;  %v1603_v27 = vld [vmem:[#allocation3 + $0x170] sm:$0xff]  ;;  %v1600_v28 = vld [vmem:[#allocation3 + $0x158] sm:$0xff] }
 0x38a   :  { %v8029_v40 = vcombine.high %v1600_v28, %v1604_v30  ;;  %v8026_v42 = vcombine.low %v1599_v26, %v1603_v27  ;;  %v8028_v21 = vcombine.low %v1600_v28, %v1604_v30  ;;  %v1672_v28 = vld [vmem:[#allocation3 + $0x398] sm:$0xff] }
 0x38b   :  { %2363 = vmatpush2.bf16.msra.mxu1 %v8078_v34  ;;  %v8027_v34 = vcombine.high %v1599_v26, %v1603_v27  ;;  %v1671_v26 = vld [vmem:[#allocation3 + $0x390] sm:$0xff]  ;;  %v1676_v30 = vld [vmem:[#allocation3 + $0x3b8] sm:$0xff] }
 0x38c   :  { %2404 = vmatpush2.bf16.msra.mxu0 %v8080_v35  ;;  %2364 = vmatprep.subr.bf16.mxu1 %v8071_v36  ;;  %v1591_v35 = vld [vmem:[#allocation3 + $0x110] sm:$0xff] }
 0x38d   :  { %2405 = vmatprep.subr.bf16.mxu0 %v8073_v39  ;;  %v1595_v36 = vld [vmem:[#allocation3 + $0x130] sm:$0xff]  ;;  %v1592_v39 = vld [vmem:[#allocation3 + $0x118] sm:$0xff] }
 0x38e   :  { %v8021_v48 = vcombine.high %v1592_v39, %v1596_v41  ;;  %v8018_v50 = vcombine.low %v1591_v35, %v1595_v36  ;;  %v8020_v51 = vcombine.low %v1592_v39, %v1596_v41  ;;  %v1675_v27 = vld [vmem:[#allocation3 + $0x3b0] sm:$0xff]  ;;  %v1664_v39 = vld [vmem:[#allocation3 + $0x358] sm:$0xff] }
 0x38f   :  { %2365 = vmatpush2.bf16.msra.mxu1 %v8070_v43  ;;  %v8019_v43 = vcombine.high %v1591_v35, %v1595_v36  ;;  %v1663_v35 = vld [vmem:[#allocation3 + $0x350] sm:$0xff]  ;;  %v1668_v41 = vld [vmem:[#allocation3 + $0x378] sm:$0xff] }
 0x390   :  { %2406 = vmatpush2.bf16.msra.mxu0 %v8072_v44  ;;  %2366 = vmatprep.subr.bf16.mxu1 %v8063_v46  ;;  %v1583_v44 = vld [vmem:[#allocation3 + $0xd0] sm:$0xff] }
 0x391   :  { %2407 = vmatprep.subr.bf16.mxu0 %v8065_v47  ;;  %v1587_v46 = vld [vmem:[#allocation3 + $0xf0] sm:$0xff]  ;;  %v1584_v47 = vld [vmem:[#allocation3 + $0xd8] sm:$0xff] }
 0x392   :  { %v8012_v61 = vcombine.low %v1584_v47, %v1588_v49  ;;  %v1667_v36 = vld [vmem:[#allocation3 + $0x370] sm:$0xff] }
 0x393   :  { %2367 = vmatpush2.bf16.msra.mxu1 %v8062_v54  ;;  %v8011_v54 = vcombine.high %v1583_v44, %v1587_v46 }
 0x394   :  { %2408 = vmatpush2.bf16.msra.mxu0 %v8064_v57  ;;  %2368 = vmatprep.subr.bf16.mxu1 %v8055_v58  ;;  %v8013_v57 = vcombine.high %v1584_v47, %v1588_v49  ;;  %v1580_v58 = vld [vmem:[#allocation3 + $0xb8] sm:$0xff] }
 0x395   :  { %2409 = vmatprep.subr.bf16.mxu0 %v8057_v60  ;;  %v8010_v60 = vcombine.low %v1583_v44, %v1587_v46  ;;  %v8005_v3 = vcombine.high %v1576_v52, %v1580_v58  ;;  %v1655_v44 = vld [vmem:[#allocation3 + $0x310] sm:$0xff]  ;;  %v1656_v47 = vld [vmem:[#allocation3 + $0x318] sm:$0xff] }
 0x396   :  { %v1659_v46 = vld [vmem:[#allocation3 + $0x330] sm:$0xff]  ;;  %v1660_v49 = vld [vmem:[#allocation3 + $0x338] sm:$0xff] }
 0x397   :  { %2369 = vmatpush2.bf16.msra.mxu1 %v8054_v2  ;;  %v1568_v2 = vld [vmem:[#allocation3 + $0x58] sm:$0xff] }
 0x398   :  { %2410 = vmatpush2.bf16.msra.mxu0 %v8056_v16  ;;  %2370 = vmatprep.subr.bf16.mxu1 %v8047_v5  ;;  %v8004_v5 = vcombine.low %v1576_v52, %v1580_v58  ;;  %v7997_v10 = vcombine.high %v1568_v2, %v1572_v0  ;;  %v1648_v52 = vld [vmem:[#allocation3 + $0x2d8] sm:$0xff] }
 0x399   :  { %2411 = vmatprep.subr.bf16.mxu0 %v8049_v37  ;;  %v7995_v37 = vcombine.high %v1567_v63, %v1571_v1  ;;  %v1652_v58 = vld [vmem:[#allocation3 + $0x2f8] sm:$0xff]  ;;  %v1639_v63 = vld [vmem:[#allocation3 + $0x290] sm:$0xff] }
 0x39a   :  { %v1643_v1 = vld [vmem:[#allocation3 + $0x2b0] sm:$0xff] }
 0x39b   :  { %2371 = vmatpush2.bf16.msra.mxu1 %v8046_v4  ;;  %v1564_v4 = vld [vmem:[#allocation3 + $0x38] sm:$0xff] }
 0x39c   :  { %2412 = vmatpush2.bf16.msra.mxu0 %v8048_v12  ;;  %2422 = vmatprep.subr.bf16.mxu1 %v8043_v13  ;;  %v7996_v12 = vcombine.low %v1568_v2, %v1572_v0  ;;  %v7987_v13 = vcombine.high %v1559_v6, %v1563_v7  ;;  %v7989_v20 = vcombine.high %v1560_v8, %v1564_v4  ;;  %v1640_v2 = vld [vmem:[#allocation3 + $0x298] sm:$0xff] }
 0x39d   :  { %2463 = vmatprep.subr.bf16.mxu0 %v8045_v14  ;;  %v1679_v14 = vld [vmem:[#allocation3 + $0x3d0] sm:$0xff]  ;;  %v1644_v0 = vld [vmem:[#allocation3 + $0x2b8] sm:$0xff] }
 0x39e   :  { %2373 = vmatmul.mubr.bf16.vlgmr.msra.gmra.mxu1 %v9714_v19 }
 0x39f   :  { %2414 = vmatmul.mubr.bf16.vlgmr.msra.gmra.mxu0 %v9714_v19  ;;  %2423 = vmatpush1.bf16.msra.mxu1 %v8042_v23  ;;  %v7986_v23 = vcombine.low %v1559_v6, %v1563_v7  ;;  %v1631_v6 = vld [vmem:[#allocation3 + $0x250] sm:$0xff] }
 0x3a0   :  { %2464 = vmatpush1.bf16.msra.mxu0 %v8044_v24  ;;  %2424 = vmatprep.subr.bf16.mxu1 %v8035_v25  ;;  %v7988_v24 = vcombine.low %v1560_v8, %v1564_v4  ;;  %v8107_v25 = vcombine.high %v1679_v14, %v1683_v15  ;;  %v1635_v7 = vld [vmem:[#allocation3 + $0x270] sm:$0xff]  ;;  %v1632_v8 = vld [vmem:[#allocation3 + $0x258] sm:$0xff] }
 0x3a1   :  { %2465 = vmatprep.subr.bf16.mxu0 %v8037_v29  ;;  %2454 = vmatprep.mubr.bf16.mxu1 %v9705_v45  ;;  %v8109_v29 = vcombine.high %v1680_v18, %v1684_v22  ;;  %v1636_v4 = vld [vmem:[#allocation3 + $0x278] sm:$0xff] }
 0x3a2   :  { %2495 = vmatprep.mubr.bf16.mxu0 %v9705_v45  ;;  %v1579_v45 = vld [vmem:[#allocation3 + $0xb0] sm:$0xff] }
 0x3a3   :  { %2425 = vmatpush1.bf16.msra.mxu1 %v8034_v31  ;;  %v8003_v62 = vcombine.high %v1575_v55, %v1579_v45  ;;  %v8002_v16 = vcombine.low %v1575_v55, %v1579_v45  ;;  %v8106_v31 = vcombine.low %v1679_v14, %v1683_v15  ;;  %v1647_v55 = vld [vmem:[#allocation3 + $0x2d0] sm:$0xff] }
 0x3a4   :  { %2466 = vmatpush1.bf16.msra.mxu0 %v8036_v32  ;;  %2426 = vmatprep.subr.bf16.mxu1 %v8027_v34  ;;  %v8108_v32 = vcombine.low %v1680_v18, %v1684_v22  ;;  %v8099_v34 = vcombine.high %v1671_v26, %v1675_v27  ;;  %v1651_v45 = vld [vmem:[#allocation3 + $0x2f0] sm:$0xff]  ;;  %v1624_v18 = vld [vmem:[#allocation3 + $0x218] sm:$0xff] }
 0x3a5   :  { %2467 = vmatprep.subr.bf16.mxu0 %v8029_v40  ;;  %v8101_v40 = vcombine.high %v1672_v28, %v1676_v30  ;;  %v1623_v14 = vld [vmem:[#allocation3 + $0x210] sm:$0xff]  ;;  %v1628_v22 = vld [vmem:[#allocation3 + $0x238] sm:$0xff] }
 0x3a6   :  { %v1627_v15 = vld [vmem:[#allocation3 + $0x230] sm:$0xff] }
 0x3a7   :  { %2427 = vmatpush1.bf16.msra.mxu1 %v8026_v42  ;;  %v8098_v42 = vcombine.low %v1671_v26, %v1675_v27  ;;  %v8060_v26 = vcombine.low %v1632_v8, %v1636_v4  ;;  %v8051_v27 = vcombine.high %v1623_v14, %v1627_v15 }
 0x3a8   :  { %2468 = vmatpush1.bf16.msra.mxu0 %v8028_v21  ;;  %2428 = vmatprep.subr.bf16.mxu1 %v8019_v43  ;;  %v8100_v21 = vcombine.low %v1672_v28, %v1676_v30  ;;  %v8091_v43 = vcombine.high %v1663_v35, %v1667_v36  ;;  %v1481_v28 = vld [vmem:[#allocation2 + $0x1c0] sm:$0xff]  ;;  %v1482_v30 = vld [vmem:[#allocation2 + $0x1c8] sm:$0xff] }
 0x3a9   :  { %2469 = vmatprep.subr.bf16.mxu0 %v8021_v48  ;;  %v8093_v48 = vcombine.high %v1664_v39, %v1668_v41 }
 0x3ab   :  { %2429 = vmatpush1.bf16.msra.mxu1 %v8018_v50  ;;  %v8090_v50 = vcombine.low %v1663_v35, %v1667_v36  ;;  %v8050_v36 = vcombine.low %v1623_v14, %v1627_v15 }
 0x3ac   :  { %2470 = vmatpush1.bf16.msra.mxu0 %v8020_v51  ;;  %2430 = vmatprep.subr.bf16.mxu1 %v8011_v54  ;;  %v8092_v51 = vcombine.low %v1664_v39, %v1668_v41  ;;  %v8083_v54 = vcombine.high %v1655_v44, %v1659_v46  ;;  %v1473_v39 = vld [vmem:[#allocation2 + $0x180] sm:$0xff]  ;;  %v1474_v41 = vld [vmem:[#allocation2 + $0x188] sm:$0xff] }
 0x3ad   :  { %2471 = vmatprep.subr.bf16.mxu0 %v8013_v57  ;;  %v8085_v57 = vcombine.high %v1656_v47, %v1660_v49 }
 0x3af   :  { %2431 = vmatpush1.bf16.msra.mxu1 %v8010_v60  ;;  %v8082_v60 = vcombine.low %v1655_v44, %v1659_v46 }
 0x3b0   :  { %2472 = vmatpush1.bf16.msra.mxu0 %v8012_v61  ;;  %2432 = vmatprep.subr.bf16.mxu1 %v8003_v62  ;;  %v8084_v61 = vcombine.low %v1656_v47, %v1660_v49  ;;  %v8075_v62 = vcombine.high %v1647_v55, %v1651_v45  ;;  %v1465_v49 = vld [vmem:[#allocation2 + $0x140] sm:$0xff] }
 0x3b1   :  { %2473 = vmatprep.subr.bf16.mxu0 %v8005_v3  ;;  %v8077_v3 = vcombine.high %v1648_v52, %v1652_v58 }
 0x3b3   :  { %2433 = vmatpush1.bf16.msra.mxu1 %v8002_v16  ;;  %v8074_v16 = vcombine.low %v1647_v55, %v1651_v45  ;;  %v1470_v55 = vld [vmem:[#allocation2 + $0x168] sm:$0xff] }
 0x3b4   :  { %2474 = vmatpush1.bf16.msra.mxu0 %v8004_v5  ;;  %2434 = vmatprep.subr.bf16.mxu1 %v7995_v37  ;;  %v8076_v5 = vcombine.low %v1648_v52, %v1652_v58  ;;  %v8067_v37 = vcombine.high %v1639_v63, %v1643_v1 }
 0x3b5   :  { %2475 = vmatprep.subr.bf16.mxu0 %v7997_v10  ;;  %v8069_v10 = vcombine.high %v1640_v2, %v1644_v0 }
 0x3b7   :  { %2435 = vmatpush1.bf16.msra.mxu1 %v7994_v11  ;;  %v8066_v11 = vcombine.low %v1639_v63, %v1643_v1  ;;  %v1462_v63 = vld [vmem:[#allocation2 + $0x128] sm:$0xff] }
 0x3b8   :  { %2476 = vmatpush1.bf16.msra.mxu0 %v7996_v12  ;;  %2436 = vmatprep.subr.bf16.mxu1 %v7987_v13  ;;  %v8068_v12 = vcombine.low %v1640_v2, %v1644_v0  ;;  %v8059_v13 = vcombine.high %v1631_v6, %v1635_v7  ;;  %v1449_v0 = vld [vmem:[#allocation2 + $0xc0] sm:$0xff] }
 0x3b9   :  { %2477 = vmatprep.subr.bf16.mxu0 %v7989_v20  ;;  %v8061_v20 = vcombine.high %v1632_v8, %v1636_v4  ;;  %v1441_v4 = vld [vmem:[#allocation2 + $0x80] sm:$0xff] }
 0x3bb   :  { %2437 = vmatpush1.bf16.msra.mxu1 %v7986_v23  ;;  %v1422_v23 = vpack.c.bf16 %v9696_v17, %v9696_v17  ;;  %v8052_v17 = vcombine.low %v1624_v18, %v1628_v22 }
 0x3bc   :  { %2478 = vmatpush1.bf16.msra.mxu0 %v7988_v24  ;;  %2438 = vmatprep.subr.bf16.mxu1 %v8107_v25  ;;  %v1424_v24 = vpack.c.bf16 %v9702_v38, %v9702_v38  ;;  %v8058_v25 = vcombine.low %v1631_v6, %v1635_v7 }
 0x3bd   :  { %2479 = vmatprep.subr.bf16.mxu0 %v8109_v29  ;;  %v1485_v29 = vld [vmem:[#allocation2 + $0x1e0] sm:$0xff] }
 0x3be   :  { %v2511_v35 = vunpack.c.l.b16 %v1424_v24  ;;  %v8167_v38 = vcombine.high %v1481_v28, %v1485_v29  ;;  %v8166_v44 = vcombine.low %v1481_v28, %v1485_v29  ;;  %v1434_v24 = vld [vmem:[#allocation2 + $0x48] sm:$0xff] }
 0x3bf   :  { %2439 = vmatpush2.bf16.msra.mxu1 %v8106_v31  ;;  %v8053_v31 = vcombine.high %v1624_v18, %v1628_v22  ;;  %v1433_v22 = vld [vmem:[#allocation2 + $0x40] sm:$0xff] }
 0x3c0   :  { %2480 = vmatpush2.bf16.msra.mxu0 %v8108_v32  ;;  %2440 = vmatprep.subr.bf16.mxu1 %v8099_v34  ;;  %v1486_v32 = vld [vmem:[#allocation2 + $0x1e8] sm:$0xff]  ;;  %v2509_v34 = vunpack.c.l.b16 %v1422_v23  ;;  %v1437_v23 = vld [vmem:[#allocation2 + $0x60] sm:$0xff] }
 0x3c1   :  { %2481 = vmatprep.subr.bf16.mxu0 %v8101_v40  ;;  %v1477_v40 = vld [vmem:[#allocation2 + $0x1a0] sm:$0xff]  ;;  %v8168_v46 = vcombine.low %v1482_v30, %v1486_v32  ;;  %v8119_v28 = vcombine.high %v1433_v22, %v1437_v23 }
 0x3c2   :  { %v8159_v47 = vcombine.high %v1473_v39, %v1477_v40  ;;  %v8158_v45 = vcombine.low %v1473_v39, %v1477_v40  ;;  %v1545_v39 = vld [vmem:[#allocation2 + $0x3c0] sm:$0xff] }
 0x3c3   :  { %2441 = vmatpush2.bf16.msra.mxu1 %v8098_v42  ;;  %v8169_v42 = vcombine.high %v1482_v30, %v1486_v32  ;;  %v1425_v30 = vld [vmem:[#allocation2] sm:$0xff]  ;;  %v1426_v32 = vld [vmem:[#allocation2 + $0x8] sm:$0xff] }
 0x3c4   :  { %2482 = vmatpush2.bf16.msra.mxu0 %v8100_v21  ;;  %2442 = vmatprep.subr.bf16.mxu1 %v8091_v43  ;;  %v1478_v21 = vld [vmem:[#allocation2 + $0x1a8] sm:$0xff]  ;;  %v2513_v43 = vsel %vm1693_vm9, %v2511_v35, %v2509_v34  ;;  %v8118_v35 = vcombine.low %v1433_v22, %v1437_v23  ;;  %v1549_v40 = vld [vmem:[#allocation2 + $0x3e0] sm:$0xff] }
 0x3c5   :  { %2483 = vmatprep.subr.bf16.mxu0 %v8093_v48  ;;  %v8161_v48 = vcombine.high %v1474_v41, %v1478_v21  ;;  %v8160_v52 = vcombine.low %v1474_v41, %v1478_v21  ;;  %v1430_v34 = vld [vmem:[#allocation2 + $0x28] sm:$0xff] }
 0x3c6   :  { %v1546_v41 = vld [vmem:[#allocation2 + $0x3c8] sm:$0xff] }
 0x3c7   :  { %2443 = vmatpush2.bf16.msra.mxu1 %v8090_v50  ;;  %v1469_v50 = vld [vmem:[#allocation2 + $0x160] sm:$0xff]  ;;  %v1506_v22 = vld [vmem:[#allocation2 + $0x288] sm:$0xff] }
 0x3c8   :  { %2484 = vmatpush2.bf16.msra.mxu0 %v8092_v51  ;;  %2444 = vmatprep.subr.bf16.mxu1 %v8083_v54  ;;  %v9725_v51 = vpack.c.b16 %v2513_v43, %v2513_v43  ;;  %v1466_v54 = vld [vmem:[#allocation2 + $0x148] sm:$0xff]  ;;  %v8150_v1 = vcombine.low %v1465_v49, %v1469_v50  ;;  %v8112_v43 = vcombine.low %v1426_v32, %v1430_v34 }
 0x3c9   :  { %2485 = vmatprep.subr.bf16.mxu0 %v8085_v57  ;;  %v8151_v57 = vcombine.high %v1465_v49, %v1469_v50  ;;  %v8153_v58 = vcombine.high %v1466_v54, %v1470_v55  ;;  %v1538_v49 = vld [vmem:[#allocation2 + $0x388] sm:$0xff] }
 0x3ca   :  { %v1542_v50 = vld [vmem:[#allocation2 + $0x3a8] sm:$0xff] }
 0x3cb   :  { %2445 = vmatpush2.bf16.msra.mxu1 %v8082_v60  ;;  %v1457_v60 = vld [vmem:[#allocation2 + $0x100] sm:$0xff]  ;;  %v1510_v23 = vld [vmem:[#allocation2 + $0x2a8] sm:$0xff] }
 0x3cc   :  { %2486 = vmatpush2.bf16.msra.mxu0 %v8084_v61  ;;  %2446 = vmatprep.subr.bf16.mxu1 %v8075_v62  ;;  %v1461_v61 = vld [vmem:[#allocation2 + $0x120] sm:$0xff]  ;;  %v1458_v62 = vld [vmem:[#allocation2 + $0x108] sm:$0xff] }
 0x3cd   :  { %2487 = vmatprep.subr.bf16.mxu0 %v8077_v3  ;;  %v8143_v2 = vcombine.high %v1457_v60, %v1461_v61  ;;  %v8145_v3 = vcombine.high %v1458_v62, %v1462_v63  ;;  %v8142_v6 = vcombine.low %v1457_v60, %v1461_v61  ;;  %v8144_v7 = vcombine.low %v1458_v62, %v1462_v63  ;;  %v1530_v60 = vld [vmem:[#allocation2 + $0x348] sm:$0xff] }
 0x3ce   :  { %v1534_v61 = vld [vmem:[#allocation2 + $0x368] sm:$0xff]  ;;  %v8224_v63 = vcombine.low %v1538_v49, %v1542_v50 }
 0x3cf   :  { %2447 = vmatpush2.bf16.msra.mxu1 %v8074_v16  ;;  %v1453_v16 = vld [vmem:[#allocation2 + $0xe0] sm:$0xff] }
 0x3d0   :  { %2488 = vmatpush2.bf16.msra.mxu0 %v8076_v5  ;;  %2448 = vmatprep.subr.bf16.mxu1 %v8067_v37  ;;  %v1450_v5 = vld [vmem:[#allocation2 + $0xc8] sm:$0xff]  ;;  %v8135_v8 = vcombine.high %v1449_v0, %v1453_v16  ;;  %v8134_v14 = vcombine.low %v1449_v0, %v1453_v16 }
 0x3d1   :  { %2489 = vmatprep.subr.bf16.mxu0 %v8069_v10  ;;  %v1454_v37 = vld [vmem:[#allocation2 + $0xe8] sm:$0xff] }
 0x3d2   :  { %v8137_v10 = vcombine.high %v1450_v5, %v1454_v37  ;;  %v8136_v15 = vcombine.low %v1450_v5, %v1454_v37  ;;  %v1522_v0 = vld [vmem:[#allocation2 + $0x308] sm:$0xff]  ;;  %v8216_v37 = vcombine.low %v1530_v60, %v1534_v61 }
 0x3d3   :  { %2449 = vmatpush2.bf16.msra.mxu1 %v8066_v11  ;;  %v1445_v11 = vld [vmem:[#allocation2 + $0xa0] sm:$0xff]  ;;  %v1526_v16 = vld [vmem:[#allocation2 + $0x328] sm:$0xff] }
 0x3d4   :  { %2490 = vmatpush2.bf16.msra.mxu0 %v8068_v12  ;;  %2450 = vmatprep.subr.bf16.mxu1 %v8059_v13  ;;  %v1442_v12 = vld [vmem:[#allocation2 + $0x88] sm:$0xff]  ;;  %v8127_v18 = vcombine.high %v1441_v4, %v1445_v11 }
 0x3d5   :  { %2491 = vmatprep.subr.bf16.mxu0 %v8061_v20  ;;  %v1446_v13 = vld [vmem:[#allocation2 + $0xa8] sm:$0xff] }
 0x3d6   :  { %v8129_v20 = vcombine.high %v1442_v12, %v1446_v13 }
 0x3d7   :  { %2451 = vmatpush2.bf16.msra.mxu1 %v8058_v25  ;;  %v1438_v25 = vld [vmem:[#allocation2 + $0x68] sm:$0xff] }
 0x3d8   :  { %2492 = vmatpush2.bf16.msra.mxu0 %v8060_v26  ;;  %2452 = vmatprep.subr.bf16.mxu1 %v8051_v27  ;;  %v8126_v26 = vcombine.low %v1441_v4, %v1445_v11  ;;  %v8128_v27 = vcombine.low %v1442_v12, %v1446_v13  ;;  %v8121_v29 = vcombine.high %v1434_v24, %v1438_v25  ;;  %v1514_v4 = vld [vmem:[#allocation2 + $0x2c8] sm:$0xff] }
 0x3d9   :  { %2493 = vmatprep.subr.bf16.mxu0 %v8053_v31  ;;  %v1429_v31 = vld [vmem:[#allocation2 + $0x20] sm:$0xff]  ;;  %v1518_v11 = vld [vmem:[#allocation2 + $0x2e8] sm:$0xff]  ;;  %v8208_v13 = vcombine.low %v1522_v0, %v1526_v16 }
 0x3da   :  { %v8110_v21 = vcombine.low %v1425_v30, %v1429_v31 }
 0x3db   :  { %2453 = vmatpush2.bf16.msra.mxu1 %v8050_v36  ;;  %v8120_v36 = vcombine.low %v1434_v24, %v1438_v25  ;;  %v8200_v25 = vcombine.low %v1514_v4, %v1518_v11 }
 0x3dc   :  { %2494 = vmatpush2.bf16.msra.mxu0 %v8052_v17  ;;  %3158 = vmatprep.subr.bf16.mxu1 %v8167_v38  ;;  %v8111_v17 = vcombine.high %v1425_v30, %v1429_v31  ;;  %v8113_v38 = vcombine.high %v1426_v32, %v1430_v34  ;;  %v1498_v30 = vld [vmem:[#allocation2 + $0x248] sm:$0xff]  ;;  %v1421_v34 = vpack.c.bf16 %v9692_v9, %v9692_v9 }
 0x3dd   :  { %3199 = vmatprep.subr.bf16.mxu0 %v8169_v42  ;;  %v1550_v42 = vld [vmem:[#allocation2 + $0x3e8] sm:$0xff] }
 0x3de   :  { %2455 = vmatmul.mubr.bf16.vlgmr.msra.gmra.mxu1 %v9714_v19  ;;  %v1502_v31 = vld [vmem:[#allocation2 + $0x268] sm:$0xff] }
 0x3df   :  { %2496 = vmatmul.mubr.bf16.vlgmr.msra.gmra.mxu0 %v9714_v19  ;;  %3159 = vmatpush1.bf16.msra.mxu1 %v8166_v44  ;;  %v8152_v19 = vcombine.low %v1466_v54, %v1470_v55  ;;  %v8231_v44 = vcombine.high %v1545_v39, %v1549_v40  ;;  %v8230_v54 = vcombine.low %v1545_v39, %v1549_v40  ;;  %v1489_v39 = vld [vmem:[#allocation2 + $0x200] sm:$0xff] }
 0x3e0   :  { %3200 = vmatpush1.bf16.msra.mxu0 %v8168_v46  ;;  %3160 = vmatprep.subr.bf16.mxu1 %v8159_v47  ;;  %v8233_v46 = vcombine.high %v1546_v41, %v1550_v42  ;;  %v1537_v47 = vld [vmem:[#allocation2 + $0x380] sm:$0xff]  ;;  %v8232_v55 = vcombine.low %v1546_v41, %v1550_v42  ;;  %v1490_v41 = vld [vmem:[#allocation2 + $0x208] sm:$0xff]  ;;  %v8184_v9 = vcombine.low %v1498_v30, %v1502_v31 }
 0x3e1   :  { %3201 = vmatprep.subr.bf16.mxu0 %v8161_v48  ;;  %3190 = vmatprep.mubr.bf16.mxu1 %v9725_v51  ;;  %v1541_v48 = vld [vmem:[#allocation2 + $0x3a0] sm:$0xff]  ;;  %v1494_v42 = vld [vmem:[#allocation2 + $0x228] sm:$0xff] }
 0x3e2   :  { %3231 = vmatprep.mubr.bf16.mxu0 %v9725_v51  ;;  %v8222_v62 = vcombine.low %v1537_v47, %v1541_v48  ;;  %v1493_v40 = vld [vmem:[#allocation2 + $0x220] sm:$0xff] }
 0x3e3   :  { %3161 = vmatpush1.bf16.msra.mxu1 %v8158_v45  ;;  %v8223_v45 = vcombine.high %v1537_v47, %v1541_v48  ;;  %v1483_v47 = vld [vmem:[#allocation2 + $0x1d0] sm:$0xff] }
 0x3e4   :  { %3202 = vmatpush1.bf16.msra.mxu0 %v8160_v52  ;;  %3162 = vmatprep.subr.bf16.mxu1 %v8151_v57  ;;  %v8225_v52 = vcombine.high %v1538_v49, %v1542_v50  ;;  %v1529_v57 = vld [vmem:[#allocation2 + $0x340] sm:$0xff]  ;;  %v1487_v48 = vld [vmem:[#allocation2 + $0x1f0] sm:$0xff]  ;;  %v1484_v49 = vld [vmem:[#allocation2 + $0x1d8] sm:$0xff] }
 0x3e5   :  { %3203 = vmatprep.subr.bf16.mxu0 %v8153_v58  ;;  %v1533_v58 = vld [vmem:[#allocation2 + $0x360] sm:$0xff]  ;;  %v1488_v50 = vld [vmem:[#allocation2 + $0x1f8] sm:$0xff] }
 0x3e6   :  { %v8214_v5 = vcombine.low %v1529_v57, %v1533_v58 }
 0x3e7   :  { %3163 = vmatpush1.bf16.msra.mxu1 %v8150_v1  ;;  %v8215_v1 = vcombine.high %v1529_v57, %v1533_v58  ;;  %v8173_v57 = vcombine.high %v1484_v49, %v1488_v50  ;;  %v1475_v58 = vld [vmem:[#allocation2 + $0x190] sm:$0xff] }
 0x3e8   :  { %3204 = vmatpush1.bf16.msra.mxu0 %v8152_v19  ;;  %3164 = vmatprep.subr.bf16.mxu1 %v8143_v2  ;;  %v8217_v19 = vcombine.high %v1530_v60, %v1534_v61  ;;  %v1521_v2 = vld [vmem:[#allocation2 + $0x300] sm:$0xff]  ;;  %v1479_v60 = vld [vmem:[#allocation2 + $0x1b0] sm:$0xff] }
 0x3e9   :  { %3205 = vmatprep.subr.bf16.mxu0 %v8145_v3  ;;  %v1525_v3 = vld [vmem:[#allocation2 + $0x320] sm:$0xff] }
 0x3ea   :  { %v8206_v12 = vcombine.low %v1521_v2, %v1525_v3 }
 0x3eb   :  { %3165 = vmatpush1.bf16.msra.mxu1 %v8142_v6  ;;  %v8207_v6 = vcombine.high %v1521_v2, %v1525_v3  ;;  %v8163_v2 = vcombine.high %v1475_v58, %v1479_v60 }
 0x3ec   :  { %3206 = vmatpush1.bf16.msra.mxu0 %v8144_v7  ;;  %3166 = vmatprep.subr.bf16.mxu1 %v8135_v8  ;;  %v8209_v7 = vcombine.high %v1522_v0, %v1526_v16  ;;  %v1513_v8 = vld [vmem:[#allocation2 + $0x2c0] sm:$0xff]  ;;  %v1467_v0 = vld [vmem:[#allocation2 + $0x150] sm:$0xff] }
 0x3ed   :  { %3207 = vmatprep.subr.bf16.mxu0 %v8137_v10  ;;  %v1517_v10 = vld [vmem:[#allocation2 + $0x2e0] sm:$0xff]  ;;  %v1471_v16 = vld [vmem:[#allocation2 + $0x170] sm:$0xff] }
 0x3ee   :  { %v8198_v24 = vcombine.low %v1513_v8, %v1517_v10 }
 0x3ef   :  { %3167 = vmatpush1.bf16.msra.mxu1 %v8134_v14  ;;  %v8199_v14 = vcombine.high %v1513_v8, %v1517_v10  ;;  %v8155_v8 = vcombine.high %v1467_v0, %v1471_v16 }
 0x3f0   :  { %3208 = vmatpush1.bf16.msra.mxu0 %v8136_v15  ;;  %3168 = vmatprep.subr.bf16.mxu1 %v8127_v18  ;;  %v8201_v15 = vcombine.high %v1514_v4, %v1518_v11  ;;  %v1505_v18 = vld [vmem:[#allocation2 + $0x280] sm:$0xff]  ;;  %v1459_v4 = vld [vmem:[#allocation2 + $0x110] sm:$0xff] }
 0x3f1   :  { %3209 = vmatprep.subr.bf16.mxu0 %v8129_v20  ;;  %v1509_v20 = vld [vmem:[#allocation2 + $0x2a0] sm:$0xff]  ;;  %v1463_v11 = vld [vmem:[#allocation2 + $0x130] sm:$0xff] }
 0x3f2   :  { %v8190_v32 = vcombine.low %v1505_v18, %v1509_v20 }
 0x3f3   :  { %3169 = vmatpush1.bf16.msra.mxu1 %v8126_v26  ;;  %v8191_v26 = vcombine.high %v1505_v18, %v1509_v20  ;;  %v8147_v18 = vcombine.high %v1459_v4, %v1463_v11 }
 0x3f4   :  { %3210 = vmatpush1.bf16.msra.mxu0 %v8128_v27  ;;  %3170 = vmatprep.subr.bf16.mxu1 %v8119_v28  ;;  %v8193_v27 = vcombine.high %v1506_v22, %v1510_v23  ;;  %v1497_v28 = vld [vmem:[#allocation2 + $0x240] sm:$0xff] }
 0x3f5   :  { %3211 = vmatprep.subr.bf16.mxu0 %v8121_v29  ;;  %v1501_v29 = vld [vmem:[#allocation2 + $0x260] sm:$0xff] }
 0x3f7   :  { %3171 = vmatpush1.bf16.msra.mxu1 %v8118_v35  ;;  %v1423_v35 = vpack.c.bf16 %v9698_v33, %v9698_v33  ;;  %v8177_v33 = vcombine.high %v1490_v41, %v1494_v42 }
 0x3f8   :  { %3212 = vmatpush1.bf16.msra.mxu0 %v8120_v36  ;;  %3172 = vmatprep.subr.bf16.mxu1 %v8111_v17  ;;  %v8192_v36 = vcombine.low %v1506_v22, %v1510_v23  ;;  %v8183_v17 = vcombine.high %v1497_v28, %v1501_v29  ;;  %v1451_v22 = vld [vmem:[#allocation2 + $0xd0] sm:$0xff] }
 0x3f9   :  { %3213 = vmatprep.subr.bf16.mxu0 %v8113_v38  ;;  %v8185_v38 = vcombine.high %v1498_v30, %v1502_v31  ;;  %v1455_v23 = vld [vmem:[#allocation2 + $0xf0] sm:$0xff]  ;;  %v1444_v31 = vld [vmem:[#allocation2 + $0x98] sm:$0xff] }
 0x3fa   :  { %v1447_v30 = vld [vmem:[#allocation2 + $0xb0] sm:$0xff] }
 0x3fb   :  { %3173 = vmatpush1.bf16.msra.mxu1 %v8110_v21  ;;  %v8182_v21 = vcombine.low %v1497_v28, %v1501_v29  ;;  %v8139_v28 = vcombine.high %v1451_v22, %v1455_v23  ;;  %v1443_v29 = vld [vmem:[#allocation2 + $0x90] sm:$0xff] }
 0x3fc   :  { %3214 = vmatpush1.bf16.msra.mxu0 %v8112_v43  ;;  %3174 = vmatprep.subr.bf16.mxu1 %v8231_v44  ;;  %v2508_v43 = vunpack.c.l.b16 %v1421_v34  ;;  %v2510_v44 = vunpack.c.l.b16 %v1423_v35  ;;  %v8138_v34 = vcombine.low %v1451_v22, %v1455_v23 }
 0x3fd   :  { %3215 = vmatprep.subr.bf16.mxu0 %v8233_v46  ;;  %v8175_v46 = vcombine.high %v1489_v39, %v1493_v40 }
 0x3ff   :  { %3175 = vmatpush2.bf16.msra.mxu1 %v8230_v54  ;;  %v8174_v54 = vcombine.low %v1489_v39, %v1493_v40  ;;  %v1439_v39 = vld [vmem:[#allocation2 + $0x70] sm:$0xff]  ;;  %v1436_v40 = vld [vmem:[#allocation2 + $0x58] sm:$0xff] }
 0x400   :  { %3216 = vmatpush2.bf16.msra.mxu0 %v8232_v55  ;;  %3176 = vmatprep.subr.bf16.mxu1 %v8223_v45  ;;  %v2512_v55 = vsel %vm1693_vm9, %v2510_v44, %v2508_v43  ;;  %v8176_v45 = vcombine.low %v1490_v41, %v1494_v42  ;;  %v1440_v41 = vld [vmem:[#allocation2 + $0x78] sm:$0xff]  ;;  %v8130_v42 = vcombine.low %v1443_v29, %v1447_v30 }
 0x401   :  { %3217 = vmatprep.subr.bf16.mxu0 %v8225_v52  ;;  %v8171_v52 = vcombine.high %v1483_v47, %v1487_v48  ;;  %v9736_v61 = vpack.c.b16 %v2512_v55, %v2512_v55  ;;  %v8125_v44 = vcombine.high %v1436_v40, %v1440_v41  ;;  %v1547_v55 = vld [vmem:[#allocation2 + $0x3d0] sm:$0xff] }
 0x403   :  { %3177 = vmatpush2.bf16.msra.mxu1 %v8222_v62  ;;  %v1476_v62 = vld [vmem:[#allocation2 + $0x198] sm:$0xff] }
 0x404   :  { %3218 = vmatpush2.bf16.msra.mxu0 %v8224_v63  ;;  %3178 = vmatprep.subr.bf16.mxu1 %v8215_v1  ;;  %v1480_v63 = vld [vmem:[#allocation2 + $0x1b8] sm:$0xff]  ;;  %v8170_v1 = vcombine.low %v1483_v47, %v1487_v48 }
 0x405   :  { %3219 = vmatprep.subr.bf16.mxu0 %v8217_v19  ;;  %v8172_v19 = vcombine.low %v1484_v49, %v1488_v50  ;;  %v8165_v3 = vcombine.high %v1476_v62, %v1480_v63  ;;  %v1432_v47 = vld [vmem:[#allocation2 + $0x38] sm:$0xff]  ;;  %v8124_v49 = vcombine.low %v1436_v40, %v1440_v41 }
 0x407   :  { %3179 = vmatpush2.bf16.msra.mxu1 %v8214_v5  ;;  %v1468_v5 = vld [vmem:[#allocation2 + $0x158] sm:$0xff] }
 0x408   :  { %3220 = vmatpush2.bf16.msra.mxu0 %v8216_v37  ;;  %3180 = vmatprep.subr.bf16.mxu1 %v8207_v6  ;;  %v1472_v37 = vld [vmem:[#allocation2 + $0x178] sm:$0xff]  ;;  %v8162_v6 = vcombine.low %v1475_v58, %v1479_v60 }
 0x409   :  { %3221 = vmatprep.subr.bf16.mxu0 %v8209_v7  ;;  %v8164_v7 = vcombine.low %v1476_v62, %v1480_v63  ;;  %v8157_v10 = vcombine.high %v1468_v5, %v1472_v37 }
 0x40b   :  { %3181 = vmatpush2.bf16.msra.mxu1 %v8206_v12  ;;  %v1460_v12 = vld [vmem:[#allocation2 + $0x118] sm:$0xff] }
 0x40c   :  { %3222 = vmatpush2.bf16.msra.mxu0 %v8208_v13  ;;  %3182 = vmatprep.subr.bf16.mxu1 %v8199_v14  ;;  %v1464_v13 = vld [vmem:[#allocation2 + $0x138] sm:$0xff]  ;;  %v8154_v14 = vcombine.low %v1467_v0, %v1471_v16 }
 0x40d   :  { %3223 = vmatprep.subr.bf16.mxu0 %v8201_v15  ;;  %v8156_v15 = vcombine.low %v1468_v5, %v1472_v37  ;;  %v8149_v20 = vcombine.high %v1460_v12, %v1464_v13 }
 0x40f   :  { %3183 = vmatpush2.bf16.msra.mxu1 %v8198_v24  ;;  %v1452_v24 = vld [vmem:[#allocation2 + $0xd8] sm:$0xff] }
 0x410   :  { %3224 = vmatpush2.bf16.msra.mxu0 %v8200_v25  ;;  %3184 = vmatprep.subr.bf16.mxu1 %v8191_v26  ;;  %v1456_v25 = vld [vmem:[#allocation2 + $0xf8] sm:$0xff]  ;;  %v8146_v26 = vcombine.low %v1459_v4, %v1463_v11 }
 0x411   :  { %3225 = vmatprep.subr.bf16.mxu0 %v8193_v27  ;;  %v8148_v27 = vcombine.low %v1460_v12, %v1464_v13  ;;  %v8140_v35 = vcombine.low %v1452_v24, %v1456_v25 }
 0x413   :  { %3185 = vmatpush2.bf16.msra.mxu1 %v8190_v32  ;;  %v1448_v32 = vld [vmem:[#allocation2 + $0xb8] sm:$0xff] }
 0x414   :  { %3226 = vmatpush2.bf16.msra.mxu0 %v8192_v36  ;;  %3186 = vmatprep.subr.bf16.mxu1 %v8183_v17  ;;  %v8131_v36 = vcombine.high %v1443_v29, %v1447_v30  ;;  %v8133_v17 = vcombine.high %v1444_v31, %v1448_v32 }
 0x415   :  { %3227 = vmatprep.subr.bf16.mxu0 %v8185_v38  ;;  %v1435_v38 = vld [vmem:[#allocation2 + $0x50] sm:$0xff] }
 0x416   :  { %v8123_v43 = vcombine.high %v1435_v38, %v1439_v39  ;;  %v8122_v48 = vcombine.low %v1435_v38, %v1439_v39 }
 0x417   :  { %3187 = vmatpush2.bf16.msra.mxu1 %v8182_v21  ;;  %v8132_v21 = vcombine.low %v1444_v31, %v1448_v32 }
 0x418   :  { %3228 = vmatpush2.bf16.msra.mxu0 %v8184_v9  ;;  %3188 = vmatprep.subr.bf16.mxu1 %v8175_v46  ;;  %v1427_v9 = vld [vmem:[#allocation2 + $0x10] sm:$0xff] }
 0x419   :  { %3229 = vmatprep.subr.bf16.mxu0 %v8177_v33  ;;  %v1431_v46 = vld [vmem:[#allocation2 + $0x30] sm:$0xff]  ;;  %v1428_v33 = vld [vmem:[#allocation2 + $0x18] sm:$0xff] }
 0x41a   :  { %v8115_v50 = vcombine.high %v1427_v9, %v1431_v46  ;;  %v8114_v58 = vcombine.low %v1427_v9, %v1431_v46  ;;  %v8116_v60 = vcombine.low %v1428_v33, %v1432_v47 }
 0x41b   :  { %3189 = vmatpush2.bf16.msra.mxu1 %v8174_v54  ;;  %v8117_v54 = vcombine.high %v1428_v33, %v1432_v47 }
 0x41c   :  { %3230 = vmatpush2.bf16.msra.mxu0 %v8176_v45  ;;  %3240 = vmatprep.subr.bf16.mxu1 %v8171_v52  ;;  %v1551_v45 = vld [vmem:[#allocation2 + $0x3f0] sm:$0xff]  ;;  %v1548_v52 = vld [vmem:[#allocation2 + $0x3d8] sm:$0xff] }
 0x41d   :  { %3281 = vmatprep.subr.bf16.mxu0 %v8173_v57  ;;  %v1552_v57 = vld [vmem:[#allocation2 + $0x3f8] sm:$0xff]  ;;  %v8235_v62 = vcombine.high %v1547_v55, %v1551_v45  ;;  %v8234_v0 = vcombine.low %v1547_v55, %v1551_v45 }
 0x41e   :  { %3191 = vmatmul.mubr.bf16.vlgmr.msra.gmra.mxu1 %v9736_v61  ;;  %v8237_v63 = vcombine.high %v1548_v52, %v1552_v57  ;;  %v8236_v16 = vcombine.low %v1548_v52, %v1552_v57 }
 0x41f   :  { %3232 = vmatmul.mubr.bf16.vlgmr.msra.gmra.mxu0 %v9736_v61  ;;  %3241 = vmatpush1.bf16.msra.mxu1 %v8170_v1  ;;  %v1539_v1 = vld [vmem:[#allocation2 + $0x390] sm:$0xff] }
 0x420   :  { %3282 = vmatpush1.bf16.msra.mxu0 %v8172_v19  ;;  %3242 = vmatprep.subr.bf16.mxu1 %v8163_v2  ;;  %v1543_v19 = vld [vmem:[#allocation2 + $0x3b0] sm:$0xff]  ;;  %v1540_v2 = vld [vmem:[#allocation2 + $0x398] sm:$0xff] }
 0x421   :  { %3283 = vmatprep.subr.bf16.mxu0 %v8165_v3  ;;  %3272 = vmatprep.mubr.bf16.mxu1 %v9725_v51  ;;  %v1544_v3 = vld [vmem:[#allocation2 + $0x3b8] sm:$0xff]  ;;  %v8227_v5 = vcombine.high %v1539_v1, %v1543_v19  ;;  %v8226_v4 = vcombine.low %v1539_v1, %v1543_v19 }
 0x422   :  { %3313 = vmatprep.mubr.bf16.mxu0 %v9725_v51  ;;  %v8141_v51 = vcombine.high %v1452_v24, %v1456_v25  ;;  %v8229_v37 = vcombine.high %v1540_v2, %v1544_v3  ;;  %v8228_v11 = vcombine.low %v1540_v2, %v1544_v3 }
 0x423   :  { %3243 = vmatpush1.bf16.msra.mxu1 %v8162_v6  ;;  %v1531_v6 = vld [vmem:[#allocation2 + $0x350] sm:$0xff] }
 0x424   :  { %3284 = vmatpush1.bf16.msra.mxu0 %v8164_v7  ;;  %3244 = vmatprep.subr.bf16.mxu1 %v8155_v8  ;;  %v1535_v7 = vld [vmem:[#allocation2 + $0x370] sm:$0xff]  ;;  %v1532_v8 = vld [vmem:[#allocation2 + $0x358] sm:$0xff] }
 0x425   :  { %3285 = vmatprep.subr.bf16.mxu0 %v8157_v10  ;;  %v1536_v10 = vld [vmem:[#allocation2 + $0x378] sm:$0xff]  ;;  %v8219_v12 = vcombine.high %v1531_v6, %v1535_v7  ;;  %v8218_v22 = vcombine.low %v1531_v6, %v1535_v7 }
 0x426   :  { %v8221_v13 = vcombine.high %v1532_v8, %v1536_v10  ;;  %v8220_v23 = vcombine.low %v1532_v8, %v1536_v10 }
 0x427   :  { %3245 = vmatpush1.bf16.msra.mxu1 %v8154_v14  ;;  %v1523_v14 = vld [vmem:[#allocation2 + $0x310] sm:$0xff] }
 0x428   :  { %3286 = vmatpush1.bf16.msra.mxu0 %v8156_v15  ;;  %3246 = vmatprep.subr.bf16.mxu1 %v8147_v18  ;;  %v1527_v15 = vld [vmem:[#allocation2 + $0x330] sm:$0xff]  ;;  %v1524_v18 = vld [vmem:[#allocation2 + $0x318] sm:$0xff] }
 0x429   :  { %3287 = vmatprep.subr.bf16.mxu0 %v8149_v20  ;;  %v1528_v20 = vld [vmem:[#allocation2 + $0x338] sm:$0xff]  ;;  %v8211_v24 = vcombine.high %v1523_v14, %v1527_v15  ;;  %v8210_v29 = vcombine.low %v1523_v14, %v1527_v15  ;;  %v3560_v14 = vld [vmem:[#allocation4 + $0x560] sm:$0xff] }
 0x42a   :  { %v8213_v25 = vcombine.high %v1524_v18, %v1528_v20  ;;  %v8212_v30 = vcombine.low %v1524_v18, %v1528_v20 }
 0x42b   :  { %3247 = vmatpush1.bf16.msra.mxu1 %v8146_v26  ;;  %v1515_v26 = vld [vmem:[#allocation2 + $0x2d0] sm:$0xff] }
 0x42c   :  { %3288 = vmatpush1.bf16.msra.mxu0 %v8148_v27  ;;  %3248 = vmatprep.subr.bf16.mxu1 %v8139_v28  ;;  %v1519_v27 = vld [vmem:[#allocation2 + $0x2f0] sm:$0xff]  ;;  %v1516_v28 = vld [vmem:[#allocation2 + $0x2d8] sm:$0xff] }
 0x42d   :  { %3289 = vmatprep.subr.bf16.mxu0 %v8141_v51  ;;  %v1520_v51 = vld [vmem:[#allocation2 + $0x2f8] sm:$0xff]  ;;  %v8203_v31 = vcombine.high %v1515_v26, %v1519_v27  ;;  %v8202_v38 = vcombine.low %v1515_v26, %v1519_v27  ;;  %v3420_v26 = vld [vmem:[#allocation4 + $0x100] sm:$0xff] }
 0x42e   :  { %v8205_v32 = vcombine.high %v1516_v28, %v1520_v51  ;;  %v8204_v39 = vcombine.low %v1516_v28, %v1520_v51  ;;  %v3424_v27 = vld [vmem:[#allocation4 + $0x120] sm:$0xff] }
 0x42f   :  { %3249 = vmatpush1.bf16.msra.mxu1 %v8138_v34  ;;  %v1507_v34 = vld [vmem:[#allocation2 + $0x290] sm:$0xff]  ;;  %v3548_v51 = vld [vmem:[#allocation4 + $0x500] sm:$0xff] }
 0x430   :  { %3290 = vmatpush1.bf16.msra.mxu0 %v8140_v35  ;;  %3250 = vmatprep.subr.bf16.mxu1 %v8131_v36  ;;  %v1511_v35 = vld [vmem:[#allocation2 + $0x2b0] sm:$0xff]  ;;  %v1508_v36 = vld [vmem:[#allocation2 + $0x298] sm:$0xff] }
 0x431   :  { %3291 = vmatprep.subr.bf16.mxu0 %v8133_v17  ;;  %v1512_v17 = vld [vmem:[#allocation2 + $0x2b8] sm:$0xff]  ;;  %v8195_v40 = vcombine.high %v1507_v34, %v1511_v35  ;;  %v8194_v9 = vcombine.low %v1507_v34, %v1511_v35  ;;  %v8271_v34 = vcombine.high %v3420_v26, %v3424_v27 }
 0x432   :  { %v8197_v41 = vcombine.high %v1508_v36, %v1512_v17  ;;  %v8196_v46 = vcombine.low %v1508_v36, %v1512_v17  ;;  %v3412_v17 = vld [vmem:[#allocation4 + $0xc0] sm:$0xff] }
 0x433   :  { %3251 = vmatpush1.bf16.msra.mxu1 %v8130_v42  ;;  %v1499_v42 = vld [vmem:[#allocation2 + $0x250] sm:$0xff] }
 0x434   :  { %3292 = vmatpush1.bf16.msra.mxu0 %v8132_v21  ;;  %3252 = vmatprep.subr.bf16.mxu1 %v8123_v43  ;;  %v1503_v21 = vld [vmem:[#allocation2 + $0x270] sm:$0xff]  ;;  %v1500_v43 = vld [vmem:[#allocation2 + $0x258] sm:$0xff] }
 0x435   :  { %3293 = vmatprep.subr.bf16.mxu0 %v8125_v44  ;;  %v1504_v44 = vld [vmem:[#allocation2 + $0x278] sm:$0xff]  ;;  %v8187_v33 = vcombine.high %v1499_v42, %v1503_v21  ;;  %v8186_v55 = vcombine.low %v1499_v42, %v1503_v21  ;;  %v9752_v42 = vld [vmem:[#allocation4 + $0x9c0] sm:$0xff] }
 0x436   :  { %v8189_v47 = vcombine.high %v1500_v43, %v1504_v44  ;;  %v8188_v45 = vcombine.low %v1500_v43, %v1504_v44  ;;  %v9754_v21 = vld [vmem:[#allocation4 + $0x9e0] sm:$0xff] }
 0x437   :  { %3253 = vmatpush1.bf16.msra.mxu1 %v8122_v48  ;;  %v1491_v48 = vld [vmem:[#allocation2 + $0x210] sm:$0xff]  ;;  %v9756_v43 = vld [vmem:[#allocation4 + $0xdc0] sm:$0xff] }
 0x438   :  { %3294 = vmatpush1.bf16.msra.mxu0 %v8124_v49  ;;  %3254 = vmatprep.subr.bf16.mxu1 %v8115_v50  ;;  %v1495_v49 = vld [vmem:[#allocation2 + $0x230] sm:$0xff]  ;;  %v1492_v50 = vld [vmem:[#allocation2 + $0x218] sm:$0xff] }
 0x439   :  { %3295 = vmatprep.subr.bf16.mxu0 %v8117_v54  ;;  %v1496_v54 = vld [vmem:[#allocation2 + $0x238] sm:$0xff]  ;;  %v8179_v52 = vcombine.high %v1491_v48, %v1495_v49  ;;  %v8178_v1 = vcombine.low %v1491_v48, %v1495_v49  ;;  %v3408_v48 = vld [vmem:[#allocation4 + $0xa0] sm:$0xff]  ;;  %v8550_v49 = vcombine.low %v9752_v42, %v9754_v21 }
 0x43a   :  { %v8181_v57 = vcombine.high %v1492_v50, %v1496_v54  ;;  %v8180_v19 = vcombine.low %v1492_v50, %v1496_v54  ;;  %v3532_v54 = vld [vmem:[#allocation4 + $0x480] sm:$0xff] }
 0x43b   :  { %3255 = vmatpush1.bf16.msra.mxu1 %v8114_v58  ;;  %v3444_v58 = vld [vmem:[#allocation4 + $0x1c0] sm:$0xff] }
 0x43c   :  { %3296 = vmatpush1.bf16.msra.mxu0 %v8116_v60  ;;  %3256 = vmatprep.subr.bf16.mxu1 %v8235_v62  ;;  %v3448_v60 = vld [vmem:[#allocation4 + $0x1e0] sm:$0xff] }
 0x43d   :  { %3297 = vmatprep.subr.bf16.mxu0 %v8237_v63  ;;  %v3572_v62 = vld [vmem:[#allocation4 + $0x5c0] sm:$0xff]  ;;  %v8295_v2 = vcombine.high %v3444_v58, %v3448_v60  ;;  %v8294_v6 = vcombine.low %v3444_v58, %v3448_v60 }
 0x43e   :  { %v3576_v63 = vld [vmem:[#allocation4 + $0x5e0] sm:$0xff] }
 0x43f   :  { %3257 = vmatpush2.bf16.msra.mxu1 %v8234_v0  ;;  %v8423_v3 = vcombine.high %v3572_v62, %v3576_v63  ;;  %v3436_v0 = vld [vmem:[#allocation4 + $0x180] sm:$0xff]  ;;  %v8422_v7 = vcombine.low %v3572_v62, %v3576_v63 }
 0x440   :  { %3298 = vmatpush2.bf16.msra.mxu0 %v8236_v16  ;;  %3258 = vmatprep.subr.bf16.mxu1 %v8227_v5  ;;  %v3440_v16 = vld [vmem:[#allocation4 + $0x1a0] sm:$0xff] }
 0x441   :  { %3299 = vmatprep.subr.bf16.mxu0 %v8229_v37  ;;  %v3564_v5 = vld [vmem:[#allocation4 + $0x580] sm:$0xff]  ;;  %v8287_v8 = vcombine.high %v3436_v0, %v3440_v16  ;;  %v8286_v18 = vcombine.low %v3436_v0, %v3440_v16 }
 0x442   :  { %v3568_v37 = vld [vmem:[#allocation4 + $0x5a0] sm:$0xff] }
 0x443   :  { %3259 = vmatpush2.bf16.msra.mxu1 %v8226_v4  ;;  %v8415_v10 = vcombine.high %v3564_v5, %v3568_v37  ;;  %v3428_v4 = vld [vmem:[#allocation4 + $0x140] sm:$0xff] }
 0x444   :  { %3300 = vmatpush2.bf16.msra.mxu0 %v8228_v11  ;;  %3260 = vmatprep.subr.bf16.mxu1 %v8219_v12  ;;  %v3432_v11 = vld [vmem:[#allocation4 + $0x160] sm:$0xff] }
 0x445   :  { %3301 = vmatprep.subr.bf16.mxu0 %v8221_v13  ;;  %v3556_v13 = vld [vmem:[#allocation4 + $0x540] sm:$0xff] }
 0x446   :  { %v3396_v60 = vld [vmem:[#allocation4 + $0x40] sm:$0xff] }
 0x447   :  { %3261 = vmatpush2.bf16.msra.mxu1 %v8218_v22  ;;  %v8414_v22 = vcombine.low %v3564_v5, %v3568_v37  ;;  %v3400_v62 = vld [vmem:[#allocation4 + $0x60] sm:$0xff] }
 0x448   :  { %3302 = vmatpush2.bf16.msra.mxu0 %v8220_v23  ;;  %3262 = vmatprep.subr.bf16.mxu1 %v8211_v24  ;;  %v8279_v23 = vcombine.high %v3428_v4, %v3432_v11  ;;  %v3524_v63 = vld [vmem:[#allocation4 + $0x440] sm:$0xff] }
 0x449   :  { %3303 = vmatprep.subr.bf16.mxu0 %v8213_v25  ;;  %v8407_v25 = vcombine.high %v3556_v13, %v3560_v14  ;;  %v3388_v16 = vld [vmem:[#allocation4] sm:$0xff] }
 0x44a   :  { %v3392_v5 = vld [vmem:[#allocation4 + $0x20] sm:$0xff] }
 0x44b   :  { %3263 = vmatpush2.bf16.msra.mxu1 %v8210_v29  ;;  %v3552_v29 = vld [vmem:[#allocation4 + $0x520] sm:$0xff] }
 0x44c   :  { %3304 = vmatpush2.bf16.msra.mxu0 %v8212_v30  ;;  %3264 = vmatprep.subr.bf16.mxu1 %v8203_v31  ;;  %v8399_v36 = vcombine.high %v3548_v51, %v3552_v29  ;;  %v8398_v44 = vcombine.low %v3548_v51, %v3552_v29  ;;  %v3516_v37 = vld [vmem:[#allocation4 + $0x400] sm:$0xff] }
 0x44d   :  { %3305 = vmatprep.subr.bf16.mxu0 %v8205_v32  ;;  %v8406_v32 = vcombine.low %v3556_v13, %v3560_v14  ;;  %v3512_v13 = vld [vmem:[#allocation4 + $0x3e0] sm:$0xff] }
 0x44e   :  { %v3636_v14 = vld [vmem:[#allocation4 + $0x7c0] sm:$0xff] }
 0x44f   :  { %3265 = vmatpush2.bf16.msra.mxu1 %v8202_v38  ;;  %v3416_v38 = vld [vmem:[#allocation4 + $0xe0] sm:$0xff] }
 0x450   :  { %3306 = vmatpush2.bf16.msra.mxu0 %v8204_v39  ;;  %3266 = vmatprep.subr.bf16.mxu1 %v8195_v40  ;;  %v3540_v39 = vld [vmem:[#allocation4 + $0x4c0] sm:$0xff] }
 0x451   :  { %3307 = vmatprep.subr.bf16.mxu0 %v8197_v41  ;;  %v3544_v40 = vld [vmem:[#allocation4 + $0x4e0] sm:$0xff]  ;;  %v8270_v41 = vcombine.low %v3420_v26, %v3424_v27 }
 0x452   :  { %v3500_v27 = vld [vmem:[#allocation4 + $0x380] sm:$0xff] }
 0x453   :  { %3267 = vmatpush2.bf16.msra.mxu1 %v8194_v9  ;;  %v8263_v9 = vcombine.high %v3412_v17, %v3416_v38  ;;  %v3628_v51 = vld [vmem:[#allocation4 + $0x780] sm:$0xff] }
 0x454   :  { %3308 = vmatpush2.bf16.msra.mxu0 %v8196_v46  ;;  %3268 = vmatprep.subr.bf16.mxu1 %v8187_v33  ;;  %v9758_v46 = vld [vmem:[#allocation4 + $0xde0] sm:$0xff]  ;;  %v8391_v33 = vcombine.high %v3540_v39, %v3544_v40 }
 0x455   :  { %3309 = vmatprep.subr.bf16.mxu0 %v8189_v47  ;;  %v3404_v47 = vld [vmem:[#allocation4 + $0x80] sm:$0xff]  ;;  %v8678_v50 = vcombine.low %v9756_v43, %v9758_v46 }
 0x456   :  { %v3632_v29 = vld [vmem:[#allocation4 + $0x7a0] sm:$0xff] }
 0x457   :  { %3269 = vmatpush2.bf16.msra.mxu1 %v8186_v55  ;;  %v3536_v55 = vld [vmem:[#allocation4 + $0x4a0] sm:$0xff] }
 0x458   :  { %3310 = vmatpush2.bf16.msra.mxu0 %v8188_v45  ;;  %3270 = vmatprep.subr.bf16.mxu1 %v8179_v52  ;;  %v8262_v45 = vcombine.low %v3412_v17, %v3416_v38  ;;  %v8390_v52 = vcombine.low %v3540_v39, %v3544_v40  ;;  %v8383_v58 = vcombine.high %v3532_v54, %v3536_v55  ;;  %v3624_v17 = vld [vmem:[#allocation4 + $0x760] sm:$0xff] }
 0x459   :  { %3311 = vmatprep.subr.bf16.mxu0 %v8181_v57  ;;  %v8255_v57 = vcombine.high %v3404_v47, %v3408_v48  ;;  %v8478_v39 = vcombine.low %v3628_v51, %v3632_v29 }
 0x45b   :  { %3271 = vmatpush2.bf16.msra.mxu1 %v8178_v1  ;;  %v3528_v1 = vld [vmem:[#allocation4 + $0x460] sm:$0xff] }
 0x45c   :  { %3312 = vmatpush2.bf16.msra.mxu0 %v8180_v19  ;;  %6502 = vmatprep.subr.bf16.mxu1 %v8295_v2  ;;  %v8254_v19 = vcombine.low %v3404_v47, %v3408_v48  ;;  %v8382_v2 = vcombine.low %v3532_v54, %v3536_v55  ;;  %v8375_v0 = vcombine.high %v3524_v63, %v3528_v1  ;;  %v3616_v47 = vld [vmem:[#allocation4 + $0x720] sm:$0xff] }
 0x45d   :  { %6543 = vmatprep.subr.bf16.mxu0 %v8423_v3  ;;  %v8247_v3 = vcombine.high %v3396_v60, %v3400_v62 }
 0x45e   :  { %v9742_v12 = vpop.f32.mrf.mxu1  ;;  %3273 = vmatmul.mubr.bf16.vlgmr.msra.gmra.mxu1 %v9736_v61 }
 0x45f   :  { %v9745_v15 = vpop.f32.mrf.mxu0  ;;  %3314 = vmatmul.mubr.bf16.vlgmr.msra.gmra.mxu0 %v9736_v61  ;;  %6503 = vmatpush1.bf16.msra.mxu1 %v8294_v6  ;;  %v8278_v61 = vcombine.low %v3428_v4, %v3432_v11  ;;  %v3520_v6 = vld [vmem:[#allocation4 + $0x420] sm:$0xff] }
 0x460   :  { %v9748_v20 = vpop.f32.mrf.mxu1  ;;  %6544 = vmatpush1.bf16.msra.mxu0 %v8422_v7  ;;  %6504 = vmatprep.subr.bf16.mxu1 %v8287_v8  ;;  %v8246_v7 = vcombine.low %v3396_v60, %v3400_v62  ;;  %v8374_v8 = vcombine.low %v3524_v63, %v3528_v1  ;;  %v8367_v4 = vcombine.high %v3516_v37, %v3520_v6  ;;  %v3508_v11 = vld [vmem:[#allocation4 + $0x3c0] sm:$0xff] }
 0x461   :  { %v9750_v24 = vpop.f32.mrf.mxu0  ;;  %6545 = vmatprep.subr.bf16.mxu0 %v8415_v10  ;;  %v8239_v10 = vcombine.high %v3388_v16, %v3392_v5  ;;  %v3608_v60 = vld [vmem:[#allocation4 + $0x6e0] sm:$0xff] }
 0x462   :  { %v2378_v28 = vpop.f32.mrf.mxu1 }
 0x463   :  { %v2419_v30 = vpop.f32.mrf.mxu0  ;;  %6505 = vmatpush1.bf16.msra.mxu1 %v8286_v18  ;;  %v3640_v18 = vld [vmem:[#allocation4 + $0x7e0] sm:$0xff] }
 0x464   :  { %v2379_v31 = vpop.f32.mrf.mxu1  ;;  %6546 = vmatpush1.bf16.msra.mxu0 %v8414_v22  ;;  %6506 = vmatprep.subr.bf16.mxu1 %v8279_v23  ;;  %v8238_v22 = vcombine.low %v3388_v16, %v3392_v5  ;;  %v8366_v23 = vcombine.low %v3516_v37, %v3520_v6  ;;  %v8487_v26 = vcombine.high %v3636_v14, %v3640_v18  ;;  %v3504_v28 = vld [vmem:[#allocation4 + $0x3a0] sm:$0xff] }
 0x465   :  { %v2420_v35 = vpop.f32.mrf.mxu0  ;;  %6547 = vmatprep.subr.bf16.mxu0 %v8407_v25  ;;  %v8359_v25 = vcombine.high %v3508_v11, %v3512_v13  ;;  %v8358_v30 = vcombine.low %v3508_v11, %v3512_v13  ;;  %v8351_v31 = vcombine.high %v3500_v27, %v3504_v28  ;;  %v8350_v38 = vcombine.low %v3500_v27, %v3504_v28  ;;  %v3600_v16 = vld [vmem:[#allocation4 + $0x6a0] sm:$0xff] }
 0x466   :  { %v3496_v35 = vld [vmem:[#allocation4 + $0x360] sm:$0xff] }
 0x467   :  { %6507 = vmatpush1.bf16.msra.mxu1 %v8278_v61  ;;  %v8486_v61 = vcombine.low %v3636_v14, %v3640_v18  ;;  %v3592_v11 = vld [vmem:[#allocation4 + $0x660] sm:$0xff] }
 0x468   :  { %6548 = vmatpush1.bf16.msra.mxu0 %v8406_v32  ;;  %6508 = vmatprep.subr.bf16.mxu1 %v8271_v34  ;;  %v8479_v32 = vcombine.high %v3628_v51, %v3632_v29  ;;  %v3492_v34 = vld [vmem:[#allocation4 + $0x340] sm:$0xff] }
 0x469   :  { %6549 = vmatprep.subr.bf16.mxu0 %v8399_v36  ;;  %v3620_v36 = vld [vmem:[#allocation4 + $0x740] sm:$0xff]  ;;  %v8343_v40 = vcombine.high %v3492_v34, %v3496_v35  ;;  %v8342_v48 = vcombine.low %v3492_v34, %v3496_v35  ;;  %v8679_v34 = vcombine.high %v9756_v43, %v9758_v46 }
 0x46a   :  { %v8470_v54 = vcombine.low %v3620_v36, %v3624_v17  ;;  %v3584_v27 = vld [vmem:[#allocation4 + $0x620] sm:$0xff] }
 0x46b   :  { %6509 = vmatpush1.bf16.msra.mxu1 %v8270_v41  ;;  %v8471_v41 = vcombine.high %v3620_v36, %v3624_v17  ;;  %v3672_v43 = vld [vmem:[#allocation4 + $0x8e0] sm:$0xff] }
 0x46c   :  { %6550 = vmatpush1.bf16.msra.mxu0 %v8398_v44  ;;  %6510 = vmatprep.subr.bf16.mxu1 %v8263_v9  ;;  %v3484_v44 = vld [vmem:[#allocation4 + $0x300] sm:$0xff] }
 0x46d   :  { %6551 = vmatprep.subr.bf16.mxu0 %v8391_v33  ;;  %v3488_v9 = vld [vmem:[#allocation4 + $0x320] sm:$0xff] }
 0x46e   :  { %v3612_v33 = vld [vmem:[#allocation4 + $0x700] sm:$0xff]  ;;  %v8335_v55 = vcombine.high %v3484_v44, %v3488_v9  ;;  %v8334_v62 = vcombine.low %v3484_v44, %v3488_v9  ;;  %v9776_v9 = vld [vmem:[#allocation18] sm:$0xff] }
 0x46f   :  { %6511 = vmatpush1.bf16.msra.mxu1 %v8262_v45  ;;  %v8463_v45 = vcombine.high %v3612_v33, %v3616_v47  ;;  %v8462_v63 = vcombine.low %v3612_v33, %v3616_v47  ;;  %v3334_v33 = vsub.s32 2, %v9682_v53  ;;  %v3338_v47 = vsub.s32 3, %v9682_v53  ;;  %v3796_v46 = vld [vmem:[#allocation4 + $0xcc0] sm:$0xff] }
 0x470   :  { %6552 = vmatpush1.bf16.msra.mxu0 %v8390_v52  ;;  %6512 = vmatprep.subr.bf16.mxu1 %v8255_v57  ;;  %v3476_v52 = vld [vmem:[#allocation4 + $0x2c0] sm:$0xff] }
 0x471   :  { %6553 = vmatprep.subr.bf16.mxu0 %v8383_v58  ;;  %v3480_v57 = vld [vmem:[#allocation4 + $0x2e0] sm:$0xff] }
 0x472   :  { %v3604_v58 = vld [vmem:[#allocation4 + $0x6c0] sm:$0xff]  ;;  %v8327_v1 = vcombine.high %v3476_v52, %v3480_v57  ;;  %v8326_v5 = vcombine.low %v3476_v52, %v3480_v57  ;;  %v3331_v57 = vrot.slane %v9776_v9, %v9688_v59 }
 0x473   :  { %6513 = vmatpush1.bf16.msra.mxu1 %v8254_v19  ;;  %v8455_v19 = vcombine.high %v3604_v58, %v3608_v60  ;;  %v8454_v37 = vcombine.low %v3604_v58, %v3608_v60 }
 0x474   :  { %6554 = vmatpush1.bf16.msra.mxu0 %v8382_v2  ;;  %6514 = vmatprep.subr.bf16.mxu1 %v8247_v3  ;;  %v3468_v2 = vld [vmem:[#allocation4 + $0x280] sm:$0xff] }
 0x475   :  { %6555 = vmatprep.subr.bf16.mxu0 %v8375_v0  ;;  %v3472_v3 = vld [vmem:[#allocation4 + $0x2a0] sm:$0xff] }
 0x476   :  { %v3596_v0 = vld [vmem:[#allocation4 + $0x680] sm:$0xff]  ;;  %v8319_v6 = vcombine.high %v3468_v2, %v3472_v3  ;;  %v8318_v13 = vcombine.low %v3468_v2, %v3472_v3 }
 0x477   :  { %6515 = vmatpush1.bf16.msra.mxu1 %v8246_v7  ;;  %v8447_v7 = vcombine.high %v3596_v0, %v3600_v16  ;;  %v8446_v14 = vcombine.low %v3596_v0, %v3600_v16 }
 0x478   :  { %6556 = vmatpush1.bf16.msra.mxu0 %v8374_v8  ;;  %6516 = vmatprep.subr.bf16.mxu1 %v8239_v10  ;;  %v3460_v8 = vld [vmem:[#allocation4 + $0x240] sm:$0xff] }
 0x479   :  { %6557 = vmatprep.subr.bf16.mxu0 %v8367_v4  ;;  %v3464_v10 = vld [vmem:[#allocation4 + $0x260] sm:$0xff] }
 0x47a   :  { %v3588_v4 = vld [vmem:[#allocation4 + $0x640] sm:$0xff]  ;;  %v8311_v18 = vcombine.high %v3460_v8, %v3464_v10  ;;  %v8310_v28 = vcombine.low %v3460_v8, %v3464_v10 }
 0x47b   :  { %6517 = vmatpush1.bf16.msra.mxu1 %v8238_v22  ;;  %v8439_v22 = vcombine.high %v3588_v4, %v3592_v11  ;;  %v8438_v51 = vcombine.low %v3588_v4, %v3592_v11  ;;  %v3692_v10 = vld [vmem:[#allocation4 + $0x980] sm:$0xff] }
 0x47c   :  { %6558 = vmatpush1.bf16.msra.mxu0 %v8366_v23  ;;  %6518 = vmatprep.subr.bf16.mxu1 %v8359_v25  ;;  %v3452_v23 = vld [vmem:[#allocation4 + $0x200] sm:$0xff] }
 0x47d   :  { %6559 = vmatprep.subr.bf16.mxu0 %v8487_v26  ;;  %v3456_v25 = vld [vmem:[#allocation4 + $0x220] sm:$0xff] }
 0x47e   :  { %v3580_v26 = vld [vmem:[#allocation4 + $0x600] sm:$0xff]  ;;  %v8303_v29 = vcombine.high %v3452_v23, %v3456_v25 }
 0x47f   :  { %6519 = vmatpush2.bf16.msra.mxu1 %v8358_v30  ;;  %v8431_v30 = vcombine.high %v3580_v26, %v3584_v27  ;;  %v3696_v4 = vld [vmem:[#allocation4 + $0x9a0] sm:$0xff] }
 0x480   :  { %6560 = vmatpush2.bf16.msra.mxu0 %v8486_v61  ;;  %6520 = vmatprep.subr.bf16.mxu1 %v8351_v31  ;;  %v8302_v61 = vcombine.low %v3452_v23, %v3456_v25  ;;  %v8430_v31 = vcombine.low %v3580_v26, %v3584_v27  ;;  %v3684_v26 = vld [vmem:[#allocation4 + $0x940] sm:$0xff] }
 0x481   :  { %6561 = vmatprep.subr.bf16.mxu0 %v8479_v32  ;;  %v8551_v32 = vcombine.high %v9752_v42, %v9754_v21  ;;  %v3688_v27 = vld [vmem:[#allocation4 + $0x960] sm:$0xff] }
 0x483   :  { %6521 = vmatpush2.bf16.msra.mxu1 %v8350_v38 }
 0x484   :  { %6562 = vmatpush2.bf16.msra.mxu0 %v8478_v39  ;;  %6522 = vmatprep.subr.bf16.mxu1 %v8343_v40 }
 0x485   :  { %6563 = vmatprep.subr.bf16.mxu0 %v8471_v41 }
 0x487   :  { %6523 = vmatpush2.bf16.msra.mxu1 %v8342_v48  ;;  %v3327_v48 = vrot.slane %v9776_v9, %v9685_v56 }
 0x488   :  { %6564 = vmatpush2.bf16.msra.mxu0 %v8470_v54  ;;  %6524 = vmatprep.subr.bf16.mxu1 %v8335_v55  ;;  %v3335_v55 = vrot.slane %v9776_v9, %v3334_v33 }
 0x489   :  { %6565 = vmatprep.subr.bf16.mxu0 %v8463_v45 }
 0x48b   :  { %6525 = vmatpush2.bf16.msra.mxu1 %v8334_v62  ;;  %v3339_v62 = vrot.slane %v9776_v9, %v3338_v47 }
 0x48c   :  { %6566 = vmatpush2.bf16.msra.mxu0 %v8462_v63  ;;  %6526 = vmatprep.subr.bf16.mxu1 %v8327_v1 }
 0x48d   :  { %6567 = vmatprep.subr.bf16.mxu0 %v8455_v19 }
 0x48f   :  { %6527 = vmatpush2.bf16.msra.mxu1 %v8326_v5 }
 0x490   :  { %6568 = vmatpush2.bf16.msra.mxu0 %v8454_v37  ;;  %6528 = vmatprep.subr.bf16.mxu1 %v8319_v6 }
 0x491   :  { %6569 = vmatprep.subr.bf16.mxu0 %v8447_v7 }
 0x493   :  { %6529 = vmatpush2.bf16.msra.mxu1 %v8318_v13  ;;  %v3820_v13 = vld [vmem:[#allocation4 + $0xd80] sm:$0xff] }
 0x494   :  { %6570 = vmatpush2.bf16.msra.mxu0 %v8446_v14  ;;  %6530 = vmatprep.subr.bf16.mxu1 %v8311_v18  ;;  %v3824_v14 = vld [vmem:[#allocation4 + $0xda0] sm:$0xff] }
 0x495   :  { %6571 = vmatprep.subr.bf16.mxu0 %v8439_v22  ;;  %v8671_v25 = vcombine.high %v3820_v13, %v3824_v14 }
 0x497   :  { %6531 = vmatpush2.bf16.msra.mxu1 %v8310_v28  ;;  %v3812_v28 = vld [vmem:[#allocation4 + $0xd40] sm:$0xff] }
 0x498   :  { %6572 = vmatpush2.bf16.msra.mxu0 %v8438_v51  ;;  %6532 = vmatprep.subr.bf16.mxu1 %v8303_v29  ;;  %v3816_v51 = vld [vmem:[#allocation4 + $0xd60] sm:$0xff]  ;;  %v8542_v29 = vcombine.low %v3692_v10, %v3696_v4 }
 0x499   :  { %6573 = vmatprep.subr.bf16.mxu0 %v8431_v30  ;;  %v8670_v30 = vcombine.low %v3820_v13, %v3824_v14  ;;  %v8662_v42 = vcombine.low %v3812_v28, %v3816_v51 }
 0x49b   :  { %6533 = vmatpush2.bf16.msra.mxu1 %v8302_v61  ;;  %v8535_v61 = vcombine.high %v3684_v26, %v3688_v27 }
 0x49c   :  { %6574 = vmatpush2.bf16.msra.mxu0 %v8430_v31  ;;  %6584 = vmatprep.subr.bf16.mxu1 %v8551_v32  ;;  %v8663_v31 = vcombine.high %v3812_v28, %v3816_v51  ;;  %v3676_v32 = vld [vmem:[#allocation4 + $0x900] sm:$0xff] }
 0x49d   :  { %6625 = vmatprep.subr.bf16.mxu0 %v8679_v34  ;;  %v3680_v34 = vld [vmem:[#allocation4 + $0x920] sm:$0xff] }
 0x49e   :  { %v9768_v35 = vpop.f32.mrf.mxu1  ;;  %v8527_v21 = vcombine.high %v3676_v32, %v3680_v34 }
 0x49f   :  { %v9770_v36 = vpop.f32.mrf.mxu0 }
 0x4a0   :  { %v9772_v17 = vpop.f32.mrf.mxu1 }
 0x4a1   :  { %v9774_v38 = vpop.f32.mrf.mxu0 }
 0x4a2   :  { %v2460_v39 = vpop.f32.mrf.mxu1 }
 0x4a3   :  { %v2501_v40 = vpop.f32.mrf.mxu0  ;;  %v3804_v39 = vld [vmem:[#allocation4 + $0xd00] sm:$0xff] }
 0x4a4   :  { %v2461_v41 = vpop.f32.mrf.mxu1  ;;  %v3808_v40 = vld [vmem:[#allocation4 + $0xd20] sm:$0xff] }
 0x4a5   :  { %v2502_v44 = vpop.f32.mrf.mxu0  ;;  %v8534_v41 = vcombine.low %v3684_v26, %v3688_v27  ;;  %v3892_v26 = vld [vmem:[#allocation4 + $0xfc0] sm:$0xff] }
 0x4a6   :  { %v3668_v44 = vld [vmem:[#allocation4 + $0x8c0] sm:$0xff] }
 0x4a7   :  { %v3896_v27 = vld [vmem:[#allocation4 + $0xfe0] sm:$0xff] }
 0x4de   :  { %v3192_v54 = vpop.f32.mrf.mxu1 }
 0x4df   :  { %v3193_v45 = vadd.f32 %v3192_v54, %v9742_v12  ;;  %v3233_v52 = vpop.f32.mrf.mxu0  ;;  %v8654_v54 = vcombine.low %v3804_v39, %v3808_v40 }
 0x4e0   :  { %v3234_v58 = vadd.f32 %v3233_v52, %v9745_v15  ;;  %v3194_v60 = vpop.f32.mrf.mxu1  ;;  %v3660_v52 = vld [vmem:[#allocation4 + $0x880] sm:$0xff] }
 0x4e1   :  { %v3364_v63 = vadd.f32 %v3327_v48, %v3193_v45  ;;  %v3195_v1 = vadd.f32 %v3194_v60, %v9748_v20  ;;  %v3235_v19 = vpop.f32.mrf.mxu0  ;;  %v8526_v48 = vcombine.low %v3676_v32, %v3680_v34  ;;  %v3792_v60 = vld [vmem:[#allocation4 + $0xca0] sm:$0xff] }
 0x4e2   :  { %v3366_v2 = vadd.f32 %v3335_v55, %v3234_v58  ;;  %v3236_v3 = vadd.f32 %v3235_v19, %v9750_v24  ;;  %v3196_v0 = vpop.f32.mrf.mxu1  ;;  %v8543_v24 = vcombine.high %v3692_v10, %v3696_v4  ;;  %v8519_v55 = vcombine.high %v3668_v44, %v3672_v43  ;;  %v3788_v58 = vld [vmem:[#allocation4 + $0xc80] sm:$0xff] }
 0x4e3   :  { %v3365_v12 = vadd.f32 %v3331_v57, %v3195_v1  ;;  %v3237_v16 = vpop.f32.mrf.mxu0  ;;  %v3372_v5 = vmax.f32 %v3364_v63, 0.0  ;;  %v3664_v57 = vld [vmem:[#allocation4 + $0x8a0] sm:$0xff]  ;;  %v8639_v19 = vcombine.high %v3788_v58, %v3792_v60 }
 0x4e4   :  { %v3367_v37 = vadd.f32 %v3339_v62, %v3236_v3  ;;  %v3197_v6 = vpop.f32.mrf.mxu1  ;;  %v3374_v7 = vmax.f32 %v3366_v2, 0.0  ;;  %v8518_v62 = vcombine.low %v3668_v44, %v3672_v43  ;;  %v8511_v1 = vcombine.high %v3660_v52, %v3664_v57  ;;  %v3652_v2 = vld [vmem:[#allocation4 + $0x840] sm:$0xff] }
 0x4e5   :  { %v3373_v15 = vmax.f32 %v3365_v12, 0.0  ;;  %v3238_v8 = vpop.f32.mrf.mxu0  ;;  %v9796_v20 = vpack.c.bf16 %v3372_v5, %v3372_v5  ;;  %v3656_v3 = vld [vmem:[#allocation4 + $0x860] sm:$0xff]  ;;  %v8510_v16 = vcombine.low %v3660_v52, %v3664_v57  ;;  %v8638_v5 = vcombine.low %v3788_v58, %v3792_v60 }
 0x4e6   :  { %v3375_v11 = vmax.f32 %v3367_v37, 0.0  ;;  %v9800_v23 = vpack.c.bf16 %v3374_v7, %v3374_v7  ;;  %v3780_v0 = vld [vmem:[#allocation4 + $0xc40] sm:$0xff]  ;;  %v8503_v37 = vcombine.high %v3652_v2, %v3656_v3  ;;  %v8502_v4 = vcombine.low %v3652_v2, %v3656_v3 }
 0x4e7   :  { %v9794_v18 = vpack.c.bf16 %v3373_v15, %v3373_v15  ;;  %v3784_v12 = vld [vmem:[#allocation4 + $0xc60] sm:$0xff] }
 0x4e8   :  { %v9798_v22 = vpack.c.bf16 %v3375_v11, %v3375_v11  ;;  %v8631_v6 = vcombine.high %v3780_v0, %v3784_v12  ;;  %v3644_v7 = vld [vmem:[#allocation4 + $0x800] sm:$0xff]  ;;  %v8630_v11 = vcombine.low %v3780_v0, %v3784_v12 }
 0x4e9   :  { %6534 = vmatprep.mubr.bf16.mxu1 %v9794_v18  ;;  %v3648_v15 = vld [vmem:[#allocation4 + $0x820] sm:$0xff] }
 0x4ea   :  { %6575 = vmatprep.mubr.bf16.mxu0 %v9798_v22  ;;  %6535 = vmatmul.mubr.bf16.vlgmr.msra.gmra.mxu1 %v9796_v20  ;;  %v3772_v8 = vld [vmem:[#allocation4 + $0xc00] sm:$0xff]  ;;  %v8495_v13 = vcombine.high %v3644_v7, %v3648_v15  ;;  %v8494_v28 = vcombine.low %v3644_v7, %v3648_v15 }
 0x4eb   :  { %6576 = vmatmul.mubr.bf16.vlgmr.msra.gmra.mxu0 %v9800_v23  ;;  %6585 = vmatpush1.bf16.msra.mxu1 %v8550_v49  ;;  %v8655_v49 = vcombine.high %v3804_v39, %v3808_v40  ;;  %v3776_v10 = vld [vmem:[#allocation4 + $0xc20] sm:$0xff]  ;;  %v8742_v40 = vcombine.low %v3892_v26, %v3896_v27 }
 0x4ec   :  { %6626 = vmatpush1.bf16.msra.mxu0 %v8678_v50  ;;  %6586 = vmatprep.subr.bf16.mxu1 %v8543_v24  ;;  %v3800_v50 = vld [vmem:[#allocation4 + $0xce0] sm:$0xff]  ;;  %v8623_v14 = vcombine.high %v3772_v8, %v3776_v10  ;;  %v8622_v51 = vcombine.low %v3772_v8, %v3776_v10 }
 0x4ed   :  { %6627 = vmatprep.subr.bf16.mxu0 %v8671_v25  ;;  %v8647_v45 = vcombine.high %v3796_v46, %v3800_v50  ;;  %v8646_v63 = vcombine.low %v3796_v46, %v3800_v50  ;;  %v3764_v24 = vld [vmem:[#allocation4 + $0xbc0] sm:$0xff] }
 0x4ee   :  { %v3768_v25 = vld [vmem:[#allocation4 + $0xbe0] sm:$0xff] }
 0x4ef   :  { %6587 = vmatpush1.bf16.msra.mxu1 %v8542_v29  ;;  %v8615_v29 = vcombine.high %v3764_v24, %v3768_v25  ;;  %v3884_v32 = vld [vmem:[#allocation4 + $0xf80] sm:$0xff]  ;;  %v8614_v39 = vcombine.low %v3764_v24, %v3768_v25  ;;  %v3350_v25 = vsub.s32 6, %v9682_v53 }
 0x4f0   :  { %6628 = vmatpush1.bf16.msra.mxu0 %v8670_v30  ;;  %6588 = vmatprep.subr.bf16.mxu1 %v8535_v61  ;;  %v8743_v30 = vcombine.high %v3892_v26, %v3896_v27  ;;  %v3756_v61 = vld [vmem:[#allocation4 + $0xb80] sm:$0xff] }
 0x4f1   :  { %6629 = vmatprep.subr.bf16.mxu0 %v8663_v31  ;;  %v3760_v31 = vld [vmem:[#allocation4 + $0xba0] sm:$0xff] }
 0x4f2   :  { %v3888_v34 = vld [vmem:[#allocation4 + $0xfa0] sm:$0xff]  ;;  %v8606_v46 = vcombine.low %v3756_v61, %v3760_v31 }
 0x4f3   :  { %6589 = vmatpush1.bf16.msra.mxu1 %v8534_v41  ;;  %v8607_v41 = vcombine.high %v3756_v61, %v3760_v31  ;;  %v3876_v44 = vld [vmem:[#allocation4 + $0xf40] sm:$0xff]  ;;  %v8734_v50 = vcombine.low %v3884_v32, %v3888_v34 }
 0x4f4   :  { %6630 = vmatpush1.bf16.msra.mxu0 %v8662_v42  ;;  %6590 = vmatprep.subr.bf16.mxu1 %v8527_v21  ;;  %v8735_v42 = vcombine.high %v3884_v32, %v3888_v34  ;;  %v3748_v21 = vld [vmem:[#allocation4 + $0xb40] sm:$0xff] }
 0x4f5   :  { %6631 = vmatprep.subr.bf16.mxu0 %v8655_v49  ;;  %v3752_v49 = vld [vmem:[#allocation4 + $0xb60] sm:$0xff] }
 0x4f6   :  { %v3880_v43 = vld [vmem:[#allocation4 + $0xf60] sm:$0xff]  ;;  %v8598_v58 = vcombine.low %v3748_v21, %v3752_v49 }
 0x4f7   :  { %6591 = vmatpush1.bf16.msra.mxu1 %v8526_v48  ;;  %v8599_v48 = vcombine.high %v3748_v21, %v3752_v49  ;;  %v3868_v52 = vld [vmem:[#allocation4 + $0xf00] sm:$0xff]  ;;  %v8726_v60 = vcombine.low %v3876_v44, %v3880_v43 }
 0x4f8   :  { %6632 = vmatpush1.bf16.msra.mxu0 %v8654_v54  ;;  %6592 = vmatprep.subr.bf16.mxu1 %v8519_v55  ;;  %v8727_v54 = vcombine.high %v3876_v44, %v3880_v43  ;;  %v3740_v55 = vld [vmem:[#allocation4 + $0xb00] sm:$0xff] }
 0x4f9   :  { %6633 = vmatprep.subr.bf16.mxu0 %v8647_v45  ;;  %v3744_v45 = vld [vmem:[#allocation4 + $0xb20] sm:$0xff] }
 0x4fa   :  { %v3872_v57 = vld [vmem:[#allocation4 + $0xf20] sm:$0xff]  ;;  %v8590_v0 = vcombine.low %v3740_v55, %v3744_v45 }
 0x4fb   :  { %6593 = vmatpush1.bf16.msra.mxu1 %v8518_v62  ;;  %v8591_v62 = vcombine.high %v3740_v55, %v3744_v45  ;;  %v3860_v2 = vld [vmem:[#allocation4 + $0xec0] sm:$0xff]  ;;  %v8718_v12 = vcombine.low %v3868_v52, %v3872_v57 }
 0x4fc   :  { %6634 = vmatpush1.bf16.msra.mxu0 %v8646_v63  ;;  %6594 = vmatprep.subr.bf16.mxu1 %v8511_v1  ;;  %v8719_v63 = vcombine.high %v3868_v52, %v3872_v57  ;;  %v3732_v1 = vld [vmem:[#allocation4 + $0xac0] sm:$0xff] }
 0x4fd   :  { %6635 = vmatprep.subr.bf16.mxu0 %v8639_v19  ;;  %v3736_v19 = vld [vmem:[#allocation4 + $0xae0] sm:$0xff] }
 0x4fe   :  { %v3864_v3 = vld [vmem:[#allocation4 + $0xee0] sm:$0xff]  ;;  %v8582_v8 = vcombine.low %v3732_v1, %v3736_v19 }
 0x4ff   :  { %6595 = vmatpush1.bf16.msra.mxu1 %v8510_v16  ;;  %v8583_v16 = vcombine.high %v3732_v1, %v3736_v19  ;;  %v3852_v7 = vld [vmem:[#allocation4 + $0xe80] sm:$0xff]  ;;  %v8710_v10 = vcombine.low %v3860_v2, %v3864_v3  ;;  %v3573_v19 = vld [vmem:[#allocation4 + $0x5c8] sm:$0xff] }
 0x500   :  { %6636 = vmatpush1.bf16.msra.mxu0 %v8638_v5  ;;  %6596 = vmatprep.subr.bf16.mxu1 %v8503_v37  ;;  %v8711_v5 = vcombine.high %v3860_v2, %v3864_v3  ;;  %v3724_v37 = vld [vmem:[#allocation4 + $0xa80] sm:$0xff]  ;;  %v3577_v2 = vld [vmem:[#allocation4 + $0x5e8] sm:$0xff] }
 0x501   :  { %6637 = vmatprep.subr.bf16.mxu0 %v8631_v6  ;;  %v3728_v6 = vld [vmem:[#allocation4 + $0xaa0] sm:$0xff] }
 0x502   :  { %v3856_v15 = vld [vmem:[#allocation4 + $0xea0] sm:$0xff] }
 0x503   :  { %6597 = vmatpush1.bf16.msra.mxu1 %v8502_v4  ;;  %v8575_v4 = vcombine.high %v3724_v37, %v3728_v6  ;;  %v3720_v24 = vld [vmem:[#allocation4 + $0xa60] sm:$0xff] }
 0x504   :  { %6638 = vmatpush1.bf16.msra.mxu0 %v8630_v11  ;;  %6598 = vmatprep.subr.bf16.mxu1 %v8495_v13  ;;  %v8703_v11 = vcombine.high %v3852_v7, %v3856_v15  ;;  %v3342_v13 = vsub.s32 4, %v9682_v53  ;;  %v3844_v26 = vld [vmem:[#allocation4 + $0xe40] sm:$0xff] }
 0x505   :  { %6639 = vmatprep.subr.bf16.mxu0 %v8623_v14  ;;  %v3716_v14 = vld [vmem:[#allocation4 + $0xa40] sm:$0xff] }
 0x506   :  { %v3848_v27 = vld [vmem:[#allocation4 + $0xe60] sm:$0xff]  ;;  %v8567_v61 = vcombine.high %v3716_v14, %v3720_v24  ;;  %v3343_v31 = vrot.slane %v9776_v9, %v3342_v13 }
 0x507   :  { %6599 = vmatpush1.bf16.msra.mxu1 %v8494_v28  ;;  %v8574_v28 = vcombine.low %v3724_v37, %v3728_v6  ;;  %v8695_v32 = vcombine.high %v3844_v26, %v3848_v27  ;;  %v3708_v34 = vld [vmem:[#allocation4 + $0xa00] sm:$0xff] }
 0x508   :  { %6640 = vmatpush1.bf16.msra.mxu0 %v8622_v51  ;;  %6600 = vmatprep.subr.bf16.mxu1 %v8615_v29  ;;  %v3346_v51 = vsub.s32 5, %v9682_v53  ;;  %v8702_v29 = vcombine.low %v3852_v7, %v3856_v15  ;;  %v3840_v21 = vld [vmem:[#allocation4 + $0xe20] sm:$0xff] }
 0x509   :  { %6641 = vmatprep.subr.bf16.mxu0 %v8743_v30  ;;  %v3354_v30 = vsub.s32 7, %v9682_v53 }
 0x50a   :  { %v3347_v43 = vrot.slane %v9776_v9, %v3346_v51 }
 0x50b   :  { %6601 = vmatpush2.bf16.msra.mxu1 %v8614_v39  ;;  %v3712_v39 = vld [vmem:[#allocation4 + $0xa20] sm:$0xff]  ;;  %v3355_v55 = vrot.slane %v9776_v9, %v3354_v30 }
 0x50c   :  { %6642 = vmatpush2.bf16.msra.mxu0 %v8742_v40  ;;  %6602 = vmatprep.subr.bf16.mxu1 %v8607_v41  ;;  %v3351_v41 = vrot.slane %v9776_v9, %v3350_v25  ;;  %v8559_v45 = vcombine.high %v3708_v34, %v3712_v39  ;;  %v8558_v9 = vcombine.low %v3708_v34, %v3712_v39  ;;  %v3433_v34 = vld [vmem:[#allocation4 + $0x168] sm:$0xff] }
 0x50d   :  { %6643 = vmatprep.subr.bf16.mxu0 %v8735_v42  ;;  %v3836_v42 = vld [vmem:[#allocation4 + $0xe00] sm:$0xff] }
 0x50f   :  { %6603 = vmatpush2.bf16.msra.mxu1 %v8606_v46  ;;  %v8566_v46 = vcombine.low %v3716_v14, %v3720_v24  ;;  %v3565_v24 = vld [vmem:[#allocation4 + $0x588] sm:$0xff] }
 0x510   :  { %6644 = vmatpush2.bf16.msra.mxu0 %v8734_v50  ;;  %6604 = vmatprep.subr.bf16.mxu1 %v8599_v48  ;;  %v8694_v50 = vcombine.low %v3844_v26, %v3848_v27  ;;  %v3569_v26 = vld [vmem:[#allocation4 + $0x5a8] sm:$0xff] }
 0x511   :  { %6645 = vmatprep.subr.bf16.mxu0 %v8727_v54  ;;  %v8417_v39 = vcombine.high %v3565_v24, %v3569_v26 }
 0x513   :  { %6605 = vmatpush2.bf16.msra.mxu1 %v8598_v58  ;;  %v8687_v58 = vcombine.high %v3836_v42, %v3840_v21 }
 0x514   :  { %6646 = vmatpush2.bf16.msra.mxu0 %v8726_v60  ;;  %6606 = vmatprep.subr.bf16.mxu1 %v8591_v62  ;;  %v3445_v60 = vld [vmem:[#allocation4 + $0x1c8] sm:$0xff] }
 0x515   :  { %6647 = vmatprep.subr.bf16.mxu0 %v8719_v63  ;;  %v3449_v62 = vld [vmem:[#allocation4 + $0x1e8] sm:$0xff] }
 0x516   :  { %v8297_v37 = vcombine.high %v3445_v60, %v3449_v62  ;;  %v8296_v14 = vcombine.low %v3445_v60, %v3449_v62  ;;  %v3545_v60 = vld [vmem:[#allocation4 + $0x4e8] sm:$0xff] }
 0x517   :  { %6607 = vmatpush2.bf16.msra.mxu1 %v8590_v0 }
 0x518   :  { %6648 = vmatpush2.bf16.msra.mxu0 %v8718_v12  ;;  %6608 = vmatprep.subr.bf16.mxu1 %v8583_v16 }
 0x519   :  { %6649 = vmatprep.subr.bf16.mxu0 %v8711_v5 }
 0x51b   :  { %6609 = vmatpush2.bf16.msra.mxu1 %v8582_v8  ;;  %v8425_v8 = vcombine.high %v3573_v19, %v3577_v2 }
 0x51c   :  { %6650 = vmatpush2.bf16.msra.mxu0 %v8710_v10  ;;  %6610 = vmatprep.subr.bf16.mxu1 %v8575_v4  ;;  %v3437_v10 = vld [vmem:[#allocation4 + $0x188] sm:$0xff] }
 0x51d   :  { %6651 = vmatprep.subr.bf16.mxu0 %v8703_v11  ;;  %v3441_v4 = vld [vmem:[#allocation4 + $0x1a8] sm:$0xff] }
 0x51e   :  { %v3274_v40 = vpop.f32.mrf.mxu1 }
 0x51f   :  { %v3275_v49 = vadd.f32 %v3274_v40, %v9768_v35  ;;  %v3315_v44 = vpop.f32.mrf.mxu0  ;;  %6611 = vmatpush2.bf16.msra.mxu1 %v8574_v28  ;;  %v3557_v40 = vld [vmem:[#allocation4 + $0x548] sm:$0xff] }
 0x520   :  { %v3316_v48 = vadd.f32 %v3315_v44, %v9770_v36  ;;  %6652 = vmatpush2.bf16.msra.mxu0 %v8702_v29  ;;  %v3276_v54 = vpop.f32.mrf.mxu1  ;;  %6612 = vmatprep.subr.bf16.mxu1 %v8567_v61  ;;  %v8424_v29 = vcombine.low %v3573_v19, %v3577_v2  ;;  %v3405_v19 = vld [vmem:[#allocation4 + $0x88] sm:$0xff] }
 0x521   :  { %v3368_v52 = vadd.f32 %v3343_v31, %v3275_v49  ;;  %v3277_v35 = vadd.f32 %v3276_v54, %v9772_v17  ;;  %v3317_v57 = vpop.f32.mrf.mxu0  ;;  %6653 = vmatprep.subr.bf16.mxu0 %v8695_v32  ;;  %v8686_v17 = vcombine.low %v3836_v42, %v3840_v21  ;;  %v8289_v31 = vcombine.high %v3437_v10, %v3441_v4  ;;  %v3429_v32 = vld [vmem:[#allocation4 + $0x148] sm:$0xff] }
 0x522   :  { %v3370_v63 = vadd.f32 %v3351_v41, %v3316_v48  ;;  %v3318_v1 = vadd.f32 %v3317_v57, %v9774_v38  ;;  %v3278_v36 = vpop.f32.mrf.mxu1  ;;  %v3561_v41 = vld [vmem:[#allocation4 + $0x568] sm:$0xff]  ;;  %v8288_v42 = vcombine.low %v3437_v10, %v3441_v4  ;;  %v8416_v21 = vcombine.low %v3565_v24, %v3569_v26 }
 0x523   :  { %v3369_v3 = vadd.f32 %v3347_v43, %v3277_v35  ;;  %v3319_v0 = vpop.f32.mrf.mxu0  ;;  %6613 = vmatpush2.bf16.msra.mxu1 %v8566_v46  ;;  %v3376_v12 = vmax.f32 %v3368_v52, 0.0  ;;  %v8281_v49 = vcombine.high %v3429_v32, %v3433_v34  ;;  %v8409_v44 = vcombine.high %v3557_v40, %v3561_v41  ;;  %v3421_v43 = vld [vmem:[#allocation4 + $0x108] sm:$0xff] }
 0x524   :  { %v3371_v16 = vadd.f32 %v3355_v55, %v3318_v1  ;;  %6654 = vmatpush2.bf16.msra.mxu0 %v8694_v50  ;;  %v3279_v5 = vpop.f32.mrf.mxu1  ;;  %6614 = vmatprep.subr.bf16.mxu1 %v8559_v45  ;;  %v3378_v6 = vmax.f32 %v3370_v63, 0.0  ;;  %v3425_v46 = vld [vmem:[#allocation4 + $0x128] sm:$0xff]  ;;  %v8280_v54 = vcombine.low %v3429_v32, %v3433_v34  ;;  %v8408_v55 = vcombine.low %v3557_v40, %v3561_v41 }
 0x525   :  { %v3377_v7 = vmax.f32 %v3369_v3, 0.0  ;;  %v3320_v15 = vpop.f32.mrf.mxu0  ;;  %6655 = vmatprep.subr.bf16.mxu0 %v8687_v58  ;;  %v9834_v27 = vpack.c.bf16 %v3376_v12, %v3376_v12  ;;  %v3549_v50 = vld [vmem:[#allocation4 + $0x508] sm:$0xff]  ;;  %v8273_v45 = vcombine.high %v3421_v43, %v3425_v46  ;;  %v8272_v62 = vcombine.low %v3421_v43, %v3425_v46 }
 0x526   :  { %v3379_v38 = vmax.f32 %v3371_v16, 0.0  ;;  %v9838_v61 = vpack.c.bf16 %v3378_v6, %v3378_v6  ;;  %v3553_v48 = vld [vmem:[#allocation4 + $0x528] sm:$0xff] }
 0x527   :  { %v9832_v11 = vpack.c.bf16 %v3377_v7, %v3377_v7  ;;  %6615 = vmatpush2.bf16.msra.mxu1 %v8558_v9  ;;  %v8401_v52 = vcombine.high %v3549_v50, %v3553_v48  ;;  %v3413_v35 = vld [vmem:[#allocation4 + $0xc8] sm:$0xff]  ;;  %v8400_v63 = vcombine.low %v3549_v50, %v3553_v48 }
 0x528   :  { %v9836_v28 = vpack.c.bf16 %v3379_v38, %v3379_v38  ;;  %6656 = vmatpush2.bf16.msra.mxu0 %v8686_v17  ;;  %6666 = vmatprep.subr.bf16.mxu1 %v8297_v37  ;;  %v3417_v57 = vld [vmem:[#allocation4 + $0xe8] sm:$0xff] }
 0x529   :  { %6616 = vmatprep.mubr.bf16.mxu1 %v9832_v11  ;;  %6707 = vmatprep.subr.bf16.mxu0 %v8425_v8  ;;  %v3541_v58 = vld [vmem:[#allocation4 + $0x4c8] sm:$0xff]  ;;  %v8265_v1 = vcombine.high %v3413_v35, %v3417_v57  ;;  %v8264_v9 = vcombine.low %v3413_v35, %v3417_v57 }
 0x52a   :  { %6657 = vmatprep.mubr.bf16.mxu0 %v9836_v28  ;;  %6617 = vmatmul.mubr.bf16.vlgmr.msra.gmra.mxu1 %v9834_v27  ;;  %v8393_v36 = vcombine.high %v3541_v58, %v3545_v60  ;;  %v3409_v2 = vld [vmem:[#allocation4 + $0xa8] sm:$0xff]  ;;  %v8392_v12 = vcombine.low %v3541_v58, %v3545_v60 }
 0x52b   :  { %6658 = vmatmul.mubr.bf16.vlgmr.msra.gmra.mxu0 %v9838_v61  ;;  %6667 = vmatpush1.bf16.msra.mxu1 %v8296_v14  ;;  %v3533_v3 = vld [vmem:[#allocation4 + $0x488] sm:$0xff]  ;;  %v8257_v16 = vcombine.high %v3405_v19, %v3409_v2  ;;  %v8256_v15 = vcombine.low %v3405_v19, %v3409_v2 }
 0x52c   :  { %6708 = vmatpush1.bf16.msra.mxu0 %v8424_v29  ;;  %6698 = vmatprep.mubr.bf16.mxu1 %v9794_v18  ;;  %v3537_v0 = vld [vmem:[#allocation4 + $0x4a8] sm:$0xff] }
 0x52d   :  { %6739 = vmatprep.mubr.bf16.mxu0 %v9798_v22  ;;  %6668 = vmatprep.subr.bf16.mxu1 %v8289_v31  ;;  %v8385_v5 = vcombine.high %v3533_v3, %v3537_v0  ;;  %v3397_v17 = vld [vmem:[#allocation4 + $0x48] sm:$0xff]  ;;  %v8384_v8 = vcombine.low %v3533_v3, %v3537_v0 }
 0x52e   :  { %6709 = vmatprep.subr.bf16.mxu0 %v8417_v39  ;;  %v3401_v37 = vld [vmem:[#allocation4 + $0x68] sm:$0xff] }
 0x52f   :  { %6669 = vmatpush1.bf16.msra.mxu1 %v8288_v42  ;;  %v3525_v6 = vld [vmem:[#allocation4 + $0x448] sm:$0xff]  ;;  %v8249_v38 = vcombine.high %v3397_v17, %v3401_v37  ;;  %v8248_v29 = vcombine.low %v3397_v17, %v3401_v37 }
 0x530   :  { %6710 = vmatpush1.bf16.msra.mxu0 %v8416_v21  ;;  %6670 = vmatprep.subr.bf16.mxu1 %v8281_v49  ;;  %v3529_v7 = vld [vmem:[#allocation4 + $0x468] sm:$0xff] }
 0x531   :  { %6711 = vmatprep.subr.bf16.mxu0 %v8409_v44  ;;  %v8377_v10 = vcombine.high %v3525_v6, %v3529_v7  ;;  %v3389_v4 = vld [vmem:[#allocation4 + $0x8] sm:$0xff]  ;;  %v8376_v31 = vcombine.low %v3525_v6, %v3529_v7 }
 0x532   :  { %v3393_v14 = vld [vmem:[#allocation4 + $0x28] sm:$0xff] }
 0x533   :  { %6671 = vmatpush1.bf16.msra.mxu1 %v8280_v54  ;;  %v3517_v24 = vld [vmem:[#allocation4 + $0x408] sm:$0xff]  ;;  %v8241_v32 = vcombine.high %v3389_v4, %v3393_v14  ;;  %v8240_v21 = vcombine.low %v3389_v4, %v3393_v14 }
 0x534   :  { %6712 = vmatpush1.bf16.msra.mxu0 %v8408_v55  ;;  %6672 = vmatprep.subr.bf16.mxu1 %v8273_v45  ;;  %v3521_v26 = vld [vmem:[#allocation4 + $0x428] sm:$0xff] }
 0x535   :  { %6713 = vmatprep.subr.bf16.mxu0 %v8401_v52  ;;  %v8369_v34 = vcombine.high %v3517_v24, %v3521_v26  ;;  %v3509_v39 = vld [vmem:[#allocation4 + $0x3c8] sm:$0xff]  ;;  %v8368_v49 = vcombine.low %v3517_v24, %v3521_v26 }
 0x536   :  { %v3513_v40 = vld [vmem:[#allocation4 + $0x3e8] sm:$0xff] }
 0x537   :  { %6673 = vmatpush1.bf16.msra.mxu1 %v8272_v62  ;;  %v3637_v41 = vld [vmem:[#allocation4 + $0x7c8] sm:$0xff]  ;;  %v8361_v44 = vcombine.high %v3509_v39, %v3513_v40  ;;  %v8360_v55 = vcombine.low %v3509_v39, %v3513_v40 }
 0x538   :  { %6714 = vmatpush1.bf16.msra.mxu0 %v8400_v63  ;;  %6674 = vmatprep.subr.bf16.mxu1 %v8265_v1  ;;  %v3641_v42 = vld [vmem:[#allocation4 + $0x7e8] sm:$0xff] }
 0x539   :  { %6715 = vmatprep.subr.bf16.mxu0 %v8393_v36  ;;  %v8489_v43 = vcombine.high %v3637_v41, %v3641_v42  ;;  %v3501_v46 = vld [vmem:[#allocation4 + $0x388] sm:$0xff]  ;;  %v8488_v45 = vcombine.low %v3637_v41, %v3641_v42 }
 0x53a   :  { %v3505_v50 = vld [vmem:[#allocation4 + $0x3a8] sm:$0xff] }
 0x53b   :  { %6675 = vmatpush1.bf16.msra.mxu1 %v8264_v9  ;;  %v3629_v48 = vld [vmem:[#allocation4 + $0x788] sm:$0xff]  ;;  %v8353_v52 = vcombine.high %v3501_v46, %v3505_v50  ;;  %v8352_v63 = vcombine.low %v3501_v46, %v3505_v50 }
 0x53c   :  { %6716 = vmatpush1.bf16.msra.mxu0 %v8392_v12  ;;  %6676 = vmatprep.subr.bf16.mxu1 %v8257_v16  ;;  %v3633_v54 = vld [vmem:[#allocation4 + $0x7a8] sm:$0xff] }
 0x53d   :  { %6717 = vmatprep.subr.bf16.mxu0 %v8385_v5  ;;  %v8481_v35 = vcombine.high %v3629_v48, %v3633_v54  ;;  %v3493_v57 = vld [vmem:[#allocation4 + $0x348] sm:$0xff]  ;;  %v8480_v1 = vcombine.low %v3629_v48, %v3633_v54 }
 0x53e   :  { %v3497_v58 = vld [vmem:[#allocation4 + $0x368] sm:$0xff] }
 0x53f   :  { %6677 = vmatpush1.bf16.msra.mxu1 %v8256_v15  ;;  %v3621_v60 = vld [vmem:[#allocation4 + $0x748] sm:$0xff]  ;;  %v8345_v36 = vcombine.high %v3493_v57, %v3497_v58  ;;  %v8344_v12 = vcombine.low %v3493_v57, %v3497_v58 }
 0x540   :  { %6718 = vmatpush1.bf16.msra.mxu0 %v8384_v8  ;;  %6678 = vmatprep.subr.bf16.mxu1 %v8249_v38  ;;  %v3625_v62 = vld [vmem:[#allocation4 + $0x768] sm:$0xff] }
 0x541   :  { %6719 = vmatprep.subr.bf16.mxu0 %v8377_v10  ;;  %v8473_v19 = vcombine.high %v3621_v60, %v3625_v62  ;;  %v3485_v2 = vld [vmem:[#allocation4 + $0x308] sm:$0xff]  ;;  %v8472_v16 = vcombine.low %v3621_v60, %v3625_v62 }
 0x542   :  { %v3489_v3 = vld [vmem:[#allocation4 + $0x328] sm:$0xff] }
 0x543   :  { %6679 = vmatpush1.bf16.msra.mxu1 %v8248_v29  ;;  %v3613_v0 = vld [vmem:[#allocation4 + $0x708] sm:$0xff]  ;;  %v8337_v5 = vcombine.high %v3485_v2, %v3489_v3  ;;  %v8336_v8 = vcombine.low %v3485_v2, %v3489_v3 }
 0x544   :  { %6720 = vmatpush1.bf16.msra.mxu0 %v8376_v31  ;;  %6680 = vmatprep.subr.bf16.mxu1 %v8241_v32  ;;  %v3617_v9 = vld [vmem:[#allocation4 + $0x728] sm:$0xff] }
 0x545   :  { %6721 = vmatprep.subr.bf16.mxu0 %v8369_v34  ;;  %v8465_v17 = vcombine.high %v3613_v0, %v3617_v9  ;;  %v3477_v37 = vld [vmem:[#allocation4 + $0x2c8] sm:$0xff]  ;;  %v8464_v38 = vcombine.low %v3613_v0, %v3617_v9 }
 0x546   :  { %v3481_v6 = vld [vmem:[#allocation4 + $0x2e8] sm:$0xff] }
 0x547   :  { %6681 = vmatpush1.bf16.msra.mxu1 %v8240_v21  ;;  %v3605_v7 = vld [vmem:[#allocation4 + $0x6c8] sm:$0xff]  ;;  %v8329_v10 = vcombine.high %v3477_v37, %v3481_v6  ;;  %v8328_v31 = vcombine.low %v3477_v37, %v3481_v6 }
 0x548   :  { %6722 = vmatpush1.bf16.msra.mxu0 %v8368_v49  ;;  %6682 = vmatprep.subr.bf16.mxu1 %v8361_v44  ;;  %v3609_v15 = vld [vmem:[#allocation4 + $0x6e8] sm:$0xff] }
 0x549   :  { %6723 = vmatprep.subr.bf16.mxu0 %v8489_v43  ;;  %v8457_v4 = vcombine.high %v3605_v7, %v3609_v15  ;;  %v3469_v14 = vld [vmem:[#allocation4 + $0x288] sm:$0xff]  ;;  %v8456_v32 = vcombine.low %v3605_v7, %v3609_v15 }
 0x54a   :  { %v3473_v24 = vld [vmem:[#allocation4 + $0x2a8] sm:$0xff] }
 0x54b   :  { %6683 = vmatpush2.bf16.msra.mxu1 %v8360_v55  ;;  %v3597_v26 = vld [vmem:[#allocation4 + $0x688] sm:$0xff]  ;;  %v8321_v34 = vcombine.high %v3469_v14, %v3473_v24  ;;  %v8320_v49 = vcombine.low %v3469_v14, %v3473_v24 }
 0x54c   :  { %6724 = vmatpush2.bf16.msra.mxu0 %v8488_v45  ;;  %6684 = vmatprep.subr.bf16.mxu1 %v8353_v52  ;;  %v3601_v29 = vld [vmem:[#allocation4 + $0x6a8] sm:$0xff] }
 0x54d   :  { %6725 = vmatprep.subr.bf16.mxu0 %v8481_v35  ;;  %v8449_v39 = vcombine.high %v3597_v26, %v3601_v29  ;;  %v3461_v40 = vld [vmem:[#allocation4 + $0x248] sm:$0xff]  ;;  %v8448_v44 = vcombine.low %v3597_v26, %v3601_v29 }
 0x54e   :  { %v3465_v41 = vld [vmem:[#allocation4 + $0x268] sm:$0xff] }
 0x54f   :  { %6685 = vmatpush2.bf16.msra.mxu1 %v8352_v63  ;;  %v3589_v42 = vld [vmem:[#allocation4 + $0x648] sm:$0xff]  ;;  %v8313_v43 = vcombine.high %v3461_v40, %v3465_v41  ;;  %v8312_v45 = vcombine.low %v3461_v40, %v3465_v41 }
 0x550   :  { %6726 = vmatpush2.bf16.msra.mxu0 %v8480_v1  ;;  %6686 = vmatprep.subr.bf16.mxu1 %v8345_v36  ;;  %v3593_v21 = vld [vmem:[#allocation4 + $0x668] sm:$0xff] }
 0x551   :  { %6727 = vmatprep.subr.bf16.mxu0 %v8473_v19  ;;  %v8441_v46 = vcombine.high %v3589_v42, %v3593_v21  ;;  %v3453_v50 = vld [vmem:[#allocation4 + $0x208] sm:$0xff]  ;;  %v8440_v52 = vcombine.low %v3589_v42, %v3593_v21 }
 0x552   :  { %v3457_v48 = vld [vmem:[#allocation4 + $0x228] sm:$0xff] }
 0x553   :  { %6687 = vmatpush2.bf16.msra.mxu1 %v8344_v12  ;;  %v3581_v54 = vld [vmem:[#allocation4 + $0x608] sm:$0xff]  ;;  %v8305_v35 = vcombine.high %v3453_v50, %v3457_v48  ;;  %v8304_v1 = vcombine.low %v3453_v50, %v3457_v48 }
 0x554   :  { %6728 = vmatpush2.bf16.msra.mxu0 %v8472_v16  ;;  %6688 = vmatprep.subr.bf16.mxu1 %v8337_v5  ;;  %v3585_v55 = vld [vmem:[#allocation4 + $0x628] sm:$0xff] }
 0x555   :  { %6729 = vmatprep.subr.bf16.mxu0 %v8465_v17  ;;  %v8433_v57 = vcombine.high %v3581_v54, %v3585_v55  ;;  %v3701_v58 = vld [vmem:[#allocation4 + $0x9c8] sm:$0xff]  ;;  %v8432_v36 = vcombine.low %v3581_v54, %v3585_v55 }
 0x556   :  { %v3705_v60 = vld [vmem:[#allocation4 + $0x9e8] sm:$0xff] }
 0x557   :  { %6689 = vmatpush2.bf16.msra.mxu1 %v8336_v8  ;;  %v3829_v62 = vld [vmem:[#allocation4 + $0xdc8] sm:$0xff]  ;;  %v8553_v19 = vcombine.high %v3701_v58, %v3705_v60  ;;  %v8552_v9 = vcombine.low %v3701_v58, %v3705_v60 }
 0x558   :  { %6730 = vmatpush2.bf16.msra.mxu0 %v8464_v38  ;;  %6690 = vmatprep.subr.bf16.mxu1 %v8329_v10  ;;  %v3833_v63 = vld [vmem:[#allocation4 + $0xde8] sm:$0xff] }
 0x559   :  { %6731 = vmatprep.subr.bf16.mxu0 %v8457_v4  ;;  %v8681_v2 = vcombine.high %v3829_v62, %v3833_v63  ;;  %v3693_v3 = vld [vmem:[#allocation4 + $0x988] sm:$0xff]  ;;  %v8680_v5 = vcombine.low %v3829_v62, %v3833_v63 }
 0x55a   :  { %v3697_v0 = vld [vmem:[#allocation4 + $0x9a8] sm:$0xff] }
 0x55b   :  { %6691 = vmatpush2.bf16.msra.mxu1 %v8328_v31  ;;  %v3821_v12 = vld [vmem:[#allocation4 + $0xd88] sm:$0xff]  ;;  %v8545_v17 = vcombine.high %v3693_v3, %v3697_v0  ;;  %v8544_v38 = vcombine.low %v3693_v3, %v3697_v0 }
 0x55c   :  { %6732 = vmatpush2.bf16.msra.mxu0 %v8456_v32  ;;  %6692 = vmatprep.subr.bf16.mxu1 %v8321_v34  ;;  %v3825_v16 = vld [vmem:[#allocation4 + $0xda8] sm:$0xff] }
 0x55d   :  { %6733 = vmatprep.subr.bf16.mxu0 %v8449_v39  ;;  %v3685_v37 = vld [vmem:[#allocation4 + $0x948] sm:$0xff]  ;;  %v8673_v7 = vcombine.high %v3821_v12, %v3825_v16  ;;  %v8672_v10 = vcombine.low %v3821_v12, %v3825_v16 }
 0x55e   :  { %v3689_v6 = vld [vmem:[#allocation4 + $0x968] sm:$0xff] }
 0x55f   :  { %6693 = vmatpush2.bf16.msra.mxu1 %v8320_v49  ;;  %v3813_v15 = vld [vmem:[#allocation4 + $0xd48] sm:$0xff]  ;;  %v8537_v4 = vcombine.high %v3685_v37, %v3689_v6  ;;  %v8536_v32 = vcombine.low %v3685_v37, %v3689_v6 }
 0x560   :  { %6734 = vmatpush2.bf16.msra.mxu0 %v8448_v44  ;;  %6694 = vmatprep.subr.bf16.mxu1 %v8313_v43  ;;  %v3817_v8 = vld [vmem:[#allocation4 + $0xd68] sm:$0xff] }
 0x561   :  { %6735 = vmatprep.subr.bf16.mxu0 %v8441_v46  ;;  %v8665_v14 = vcombine.high %v3813_v15, %v3817_v8  ;;  %v3677_v24 = vld [vmem:[#allocation4 + $0x908] sm:$0xff]  ;;  %v8664_v34 = vcombine.low %v3813_v15, %v3817_v8 }
 0x562   :  { %v3681_v26 = vld [vmem:[#allocation4 + $0x928] sm:$0xff] }
 0x563   :  { %6695 = vmatpush2.bf16.msra.mxu1 %v8312_v45  ;;  %v3805_v29 = vld [vmem:[#allocation4 + $0xd08] sm:$0xff]  ;;  %v8529_v39 = vcombine.high %v3677_v24, %v3681_v26  ;;  %v8528_v44 = vcombine.low %v3677_v24, %v3681_v26 }
 0x564   :  { %6736 = vmatpush2.bf16.msra.mxu0 %v8440_v52  ;;  %6696 = vmatprep.subr.bf16.mxu1 %v8305_v35  ;;  %v3809_v31 = vld [vmem:[#allocation4 + $0xd28] sm:$0xff] }
 0x565   :  { %6737 = vmatprep.subr.bf16.mxu0 %v8433_v57  ;;  %v8657_v40 = vcombine.high %v3805_v29, %v3809_v31  ;;  %v3669_v41 = vld [vmem:[#allocation4 + $0x8c8] sm:$0xff]  ;;  %v8656_v43 = vcombine.low %v3805_v29, %v3809_v31 }
 0x566   :  { %v3673_v42 = vld [vmem:[#allocation4 + $0x8e8] sm:$0xff] }
 0x567   :  { %6697 = vmatpush2.bf16.msra.mxu1 %v8304_v1  ;;  %v3797_v21 = vld [vmem:[#allocation4 + $0xcc8] sm:$0xff]  ;;  %v8521_v46 = vcombine.high %v3669_v41, %v3673_v42  ;;  %v8520_v52 = vcombine.low %v3669_v41, %v3673_v42 }
 0x568   :  { %6738 = vmatpush2.bf16.msra.mxu0 %v8432_v36  ;;  %6748 = vmatprep.subr.bf16.mxu1 %v8553_v19  ;;  %v3801_v49 = vld [vmem:[#allocation4 + $0xce8] sm:$0xff] }
 0x569   :  { %6789 = vmatprep.subr.bf16.mxu0 %v8681_v2  ;;  %v8649_v50 = vcombine.high %v3797_v21, %v3801_v49  ;;  %v3661_v48 = vld [vmem:[#allocation4 + $0x888] sm:$0xff]  ;;  %v8648_v35 = vcombine.low %v3797_v21, %v3801_v49 }
 0x56a   :  { %6699 = vmatmul.mubr.bf16.vlgmr.msra.gmra.mxu1 %v9796_v20  ;;  %v3665_v54 = vld [vmem:[#allocation4 + $0x8a8] sm:$0xff] }
 0x56b   :  { %6740 = vmatmul.mubr.bf16.vlgmr.msra.gmra.mxu0 %v9800_v23  ;;  %6749 = vmatpush1.bf16.msra.mxu1 %v8552_v9  ;;  %v3789_v55 = vld [vmem:[#allocation4 + $0xc88] sm:$0xff]  ;;  %v8513_v57 = vcombine.high %v3661_v48, %v3665_v54  ;;  %v8512_v36 = vcombine.low %v3661_v48, %v3665_v54 }
 0x56c   :  { %6780 = vmatprep.mubr.bf16.mxu1 %v9832_v11  ;;  %6790 = vmatpush1.bf16.msra.mxu0 %v8680_v5  ;;  %v3793_v45 = vld [vmem:[#allocation4 + $0xca8] sm:$0xff] }
 0x56d   :  { %6821 = vmatprep.mubr.bf16.mxu0 %v9836_v28  ;;  %6750 = vmatprep.subr.bf16.mxu1 %v8545_v17  ;;  %v8641_v58 = vcombine.high %v3789_v55, %v3793_v45  ;;  %v3653_v60 = vld [vmem:[#allocation4 + $0x848] sm:$0xff]  ;;  %v8640_v19 = vcombine.low %v3789_v55, %v3793_v45 }
 0x56e   :  { %6791 = vmatprep.subr.bf16.mxu0 %v8673_v7  ;;  %v3657_v62 = vld [vmem:[#allocation4 + $0x868] sm:$0xff] }
 0x56f   :  { %6751 = vmatpush1.bf16.msra.mxu1 %v8544_v38  ;;  %v3781_v63 = vld [vmem:[#allocation4 + $0xc48] sm:$0xff]  ;;  %v8505_v2 = vcombine.high %v3653_v60, %v3657_v62  ;;  %v8504_v5 = vcombine.low %v3653_v60, %v3657_v62 }
 0x570   :  { %6792 = vmatpush1.bf16.msra.mxu0 %v8672_v10  ;;  %6752 = vmatprep.subr.bf16.mxu1 %v8537_v4  ;;  %v3785_v1 = vld [vmem:[#allocation4 + $0xc68] sm:$0xff] }
 0x571   :  { %6793 = vmatprep.subr.bf16.mxu0 %v8665_v14  ;;  %v8633_v3 = vcombine.high %v3781_v63, %v3785_v1  ;;  %v3645_v0 = vld [vmem:[#allocation4 + $0x808] sm:$0xff]  ;;  %v8632_v17 = vcombine.low %v3781_v63, %v3785_v1 }
 0x572   :  { %v3649_v9 = vld [vmem:[#allocation4 + $0x828] sm:$0xff] }
 0x573   :  { %6753 = vmatpush1.bf16.msra.mxu1 %v8536_v32  ;;  %v3773_v12 = vld [vmem:[#allocation4 + $0xc08] sm:$0xff]  ;;  %v8497_v37 = vcombine.high %v3645_v0, %v3649_v9  ;;  %v8496_v10 = vcombine.low %v3645_v0, %v3649_v9 }
 0x574   :  { %6794 = vmatpush1.bf16.msra.mxu0 %v8664_v34  ;;  %6754 = vmatprep.subr.bf16.mxu1 %v8529_v39  ;;  %v3777_v16 = vld [vmem:[#allocation4 + $0xc28] sm:$0xff] }
 0x575   :  { %6795 = vmatprep.subr.bf16.mxu0 %v8657_v40  ;;  %v8625_v6 = vcombine.high %v3773_v12, %v3777_v16  ;;  %v3765_v7 = vld [vmem:[#allocation4 + $0xbc8] sm:$0xff]  ;;  %v8624_v4 = vcombine.low %v3773_v12, %v3777_v16 }
 0x576   :  { %v3769_v15 = vld [vmem:[#allocation4 + $0xbe8] sm:$0xff] }
 0x577   :  { %6755 = vmatpush1.bf16.msra.mxu1 %v8528_v44  ;;  %v3893_v8 = vld [vmem:[#allocation4 + $0xfc8] sm:$0xff]  ;;  %v8617_v14 = vcombine.high %v3765_v7, %v3769_v15  ;;  %v8616_v34 = vcombine.low %v3765_v7, %v3769_v15 }
 0x578   :  { %6796 = vmatpush1.bf16.msra.mxu0 %v8656_v43  ;;  %6756 = vmatprep.subr.bf16.mxu1 %v8521_v46  ;;  %v3897_v38 = vld [vmem:[#allocation4 + $0xfe8] sm:$0xff] }
 0x579   :  { %6797 = vmatprep.subr.bf16.mxu0 %v8649_v50  ;;  %v8745_v24 = vcombine.high %v3893_v8, %v3897_v38  ;;  %v3757_v26 = vld [vmem:[#allocation4 + $0xb88] sm:$0xff]  ;;  %v8744_v39 = vcombine.low %v3893_v8, %v3897_v38 }
 0x57a   :  { %v3761_v29 = vld [vmem:[#allocation4 + $0xba8] sm:$0xff] }
 0x57b   :  { %6757 = vmatpush1.bf16.msra.mxu1 %v8520_v52  ;;  %v3885_v31 = vld [vmem:[#allocation4 + $0xf88] sm:$0xff]  ;;  %v8609_v40 = vcombine.high %v3757_v26, %v3761_v29  ;;  %v8608_v43 = vcombine.low %v3757_v26, %v3761_v29 }
 0x57c   :  { %6798 = vmatpush1.bf16.msra.mxu0 %v8648_v35  ;;  %6758 = vmatprep.subr.bf16.mxu1 %v8513_v57  ;;  %v3889_v32 = vld [vmem:[#allocation4 + $0xfa8] sm:$0xff] }
 0x57d   :  { %6799 = vmatprep.subr.bf16.mxu0 %v8641_v58  ;;  %v8737_v41 = vcombine.high %v3885_v31, %v3889_v32  ;;  %v3749_v42 = vld [vmem:[#allocation4 + $0xb48] sm:$0xff]  ;;  %v8736_v46 = vcombine.low %v3885_v31, %v3889_v32 }
 0x57e   :  { %v3753_v21 = vld [vmem:[#allocation4 + $0xb68] sm:$0xff] }
 0x57f   :  { %6759 = vmatpush1.bf16.msra.mxu1 %v8512_v36  ;;  %v3877_v49 = vld [vmem:[#allocation4 + $0xf48] sm:$0xff]  ;;  %v8601_v50 = vcombine.high %v3749_v42, %v3753_v21  ;;  %v8600_v35 = vcombine.low %v3749_v42, %v3753_v21  ;;  %v3446_v21 = vld [vmem:[#allocation4 + $0x1d0] sm:$0xff] }
 0x580   :  { %6800 = vmatpush1.bf16.msra.mxu0 %v8640_v19  ;;  %6760 = vmatprep.subr.bf16.mxu1 %v8505_v2  ;;  %v3881_v44 = vld [vmem:[#allocation4 + $0xf68] sm:$0xff] }
 0x581   :  { %6801 = vmatprep.subr.bf16.mxu0 %v8633_v3  ;;  %v8729_v48 = vcombine.high %v3877_v49, %v3881_v44  ;;  %v3741_v54 = vld [vmem:[#allocation4 + $0xb08] sm:$0xff]  ;;  %v8728_v57 = vcombine.low %v3877_v49, %v3881_v44  ;;  %v3450_v49 = vld [vmem:[#allocation4 + $0x1f0] sm:$0xff] }
 0x582   :  { %v3745_v55 = vld [vmem:[#allocation4 + $0xb28] sm:$0xff]  ;;  %v3574_v44 = vld [vmem:[#allocation4 + $0x5d0] sm:$0xff] }
 0x583   :  { %6761 = vmatpush1.bf16.msra.mxu1 %v8504_v5  ;;  %v3869_v45 = vld [vmem:[#allocation4 + $0xf08] sm:$0xff]  ;;  %v8593_v58 = vcombine.high %v3741_v54, %v3745_v55  ;;  %v8592_v19 = vcombine.low %v3741_v54, %v3745_v55  ;;  %v9850_v54 = vld [vmem:[#allocation19] sm:$0xff] }
 0x584   :  { %6802 = vmatpush1.bf16.msra.mxu0 %v8632_v17  ;;  %6762 = vmatprep.subr.bf16.mxu1 %v8497_v37  ;;  %v3873_v52 = vld [vmem:[#allocation4 + $0xf28] sm:$0xff] }
 0x585   :  { %6803 = vmatprep.subr.bf16.mxu0 %v8625_v6  ;;  %v8721_v60 = vcombine.high %v3869_v45, %v3873_v52  ;;  %v3733_v62 = vld [vmem:[#allocation4 + $0xac8] sm:$0xff]  ;;  %v8720_v2 = vcombine.low %v3869_v45, %v3873_v52  ;;  %v3438_v45 = vld [vmem:[#allocation4 + $0x190] sm:$0xff] }
 0x586   :  { %v3737_v63 = vld [vmem:[#allocation4 + $0xae8] sm:$0xff]  ;;  %v3442_v52 = vld [vmem:[#allocation4 + $0x1b0] sm:$0xff] }
 0x587   :  { %6763 = vmatpush1.bf16.msra.mxu1 %v8496_v10  ;;  %v3861_v1 = vld [vmem:[#allocation4 + $0xec8] sm:$0xff]  ;;  %v8585_v3 = vcombine.high %v3733_v62, %v3737_v63  ;;  %v8584_v17 = vcombine.low %v3733_v62, %v3737_v63  ;;  %v3909_v63 = vrot.slane %v9850_v54, %v9688_v59 }
 0x588   :  { %6804 = vmatpush1.bf16.msra.mxu0 %v8624_v4  ;;  %6764 = vmatprep.subr.bf16.mxu1 %v8617_v14  ;;  %v3865_v36 = vld [vmem:[#allocation4 + $0xee8] sm:$0xff] }
 0x589   :  { %6805 = vmatprep.subr.bf16.mxu0 %v8745_v24  ;;  %v8713_v0 = vcombine.high %v3861_v1, %v3865_v36  ;;  %v3725_v9 = vld [vmem:[#allocation4 + $0xa88] sm:$0xff]  ;;  %v8712_v37 = vcombine.low %v3861_v1, %v3865_v36  ;;  %v8291_v1 = vcombine.high %v3438_v45, %v3442_v52  ;;  %v3430_v36 = vld [vmem:[#allocation4 + $0x150] sm:$0xff] }
 0x58a   :  { %v3729_v12 = vld [vmem:[#allocation4 + $0xaa8] sm:$0xff] }
 0x58b   :  { %6765 = vmatpush2.bf16.msra.mxu1 %v8616_v34  ;;  %v3853_v16 = vld [vmem:[#allocation4 + $0xe88] sm:$0xff]  ;;  %v8577_v6 = vcombine.high %v3725_v9, %v3729_v12  ;;  %v8576_v4 = vcombine.low %v3725_v9, %v3729_v12  ;;  %v3562_v9 = vld [vmem:[#allocation4 + $0x570] sm:$0xff] }
 0x58c   :  { %6806 = vmatpush2.bf16.msra.mxu0 %v8744_v39  ;;  %6766 = vmatprep.subr.bf16.mxu1 %v8609_v40  ;;  %v3857_v5 = vld [vmem:[#allocation4 + $0xea8] sm:$0xff] }
 0x58d   :  { %6807 = vmatprep.subr.bf16.mxu0 %v8737_v41  ;;  %v8705_v7 = vcombine.high %v3853_v16, %v3857_v5  ;;  %v3717_v15 = vld [vmem:[#allocation4 + $0xa48] sm:$0xff]  ;;  %v8704_v14 = vcombine.low %v3853_v16, %v3857_v5  ;;  %v8290_v16 = vcombine.low %v3438_v45, %v3442_v52  ;;  %v3534_v45 = vld [vmem:[#allocation4 + $0x490] sm:$0xff] }
 0x58e   :  { %v3721_v8 = vld [vmem:[#allocation4 + $0xa68] sm:$0xff]  ;;  %v3538_v52 = vld [vmem:[#allocation4 + $0x4b0] sm:$0xff] }
 0x58f   :  { %6767 = vmatpush2.bf16.msra.mxu1 %v8608_v43  ;;  %v3845_v38 = vld [vmem:[#allocation4 + $0xe48] sm:$0xff]  ;;  %v8569_v24 = vcombine.high %v3717_v15, %v3721_v8  ;;  %v8568_v39 = vcombine.low %v3717_v15, %v3721_v8  ;;  %v3578_v43 = vld [vmem:[#allocation4 + $0x5f0] sm:$0xff] }
 0x590   :  { %6808 = vmatpush2.bf16.msra.mxu0 %v8736_v46  ;;  %6768 = vmatprep.subr.bf16.mxu1 %v8601_v50  ;;  %v3849_v10 = vld [vmem:[#allocation4 + $0xe68] sm:$0xff]  ;;  %v8427_v55 = vcombine.high %v3574_v44, %v3578_v43  ;;  %v8426_v62 = vcombine.low %v3574_v44, %v3578_v43  ;;  %v3422_v8 = vld [vmem:[#allocation4 + $0x110] sm:$0xff] }
 0x591   :  { %6809 = vmatprep.subr.bf16.mxu0 %v8729_v48  ;;  %v8697_v26 = vcombine.high %v3845_v38, %v3849_v10  ;;  %v3709_v29 = vld [vmem:[#allocation4 + $0xa08] sm:$0xff]  ;;  %v8696_v40 = vcombine.low %v3845_v38, %v3849_v10  ;;  %v8299_v48 = vcombine.high %v3446_v21, %v3450_v49  ;;  %v3426_v38 = vld [vmem:[#allocation4 + $0x130] sm:$0xff] }
 0x592   :  { %v3713_v31 = vld [vmem:[#allocation4 + $0xa28] sm:$0xff]  ;;  %v8274_v44 = vcombine.low %v3422_v8, %v3426_v38 }
 0x593   :  { %6769 = vmatpush2.bf16.msra.mxu1 %v8600_v35  ;;  %v3837_v32 = vld [vmem:[#allocation4 + $0xe08] sm:$0xff]  ;;  %v8561_v41 = vcombine.high %v3709_v29, %v3713_v31  ;;  %v8560_v46 = vcombine.low %v3709_v29, %v3713_v31  ;;  %v8298_v35 = vcombine.low %v3446_v21, %v3450_v49  ;;  %v3542_v21 = vld [vmem:[#allocation4 + $0x4d0] sm:$0xff] }
 0x594   :  { %6810 = vmatpush2.bf16.msra.mxu0 %v8728_v57  ;;  %6770 = vmatprep.subr.bf16.mxu1 %v8593_v58  ;;  %v3841_v34 = vld [vmem:[#allocation4 + $0xe28] sm:$0xff]  ;;  %v3905_v57 = vrot.slane %v9850_v54, %v9685_v56  ;;  %v3566_v58 = vld [vmem:[#allocation4 + $0x590] sm:$0xff] }
 0x595   :  { %6811 = vmatprep.subr.bf16.mxu0 %v8721_v60  ;;  %v8689_v42 = vcombine.high %v3837_v32, %v3841_v34  ;;  %v8688_v50 = vcombine.low %v3837_v32, %v3841_v34  ;;  %v3570_v60 = vld [vmem:[#allocation4 + $0x5b0] sm:$0xff]  ;;  %v8275_v34 = vcombine.high %v3422_v8, %v3426_v38 }
 0x596   :  { %v8418_v59 = vcombine.low %v3566_v58, %v3570_v60  ;;  %v3546_v49 = vld [vmem:[#allocation4 + $0x4f0] sm:$0xff] }
 0x597   :  { %6771 = vmatpush2.bf16.msra.mxu1 %v8592_v19  ;;  %v3434_v19 = vld [vmem:[#allocation4 + $0x170] sm:$0xff] }
 0x598   :  { %6812 = vmatpush2.bf16.msra.mxu0 %v8720_v2  ;;  %6772 = vmatprep.subr.bf16.mxu1 %v8585_v3  ;;  %v8419_v3 = vcombine.high %v3566_v58, %v3570_v60  ;;  %v8282_v29 = vcombine.low %v3430_v36, %v3434_v19  ;;  %v8387_v60 = vcombine.high %v3534_v45, %v3538_v52  ;;  %v3638_v8 = vld [vmem:[#allocation4 + $0x7d0] sm:$0xff] }
 0x599   :  { %6813 = vmatprep.subr.bf16.mxu0 %v8713_v0  ;;  %v3558_v0 = vld [vmem:[#allocation4 + $0x550] sm:$0xff] }
 0x59a   :  { %v8411_v15 = vcombine.high %v3558_v0, %v3562_v9  ;;  %v8410_v32 = vcombine.low %v3558_v0, %v3562_v9  ;;  %v3390_v9 = vld [vmem:[#allocation4 + $0x10] sm:$0xff] }
 0x59b   :  { %6773 = vmatpush2.bf16.msra.mxu1 %v8584_v17  ;;  %v8283_v17 = vcombine.high %v3430_v36, %v3434_v19  ;;  %v3530_v36 = vld [vmem:[#allocation4 + $0x470] sm:$0xff] }
 0x59c   :  { %6814 = vmatpush2.bf16.msra.mxu0 %v8712_v37  ;;  %6774 = vmatprep.subr.bf16.mxu1 %v8577_v6  ;;  %v3642_v38 = vld [vmem:[#allocation4 + $0x7f0] sm:$0xff] }
 0x59d   :  { %6815 = vmatprep.subr.bf16.mxu0 %v8705_v7 }
 0x59f   :  { %6775 = vmatpush2.bf16.msra.mxu1 %v8576_v4  ;;  %v3550_v4 = vld [vmem:[#allocation4 + $0x510] sm:$0xff] }
 0x5a0   :  { %6816 = vmatpush2.bf16.msra.mxu0 %v8704_v14  ;;  %6776 = vmatprep.subr.bf16.mxu1 %v8569_v24  ;;  %v3554_v14 = vld [vmem:[#allocation4 + $0x530] sm:$0xff] }
 0x5a1   :  { %6817 = vmatprep.subr.bf16.mxu0 %v8697_v26  ;;  %v8402_v43 = vcombine.low %v3550_v4, %v3554_v14 }
 0x5a3   :  { %6777 = vmatpush2.bf16.msra.mxu1 %v8568_v39 }
 0x5a4   :  { %6818 = vmatpush2.bf16.msra.mxu0 %v8696_v40  ;;  %6778 = vmatprep.subr.bf16.mxu1 %v8561_v41  ;;  %v8403_v40 = vcombine.high %v3550_v4, %v3554_v14  ;;  %v3414_v41 = vld [vmem:[#allocation4 + $0xd0] sm:$0xff] }
 0x5a5   :  { %6819 = vmatprep.subr.bf16.mxu0 %v8689_v42  ;;  %v3418_v42 = vld [vmem:[#allocation4 + $0xf0] sm:$0xff] }
 0x5a7   :  { %6779 = vmatpush2.bf16.msra.mxu1 %v8560_v46  ;;  %v8267_v46 = vcombine.high %v3414_v41, %v3418_v42 }
 0x5a8   :  { %6820 = vmatpush2.bf16.msra.mxu0 %v8688_v50  ;;  %6830 = vmatprep.subr.bf16.mxu1 %v8299_v48  ;;  %v8395_v50 = vcombine.high %v3542_v21, %v3546_v49  ;;  %v3406_v48 = vld [vmem:[#allocation4 + $0x90] sm:$0xff] }
 0x5a9   :  { %6871 = vmatprep.subr.bf16.mxu0 %v8427_v55  ;;  %v3410_v55 = vld [vmem:[#allocation4 + $0xb0] sm:$0xff] }
 0x5aa   :  { %6781 = vmatmul.mubr.bf16.vlgmr.msra.gmra.mxu1 %v9834_v27  ;;  %v6536_v2 = vpop.f32.mrf.mxu1  ;;  %v8259_v58 = vcombine.high %v3406_v48, %v3410_v55  ;;  %v8258_v19 = vcombine.low %v3406_v48, %v3410_v55 }
 0x5ab   :  { %6822 = vmatmul.mubr.bf16.vlgmr.msra.gmra.mxu0 %v9838_v61  ;;  %v6537_v56 = vadd.f32 %v6536_v2, %v3905_v57  ;;  %v6577_v12 = vpop.f32.mrf.mxu0  ;;  %6831 = vmatpush1.bf16.msra.mxu1 %v8298_v35  ;;  %v8266_v35 = vcombine.low %v3414_v41, %v3418_v42  ;;  %v8394_v57 = vcombine.low %v3542_v21, %v3546_v49  ;;  %v3494_v21 = vld [vmem:[#allocation4 + $0x350] sm:$0xff] }
 0x5ac   :  { %6862 = vmatprep.mubr.bf16.mxu1 %v9794_v18  ;;  %6872 = vmatpush1.bf16.msra.mxu0 %v8426_v62  ;;  %v6538_v5 = vpop.f32.mrf.mxu1  ;;  %v3398_v62 = vld [vmem:[#allocation4 + $0x50] sm:$0xff]  ;;  %v8386_v2 = vcombine.low %v3534_v45, %v3538_v52 }
 0x5ad   :  { %v9859_v37 = vadd.f32 %v6577_v12, %v6537_v56  ;;  %6903 = vmatprep.mubr.bf16.mxu0 %v9798_v22  ;;  %v6539_v6 = vadd.f32 %v6538_v5, %v3909_v63  ;;  %v6579_v7 = vpop.f32.mrf.mxu0  ;;  %6832 = vmatprep.subr.bf16.mxu1 %v8291_v1  ;;  %v3402_v63 = vld [vmem:[#allocation4 + $0x70] sm:$0xff] }
 0x5ae   :  { %6873 = vmatprep.subr.bf16.mxu0 %v8419_v3  ;;  %v6540_v10 = vpop.f32.mrf.mxu1  ;;  %v3526_v1 = vld [vmem:[#allocation4 + $0x450] sm:$0xff]  ;;  %v8251_v3 = vcombine.high %v3398_v62, %v3402_v63  ;;  %v8250_v5 = vcombine.low %v3398_v62, %v3402_v63 }
 0x5af   :  { %v9862_v24 = vadd.f32 %v6579_v7, %v6539_v6  ;;  %v6581_v26 = vpop.f32.mrf.mxu0  ;;  %6833 = vmatpush1.bf16.msra.mxu1 %v8290_v16  ;;  %v8379_v0 = vcombine.high %v3526_v1, %v3530_v36  ;;  %v3394_v56 = vld [vmem:[#allocation4 + $0x30] sm:$0xff] }
 0x5b0   :  { %6874 = vmatpush1.bf16.msra.mxu0 %v8418_v59  ;;  %v6541_v31 = vpop.f32.mrf.mxu1  ;;  %6834 = vmatprep.subr.bf16.mxu1 %v8283_v17  ;;  %v3518_v12 = vld [vmem:[#allocation4 + $0x410] sm:$0xff]  ;;  %v8378_v59 = vcombine.low %v3526_v1, %v3530_v36  ;;  %v8243_v17 = vcombine.high %v3390_v9, %v3394_v56  ;;  %v8242_v10 = vcombine.low %v3390_v9, %v3394_v56 }
 0x5b1   :  { %v6582_v39 = vpop.f32.mrf.mxu0  ;;  %6875 = vmatprep.subr.bf16.mxu0 %v8411_v15  ;;  %v3522_v16 = vld [vmem:[#allocation4 + $0x430] sm:$0xff]  ;;  %v8491_v26 = vcombine.high %v3638_v8, %v3642_v38 }
 0x5b2   :  { %v8371_v6 = vcombine.high %v3518_v12, %v3522_v16  ;;  %v3510_v7 = vld [vmem:[#allocation4 + $0x3d0] sm:$0xff]  ;;  %v8370_v4 = vcombine.low %v3518_v12, %v3522_v16 }
 0x5b3   :  { %6835 = vmatpush1.bf16.msra.mxu1 %v8282_v29  ;;  %v3514_v15 = vld [vmem:[#allocation4 + $0x3f0] sm:$0xff] }
 0x5b4   :  { %6876 = vmatpush1.bf16.msra.mxu0 %v8410_v32  ;;  %6836 = vmatprep.subr.bf16.mxu1 %v8275_v34  ;;  %v8363_v14 = vcombine.high %v3510_v7, %v3514_v15  ;;  %v3502_v29 = vld [vmem:[#allocation4 + $0x390] sm:$0xff]  ;;  %v8362_v39 = vcombine.low %v3510_v7, %v3514_v15 }
 0x5b5   :  { %6877 = vmatprep.subr.bf16.mxu0 %v8403_v40  ;;  %v3506_v31 = vld [vmem:[#allocation4 + $0x3b0] sm:$0xff]  ;;  %v8490_v40 = vcombine.low %v3638_v8, %v3642_v38 }
 0x5b6   :  { %v3630_v32 = vld [vmem:[#allocation4 + $0x790] sm:$0xff]  ;;  %v8355_v41 = vcombine.high %v3502_v29, %v3506_v31 }
 0x5b7   :  { %6837 = vmatpush1.bf16.msra.mxu1 %v8274_v44  ;;  %v3634_v34 = vld [vmem:[#allocation4 + $0x7b0] sm:$0xff] }
 0x5b8   :  { %6878 = vmatpush1.bf16.msra.mxu0 %v8402_v43  ;;  %6838 = vmatprep.subr.bf16.mxu1 %v8267_v46  ;;  %v8483_v42 = vcombine.high %v3630_v32, %v3634_v34  ;;  %v3498_v49 = vld [vmem:[#allocation4 + $0x370] sm:$0xff]  ;;  %v8354_v46 = vcombine.low %v3502_v29, %v3506_v31 }
 0x5b9   :  { %6879 = vmatprep.subr.bf16.mxu0 %v8395_v50  ;;  %v3622_v44 = vld [vmem:[#allocation4 + $0x750] sm:$0xff]  ;;  %v8482_v50 = vcombine.low %v3630_v32, %v3634_v34  ;;  %v8347_v48 = vcombine.high %v3494_v21, %v3498_v49 }
 0x5ba   :  { %v3626_v43 = vld [vmem:[#allocation4 + $0x770] sm:$0xff] }
 0x5bb   :  { %6839 = vmatpush1.bf16.msra.mxu1 %v8266_v35  ;;  %v8475_v55 = vcombine.high %v3622_v44, %v3626_v43  ;;  %v3486_v45 = vld [vmem:[#allocation4 + $0x310] sm:$0xff] }
 0x5bc   :  { %6880 = vmatpush1.bf16.msra.mxu0 %v8394_v57  ;;  %6840 = vmatprep.subr.bf16.mxu1 %v8259_v58  ;;  %v3490_v52 = vld [vmem:[#allocation4 + $0x330] sm:$0xff]  ;;  %v8346_v58 = vcombine.low %v3494_v21, %v3498_v49 }
 0x5bd   :  { %6881 = vmatprep.subr.bf16.mxu0 %v8387_v60  ;;  %v3614_v35 = vld [vmem:[#allocation4 + $0x710] sm:$0xff]  ;;  %v8474_v60 = vcombine.low %v3622_v44, %v3626_v43  ;;  %v8339_v62 = vcombine.high %v3486_v45, %v3490_v52 }
 0x5be   :  { %v3618_v57 = vld [vmem:[#allocation4 + $0x730] sm:$0xff] }
 0x5bf   :  { %6841 = vmatpush1.bf16.msra.mxu1 %v8258_v19  ;;  %v8467_v63 = vcombine.high %v3614_v35, %v3618_v57  ;;  %v3478_v1 = vld [vmem:[#allocation4 + $0x2d0] sm:$0xff] }
 0x5c0   :  { %6882 = vmatpush1.bf16.msra.mxu0 %v8386_v2  ;;  %6842 = vmatprep.subr.bf16.mxu1 %v8251_v3  ;;  %v3482_v36 = vld [vmem:[#allocation4 + $0x2f0] sm:$0xff]  ;;  %v8338_v3 = vcombine.low %v3486_v45, %v3490_v52 }
 0x5c1   :  { %6883 = vmatprep.subr.bf16.mxu0 %v8379_v0  ;;  %v3606_v19 = vld [vmem:[#allocation4 + $0x6d0] sm:$0xff]  ;;  %v8466_v0 = vcombine.low %v3614_v35, %v3618_v57  ;;  %v8331_v9 = vcombine.high %v3478_v1, %v3482_v36 }
 0x5c2   :  { %v3610_v2 = vld [vmem:[#allocation4 + $0x6f0] sm:$0xff] }
 0x5c3   :  { %6843 = vmatpush1.bf16.msra.mxu1 %v8250_v5  ;;  %v8459_v56 = vcombine.high %v3606_v19, %v3610_v2  ;;  %v3470_v12 = vld [vmem:[#allocation4 + $0x290] sm:$0xff] }
 0x5c4   :  { %6884 = vmatpush1.bf16.msra.mxu0 %v8378_v59  ;;  %6844 = vmatprep.subr.bf16.mxu1 %v8243_v17  ;;  %v3474_v16 = vld [vmem:[#allocation4 + $0x2b0] sm:$0xff]  ;;  %v8330_v17 = vcombine.low %v3478_v1, %v3482_v36 }
 0x5c5   :  { %6885 = vmatprep.subr.bf16.mxu0 %v8371_v6  ;;  %v3598_v5 = vld [vmem:[#allocation4 + $0x690] sm:$0xff]  ;;  %v8458_v6 = vcombine.low %v3606_v19, %v3610_v2  ;;  %v8323_v7 = vcombine.high %v3470_v12, %v3474_v16 }
 0x5c6   :  { %v3602_v59 = vld [vmem:[#allocation4 + $0x6b0] sm:$0xff] }
 0x5c7   :  { %6845 = vmatpush1.bf16.msra.mxu1 %v8242_v10  ;;  %v8451_v15 = vcombine.high %v3598_v5, %v3602_v59  ;;  %v3462_v8 = vld [vmem:[#allocation4 + $0x250] sm:$0xff] }
 0x5c8   :  { %6886 = vmatpush1.bf16.msra.mxu0 %v8370_v4  ;;  %6846 = vmatprep.subr.bf16.mxu1 %v8363_v14  ;;  %v3466_v38 = vld [vmem:[#allocation4 + $0x270] sm:$0xff]  ;;  %v8322_v14 = vcombine.low %v3470_v12, %v3474_v16 }
 0x5c9   :  { %6887 = vmatprep.subr.bf16.mxu0 %v8491_v26  ;;  %v3590_v10 = vld [vmem:[#allocation4 + $0x650] sm:$0xff]  ;;  %v8450_v26 = vcombine.low %v3598_v5, %v3602_v59  ;;  %v8315_v29 = vcombine.high %v3462_v8, %v3466_v38 }
 0x5ca   :  { %v3594_v4 = vld [vmem:[#allocation4 + $0x670] sm:$0xff] }
 0x5cb   :  { %6847 = vmatpush2.bf16.msra.mxu1 %v8362_v39  ;;  %v8443_v31 = vcombine.high %v3590_v10, %v3594_v4  ;;  %v3454_v32 = vld [vmem:[#allocation4 + $0x210] sm:$0xff] }
 0x5cc   :  { %6888 = vmatpush2.bf16.msra.mxu0 %v8490_v40  ;;  %6848 = vmatprep.subr.bf16.mxu1 %v8355_v41  ;;  %v3458_v34 = vld [vmem:[#allocation4 + $0x230] sm:$0xff]  ;;  %v8314_v41 = vcombine.low %v3462_v8, %v3466_v38 }
 0x5cd   :  { %6889 = vmatprep.subr.bf16.mxu0 %v8483_v42  ;;  %v3582_v39 = vld [vmem:[#allocation4 + $0x610] sm:$0xff]  ;;  %v8442_v42 = vcombine.low %v3590_v10, %v3594_v4  ;;  %v8307_v21 = vcombine.high %v3454_v32, %v3458_v34 }
 0x5ce   :  { %v3586_v40 = vld [vmem:[#allocation4 + $0x630] sm:$0xff] }
 0x5cf   :  { %6849 = vmatpush2.bf16.msra.mxu1 %v8354_v46  ;;  %v8435_v49 = vcombine.high %v3582_v39, %v3586_v40  ;;  %v3702_v44 = vld [vmem:[#allocation4 + $0x9d0] sm:$0xff] }
 0x5d0   :  { %6890 = vmatpush2.bf16.msra.mxu0 %v8482_v50  ;;  %6850 = vmatprep.subr.bf16.mxu1 %v8347_v48  ;;  %v3706_v43 = vld [vmem:[#allocation4 + $0x9f0] sm:$0xff]  ;;  %v8306_v48 = vcombine.low %v3454_v32, %v3458_v34 }
 0x5d1   :  { %6891 = vmatprep.subr.bf16.mxu0 %v8475_v55  ;;  %v3830_v46 = vld [vmem:[#allocation4 + $0xdd0] sm:$0xff]  ;;  %v8434_v55 = vcombine.low %v3582_v39, %v3586_v40  ;;  %v8555_v45 = vcombine.high %v3702_v44, %v3706_v43 }
 0x5d2   :  { %v3834_v50 = vld [vmem:[#allocation4 + $0xdf0] sm:$0xff] }
 0x5d3   :  { %6851 = vmatpush2.bf16.msra.mxu1 %v8346_v58  ;;  %v8683_v52 = vcombine.high %v3830_v46, %v3834_v50  ;;  %v3694_v35 = vld [vmem:[#allocation4 + $0x990] sm:$0xff]  ;;  %v8554_v58 = vcombine.low %v3702_v44, %v3706_v43 }
 0x5d4   :  { %6892 = vmatpush2.bf16.msra.mxu0 %v8474_v60  ;;  %6852 = vmatprep.subr.bf16.mxu1 %v8339_v62  ;;  %v3698_v57 = vld [vmem:[#allocation4 + $0x9b0] sm:$0xff] }
 0x5d5   :  { %6893 = vmatprep.subr.bf16.mxu0 %v8467_v63  ;;  %v3822_v60 = vld [vmem:[#allocation4 + $0xd90] sm:$0xff]  ;;  %v8682_v63 = vcombine.low %v3830_v46, %v3834_v50  ;;  %v8547_v1 = vcombine.high %v3694_v35, %v3698_v57  ;;  %v8546_v16 = vcombine.low %v3694_v35, %v3698_v57 }
 0x5d6   :  { %v3826_v62 = vld [vmem:[#allocation4 + $0xdb0] sm:$0xff] }
 0x5d7   :  { %6853 = vmatpush2.bf16.msra.mxu1 %v8338_v3  ;;  %v3686_v36 = vld [vmem:[#allocation4 + $0x950] sm:$0xff]  ;;  %v8675_v3 = vcombine.high %v3822_v60, %v3826_v62  ;;  %v8674_v59 = vcombine.low %v3822_v60, %v3826_v62 }
 0x5d8   :  { %6894 = vmatpush2.bf16.msra.mxu0 %v8466_v0  ;;  %6854 = vmatprep.subr.bf16.mxu1 %v8331_v9  ;;  %v3690_v19 = vld [vmem:[#allocation4 + $0x970] sm:$0xff] }
 0x5d9   :  { %6895 = vmatprep.subr.bf16.mxu0 %v8459_v56  ;;  %v3814_v0 = vld [vmem:[#allocation4 + $0xd50] sm:$0xff] }
 0x5da   :  { %v3818_v9 = vld [vmem:[#allocation4 + $0xd70] sm:$0xff] }
 0x5db   :  { %6855 = vmatpush2.bf16.msra.mxu1 %v8330_v17  ;;  %v8539_v17 = vcombine.high %v3686_v36, %v3690_v19  ;;  %v8667_v8 = vcombine.high %v3814_v0, %v3818_v9  ;;  %v3678_v38 = vld [vmem:[#allocation4 + $0x910] sm:$0xff]  ;;  %v8666_v34 = vcombine.low %v3814_v0, %v3818_v9 }
 0x5dc   :  { %6896 = vmatpush2.bf16.msra.mxu0 %v8458_v6  ;;  %6856 = vmatprep.subr.bf16.mxu1 %v8323_v7  ;;  %v3806_v4 = vld [vmem:[#allocation4 + $0xd10] sm:$0xff] }
 0x5dd   :  { %6897 = vmatprep.subr.bf16.mxu0 %v8451_v15  ;;  %v3654_v62 = vld [vmem:[#allocation4 + $0x850] sm:$0xff] }
 0x5de   :  { %v3646_v9 = vld [vmem:[#allocation4 + $0x810] sm:$0xff] }
 0x5df   :  { %6857 = vmatpush2.bf16.msra.mxu1 %v8322_v14  ;;  %v3810_v14 = vld [vmem:[#allocation4 + $0xd30] sm:$0xff] }
 0x5e0   :  { %6898 = vmatpush2.bf16.msra.mxu0 %v8450_v26  ;;  %6858 = vmatprep.subr.bf16.mxu1 %v8315_v29  ;;  %v8659_v40 = vcombine.high %v3806_v4, %v3810_v14  ;;  %v8658_v43 = vcombine.low %v3806_v4, %v3810_v14 }
 0x5e1   :  { %6899 = vmatprep.subr.bf16.mxu0 %v8443_v31  ;;  %v8538_v31 = vcombine.low %v3686_v36, %v3690_v19  ;;  %v3786_v36 = vld [vmem:[#allocation4 + $0xc70] sm:$0xff] }
 0x5e3   :  { %6859 = vmatpush2.bf16.msra.mxu1 %v8314_v41  ;;  %v3670_v41 = vld [vmem:[#allocation4 + $0x8d0] sm:$0xff] }
 0x5e4   :  { %6900 = vmatpush2.bf16.msra.mxu0 %v8442_v42  ;;  %6860 = vmatprep.subr.bf16.mxu1 %v8307_v21  ;;  %v3674_v42 = vld [vmem:[#allocation4 + $0x8f0] sm:$0xff] }
 0x5e5   :  { %6901 = vmatprep.subr.bf16.mxu0 %v8435_v49  ;;  %v3798_v21 = vld [vmem:[#allocation4 + $0xcd0] sm:$0xff]  ;;  %v8523_v46 = vcombine.high %v3670_v41, %v3674_v42  ;;  %v8522_v35 = vcombine.low %v3670_v41, %v3674_v42 }
 0x5e6   :  { %v3802_v49 = vld [vmem:[#allocation4 + $0xcf0] sm:$0xff] }
 0x5e7   :  { %6861 = vmatpush2.bf16.msra.mxu1 %v8306_v48  ;;  %v8651_v50 = vcombine.high %v3798_v21, %v3802_v49  ;;  %v3662_v48 = vld [vmem:[#allocation4 + $0x890] sm:$0xff]  ;;  %v8650_v57 = vcombine.low %v3798_v21, %v3802_v49 }
 0x5e8   :  { %6902 = vmatpush2.bf16.msra.mxu0 %v8434_v55  ;;  %6912 = vmatprep.subr.bf16.mxu1 %v8555_v45  ;;  %v3666_v55 = vld [vmem:[#allocation4 + $0x8b0] sm:$0xff] }
 0x5e9   :  { %6953 = vmatprep.subr.bf16.mxu0 %v8683_v52  ;;  %v3790_v45 = vld [vmem:[#allocation4 + $0xc90] sm:$0xff]  ;;  %v8514_v19 = vcombine.low %v3662_v48, %v3666_v55 }
 0x5ea   :  { %6863 = vmatmul.mubr.bf16.vlgmr.msra.gmra.mxu1 %v9796_v20  ;;  %v6618_v2 = vpop.f32.mrf.mxu1  ;;  %v3794_v52 = vld [vmem:[#allocation4 + $0xcb0] sm:$0xff] }
 0x5eb   :  { %6904 = vmatmul.mubr.bf16.vlgmr.msra.gmra.mxu0 %v9800_v23  ;;  %v6619_v56 = vadd.f32 %v6618_v2, %v9859_v37  ;;  %v6659_v12 = vpop.f32.mrf.mxu0  ;;  %6913 = vmatpush1.bf16.msra.mxu1 %v8554_v58  ;;  %v3682_v37 = vld [vmem:[#allocation4 + $0x930] sm:$0xff]  ;;  %v8515_v58 = vcombine.high %v3662_v48, %v3666_v55  ;;  %v8643_v60 = vcombine.high %v3790_v45, %v3794_v52 }
 0x5ec   :  { %6944 = vmatprep.mubr.bf16.mxu1 %v9832_v11  ;;  %6954 = vmatpush1.bf16.msra.mxu0 %v8682_v63  ;;  %v6620_v5 = vpop.f32.mrf.mxu1  ;;  %v8531_v39 = vcombine.high %v3678_v38, %v3682_v37  ;;  %v8530_v44 = vcombine.low %v3678_v38, %v3682_v37  ;;  %v3658_v63 = vld [vmem:[#allocation4 + $0x870] sm:$0xff]  ;;  %v8642_v2 = vcombine.low %v3790_v45, %v3794_v52 }
 0x5ed   :  { %v9868_v6 = vadd.f32 %v6659_v12, %v6619_v56  ;;  %6985 = vmatprep.mubr.bf16.mxu0 %v9836_v28  ;;  %v6621_v7 = vadd.f32 %v6620_v5, %v9862_v24  ;;  %v6661_v15 = vpop.f32.mrf.mxu0  ;;  %6914 = vmatprep.subr.bf16.mxu1 %v8547_v1  ;;  %v3782_v1 = vld [vmem:[#allocation4 + $0xc50] sm:$0xff]  ;;  %v8506_v5 = vcombine.low %v3654_v62, %v3658_v63 }
 0x5ee   :  { %6955 = vmatprep.subr.bf16.mxu0 %v8675_v3  ;;  %v6622_v10 = vpop.f32.mrf.mxu1  ;;  %v8507_v3 = vcombine.high %v3654_v62, %v3658_v63  ;;  %v8635_v0 = vcombine.high %v3782_v1, %v3786_v36  ;;  %v3650_v56 = vld [vmem:[#allocation4 + $0x830] sm:$0xff] }
 0x5ef   :  { %v9872_v26 = vadd.f32 %v6661_v15, %v6621_v7  ;;  %v6663_v29 = vpop.f32.mrf.mxu0  ;;  %6915 = vmatpush1.bf16.msra.mxu1 %v8546_v16  ;;  %v3774_v12 = vld [vmem:[#allocation4 + $0xc10] sm:$0xff]  ;;  %v8498_v10 = vcombine.low %v3646_v9, %v3650_v56 }
 0x5f0   :  { %6956 = vmatpush1.bf16.msra.mxu0 %v8674_v59  ;;  %v6623_v32 = vpop.f32.mrf.mxu1  ;;  %6916 = vmatprep.subr.bf16.mxu1 %v8539_v17  ;;  %v3778_v16 = vld [vmem:[#allocation4 + $0xc30] sm:$0xff]  ;;  %v8634_v59 = vcombine.low %v3782_v1, %v3786_v36  ;;  %v8499_v17 = vcombine.high %v3646_v9, %v3650_v56 }
 0x5f1   :  { %v6664_v24 = vpop.f32.mrf.mxu0  ;;  %6957 = vmatprep.subr.bf16.mxu0 %v8667_v8  ;;  %v8627_v7 = vcombine.high %v3774_v12, %v3778_v16  ;;  %v3766_v15 = vld [vmem:[#allocation4 + $0xbd0] sm:$0xff]  ;;  %v8626_v4 = vcombine.low %v3774_v12, %v3778_v16 }
 0x5f2   :  { %v3770_v8 = vld [vmem:[#allocation4 + $0xbf0] sm:$0xff] }
 0x5f3   :  { %6917 = vmatpush1.bf16.msra.mxu1 %v8538_v31  ;;  %v3894_v38 = vld [vmem:[#allocation4 + $0xfd0] sm:$0xff]  ;;  %v8619_v14 = vcombine.high %v3766_v15, %v3770_v8  ;;  %v8618_v24 = vcombine.low %v3766_v15, %v3770_v8 }
 0x5f4   :  { %6958 = vmatpush1.bf16.msra.mxu0 %v8666_v34  ;;  %6918 = vmatprep.subr.bf16.mxu1 %v8531_v39  ;;  %v3898_v37 = vld [vmem:[#allocation4 + $0xff0] sm:$0xff] }
 0x5f5   :  { %6959 = vmatprep.subr.bf16.mxu0 %v8659_v40  ;;  %v8747_v29 = vcombine.high %v3894_v38, %v3898_v37  ;;  %v3758_v31 = vld [vmem:[#allocation4 + $0xb90] sm:$0xff]  ;;  %v8746_v40 = vcombine.low %v3894_v38, %v3898_v37 }
 0x5f6   :  { %v3762_v32 = vld [vmem:[#allocation4 + $0xbb0] sm:$0xff] }
 0x5f7   :  { %6919 = vmatpush1.bf16.msra.mxu1 %v8530_v44  ;;  %v3886_v34 = vld [vmem:[#allocation4 + $0xf90] sm:$0xff]  ;;  %v8611_v41 = vcombine.high %v3758_v31, %v3762_v32 }
 0x5f8   :  { %6960 = vmatpush1.bf16.msra.mxu0 %v8658_v43  ;;  %6920 = vmatprep.subr.bf16.mxu1 %v8523_v46  ;;  %v3890_v39 = vld [vmem:[#allocation4 + $0xfb0] sm:$0xff]  ;;  %v8610_v46 = vcombine.low %v3758_v31, %v3762_v32 }
 0x5f9   :  { %6961 = vmatprep.subr.bf16.mxu0 %v8651_v50  ;;  %v8739_v42 = vcombine.high %v3886_v34, %v3890_v39  ;;  %v3750_v21 = vld [vmem:[#allocation4 + $0xb50] sm:$0xff]  ;;  %v8738_v50 = vcombine.low %v3886_v34, %v3890_v39 }
 0x5fa   :  { %v3754_v49 = vld [vmem:[#allocation4 + $0xb70] sm:$0xff] }
 0x5fb   :  { %6921 = vmatpush1.bf16.msra.mxu1 %v8522_v35  ;;  %v3878_v44 = vld [vmem:[#allocation4 + $0xf50] sm:$0xff]  ;;  %v8603_v48 = vcombine.high %v3750_v21, %v3754_v49 }
 0x5fc   :  { %6962 = vmatpush1.bf16.msra.mxu0 %v8650_v57  ;;  %6922 = vmatprep.subr.bf16.mxu1 %v8515_v58  ;;  %v3882_v43 = vld [vmem:[#allocation4 + $0xf70] sm:$0xff]  ;;  %v8602_v58 = vcombine.low %v3750_v21, %v3754_v49 }
 0x5fd   :  { %6963 = vmatprep.subr.bf16.mxu0 %v8643_v60  ;;  %v8731_v55 = vcombine.high %v3878_v44, %v3882_v43  ;;  %v3742_v45 = vld [vmem:[#allocation4 + $0xb10] sm:$0xff]  ;;  %v8730_v60 = vcombine.low %v3878_v44, %v3882_v43  ;;  %v3447_v44 = vld [vmem:[#allocation4 + $0x1d8] sm:$0xff] }
 0x5fe   :  { %v3746_v52 = vld [vmem:[#allocation4 + $0xb30] sm:$0xff]  ;;  %v3451_v43 = vld [vmem:[#allocation4 + $0x1f8] sm:$0xff] }
 0x5ff   :  { %6923 = vmatpush1.bf16.msra.mxu1 %v8514_v19  ;;  %v3870_v35 = vld [vmem:[#allocation4 + $0xf10] sm:$0xff]  ;;  %v8595_v62 = vcombine.high %v3742_v45, %v3746_v52 }
 0x600   :  { %6964 = vmatpush1.bf16.msra.mxu0 %v8642_v2  ;;  %6924 = vmatprep.subr.bf16.mxu1 %v8507_v3  ;;  %v3874_v57 = vld [vmem:[#allocation4 + $0xf30] sm:$0xff]  ;;  %v8594_v3 = vcombine.low %v3742_v45, %v3746_v52  ;;  %v8301_v45 = vcombine.high %v3447_v44, %v3451_v43 }
 0x601   :  { %6965 = vmatprep.subr.bf16.mxu0 %v8635_v0  ;;  %v8723_v63 = vcombine.high %v3870_v35, %v3874_v57  ;;  %v3734_v1 = vld [vmem:[#allocation4 + $0xad0] sm:$0xff]  ;;  %v8722_v0 = vcombine.low %v3870_v35, %v3874_v57  ;;  %v3439_v35 = vld [vmem:[#allocation4 + $0x198] sm:$0xff] }
 0x602   :  { %v3738_v36 = vld [vmem:[#allocation4 + $0xaf0] sm:$0xff]  ;;  %v3443_v57 = vld [vmem:[#allocation4 + $0x1b8] sm:$0xff] }
 0x603   :  { %6925 = vmatpush1.bf16.msra.mxu1 %v8506_v5  ;;  %v3862_v19 = vld [vmem:[#allocation4 + $0xed0] sm:$0xff]  ;;  %v8587_v9 = vcombine.high %v3734_v1, %v3738_v36 }
 0x604   :  { %6966 = vmatpush1.bf16.msra.mxu0 %v8634_v59  ;;  %6926 = vmatprep.subr.bf16.mxu1 %v8499_v17  ;;  %v3866_v2 = vld [vmem:[#allocation4 + $0xef0] sm:$0xff]  ;;  %v8586_v17 = vcombine.low %v3734_v1, %v3738_v36  ;;  %v3917_v36 = vrot.slane %v9850_v54, %v3338_v47 }
 0x605   :  { %6967 = vmatprep.subr.bf16.mxu0 %v8627_v7  ;;  %v8715_v56 = vcombine.high %v3862_v19, %v3866_v2  ;;  %v3726_v12 = vld [vmem:[#allocation4 + $0xa90] sm:$0xff]  ;;  %v8714_v7 = vcombine.low %v3862_v19, %v3866_v2  ;;  %v8293_v19 = vcombine.high %v3439_v35, %v3443_v57  ;;  %v3431_v2 = vld [vmem:[#allocation4 + $0x158] sm:$0xff] }
 0x606   :  { %v3730_v16 = vld [vmem:[#allocation4 + $0xab0] sm:$0xff] }
 0x607   :  { %6927 = vmatpush1.bf16.msra.mxu1 %v8498_v10  ;;  %v3854_v5 = vld [vmem:[#allocation4 + $0xe90] sm:$0xff]  ;;  %v8579_v15 = vcombine.high %v3726_v12, %v3730_v16 }
 0x608   :  { %6968 = vmatpush1.bf16.msra.mxu0 %v8626_v4  ;;  %6928 = vmatprep.subr.bf16.mxu1 %v8619_v14  ;;  %v3858_v59 = vld [vmem:[#allocation4 + $0xeb0] sm:$0xff]  ;;  %v8578_v14 = vcombine.low %v3726_v12, %v3730_v16 }
 0x609   :  { %6969 = vmatprep.subr.bf16.mxu0 %v8747_v29  ;;  %v8707_v8 = vcombine.high %v3854_v5, %v3858_v59  ;;  %v3718_v38 = vld [vmem:[#allocation4 + $0xa50] sm:$0xff]  ;;  %v8706_v29 = vcombine.low %v3854_v5, %v3858_v59  ;;  %v8292_v5 = vcombine.low %v3439_v35, %v3443_v57 }
 0x60a   :  { %v3722_v37 = vld [vmem:[#allocation4 + $0xa70] sm:$0xff] }
 0x60b   :  { %6929 = vmatpush2.bf16.msra.mxu1 %v8618_v24  ;;  %v3846_v10 = vld [vmem:[#allocation4 + $0xe50] sm:$0xff]  ;;  %v8571_v31 = vcombine.high %v3718_v38, %v3722_v37 }
 0x60c   :  { %6970 = vmatpush2.bf16.msra.mxu0 %v8746_v40  ;;  %6930 = vmatprep.subr.bf16.mxu1 %v8611_v41  ;;  %v3850_v4 = vld [vmem:[#allocation4 + $0xe70] sm:$0xff]  ;;  %v8570_v41 = vcombine.low %v3718_v38, %v3722_v37  ;;  %v3423_v38 = vld [vmem:[#allocation4 + $0x118] sm:$0xff] }
 0x60d   :  { %6971 = vmatprep.subr.bf16.mxu0 %v8739_v42  ;;  %v8699_v32 = vcombine.high %v3846_v10, %v3850_v4  ;;  %v3710_v34 = vld [vmem:[#allocation4 + $0xa10] sm:$0xff]  ;;  %v8698_v42 = vcombine.low %v3846_v10, %v3850_v4  ;;  %v3427_v37 = vld [vmem:[#allocation4 + $0x138] sm:$0xff] }
 0x60e   :  { %v3714_v39 = vld [vmem:[#allocation4 + $0xa30] sm:$0xff]  ;;  %v3551_v4 = vld [vmem:[#allocation4 + $0x518] sm:$0xff] }
 0x60f   :  { %6931 = vmatpush2.bf16.msra.mxu1 %v8610_v46  ;;  %v3838_v24 = vld [vmem:[#allocation4 + $0xe10] sm:$0xff]  ;;  %v8563_v21 = vcombine.high %v3710_v34, %v3714_v39  ;;  %v3575_v46 = vld [vmem:[#allocation4 + $0x5d8] sm:$0xff] }
 0x610   :  { %6972 = vmatpush2.bf16.msra.mxu0 %v8738_v50  ;;  %6932 = vmatprep.subr.bf16.mxu1 %v8603_v48  ;;  %v3842_v40 = vld [vmem:[#allocation4 + $0xe30] sm:$0xff]  ;;  %v3579_v50 = vld [vmem:[#allocation4 + $0x5f8] sm:$0xff]  ;;  %v8562_v48 = vcombine.low %v3710_v34, %v3714_v39 }
 0x611   :  { %6973 = vmatprep.subr.bf16.mxu0 %v8731_v55  ;;  %v8691_v49 = vcombine.high %v3838_v24, %v3842_v40  ;;  %v8690_v55 = vcombine.low %v3838_v24, %v3842_v40  ;;  %v8429_v52 = vcombine.high %v3575_v46, %v3579_v50  ;;  %v8428_v1 = vcombine.low %v3575_v46, %v3579_v50  ;;  %v3415_v40 = vld [vmem:[#allocation4 + $0xd8] sm:$0xff] }
 0x612   :  { %v3407_v50 = vld [vmem:[#allocation4 + $0x98] sm:$0xff] }
 0x613   :  { %6933 = vmatpush2.bf16.msra.mxu1 %v8602_v58  ;;  %v3913_v58 = vrot.slane %v9850_v54, %v3334_v33  ;;  %v3563_v33 = vld [vmem:[#allocation4 + $0x578] sm:$0xff] }
 0x614   :  { %6974 = vmatpush2.bf16.msra.mxu0 %v8730_v60  ;;  %6934 = vmatprep.subr.bf16.mxu1 %v8595_v62  ;;  %v8300_v60 = vcombine.low %v3447_v44, %v3451_v43  ;;  %v3567_v62 = vld [vmem:[#allocation4 + $0x598] sm:$0xff] }
 0x615   :  { %6975 = vmatprep.subr.bf16.mxu0 %v8723_v63  ;;  %v3571_v63 = vld [vmem:[#allocation4 + $0x5b8] sm:$0xff] }
 0x616   :  { %v8420_v47 = vcombine.low %v3567_v62, %v3571_v63 }
 0x617   :  { %6935 = vmatpush2.bf16.msra.mxu1 %v8594_v3  ;;  %v3435_v3 = vld [vmem:[#allocation4 + $0x178] sm:$0xff] }
 0x618   :  { %6976 = vmatpush2.bf16.msra.mxu0 %v8722_v0  ;;  %6936 = vmatprep.subr.bf16.mxu1 %v8587_v9  ;;  %v8421_v9 = vcombine.high %v3567_v62, %v3571_v63  ;;  %v8285_v54 = vcombine.high %v3431_v2, %v3435_v3  ;;  %v3403_v62 = vld [vmem:[#allocation4 + $0x78] sm:$0xff] }
 0x619   :  { %6977 = vmatprep.subr.bf16.mxu0 %v8715_v56  ;;  %v3559_v56 = vld [vmem:[#allocation4 + $0x558] sm:$0xff] }
 0x61a   :  { %v8412_v34 = vcombine.low %v3559_v56, %v3563_v33  ;;  %v3527_v63 = vld [vmem:[#allocation4 + $0x458] sm:$0xff] }
 0x61b   :  { %6937 = vmatpush2.bf16.msra.mxu1 %v8586_v17 }
 0x61c   :  { %6978 = vmatpush2.bf16.msra.mxu0 %v8714_v7  ;;  %6938 = vmatprep.subr.bf16.mxu1 %v8579_v15 }
 0x61d   :  { %6979 = vmatprep.subr.bf16.mxu0 %v8707_v8  ;;  %v8413_v8 = vcombine.high %v3559_v56, %v3563_v33  ;;  %v3519_v56 = vld [vmem:[#allocation4 + $0x418] sm:$0xff] }
 0x61e   :  { %v3523_v33 = vld [vmem:[#allocation4 + $0x438] sm:$0xff] }
 0x61f   :  { %6939 = vmatpush2.bf16.msra.mxu1 %v8578_v14  ;;  %v3555_v14 = vld [vmem:[#allocation4 + $0x538] sm:$0xff] }
 0x620   :  { %6980 = vmatpush2.bf16.msra.mxu0 %v8706_v29  ;;  %6940 = vmatprep.subr.bf16.mxu1 %v8571_v31  ;;  %v8284_v31 = vcombine.low %v3431_v2, %v3435_v3  ;;  %v8405_v24 = vcombine.high %v3551_v4, %v3555_v14  ;;  %v8404_v44 = vcombine.low %v3551_v4, %v3555_v14  ;;  %v3503_v4 = vld [vmem:[#allocation4 + $0x398] sm:$0xff] }
 0x621   :  { %6981 = vmatprep.subr.bf16.mxu0 %v8699_v32  ;;  %v3507_v14 = vld [vmem:[#allocation4 + $0x3b8] sm:$0xff] }
 0x623   :  { %6941 = vmatpush2.bf16.msra.mxu1 %v8570_v41  ;;  %v3419_v41 = vld [vmem:[#allocation4 + $0xf8] sm:$0xff] }
 0x624   :  { %6982 = vmatpush2.bf16.msra.mxu0 %v8698_v42  ;;  %6942 = vmatprep.subr.bf16.mxu1 %v8563_v21  ;;  %v3543_v42 = vld [vmem:[#allocation4 + $0x4d8] sm:$0xff]  ;;  %v8269_v43 = vcombine.high %v3415_v40, %v3419_v41 }
 0x625   :  { %6983 = vmatprep.subr.bf16.mxu0 %v8691_v49  ;;  %v3547_v21 = vld [vmem:[#allocation4 + $0x4f8] sm:$0xff]  ;;  %v8276_v49 = vcombine.low %v3423_v38, %v3427_v37 }
 0x626   :  { %v8397_v46 = vcombine.high %v3543_v42, %v3547_v21  ;;  %v8396_v35 = vcombine.low %v3543_v42, %v3547_v21  ;;  %v3627_v42 = vld [vmem:[#allocation4 + $0x778] sm:$0xff]  ;;  %v8356_v21 = vcombine.low %v3503_v4, %v3507_v14 }
 0x627   :  { %6943 = vmatpush2.bf16.msra.mxu1 %v8562_v48  ;;  %v3411_v48 = vld [vmem:[#allocation4 + $0xb8] sm:$0xff] }
 0x628   :  { %6984 = vmatpush2.bf16.msra.mxu0 %v8690_v55  ;;  %6994 = vmatprep.subr.bf16.mxu1 %v8301_v45  ;;  %v3535_v55 = vld [vmem:[#allocation4 + $0x498] sm:$0xff]  ;;  %v8261_v57 = vcombine.high %v3407_v50, %v3411_v48 }
 0x629   :  { %7035 = vmatprep.subr.bf16.mxu0 %v8429_v52  ;;  %v3539_v45 = vld [vmem:[#allocation4 + $0x4b8] sm:$0xff]  ;;  %v8268_v52 = vcombine.low %v3415_v40, %v3419_v41 }
 0x62a   :  { %v6700_v0 = vpop.f32.mrf.mxu1  ;;  %6945 = vmatmul.mubr.bf16.vlgmr.msra.gmra.mxu1 %v9834_v27  ;;  %v3499_v40 = vld [vmem:[#allocation4 + $0x378] sm:$0xff] }
 0x62b   :  { %v6701_v12 = vadd.f32 %v6700_v0, %v3913_v58  ;;  %v6741_v16 = vpop.f32.mrf.mxu0  ;;  %6986 = vmatmul.mubr.bf16.vlgmr.msra.gmra.mxu0 %v9838_v61  ;;  %6995 = vmatpush1.bf16.msra.mxu1 %v8300_v60  ;;  %v8389_v58 = vcombine.high %v3535_v55, %v3539_v45  ;;  %v3399_v60 = vld [vmem:[#allocation4 + $0x58] sm:$0xff] }
 0x62c   :  { %7026 = vmatprep.mubr.bf16.mxu1 %v9794_v18  ;;  %7036 = vmatpush1.bf16.msra.mxu0 %v8428_v1  ;;  %v6702_v59 = vpop.f32.mrf.mxu1  ;;  %v3531_v1 = vld [vmem:[#allocation4 + $0x478] sm:$0xff]  ;;  %v8253_v2 = vcombine.high %v3399_v60, %v3403_v62 }
 0x62d   :  { %v9883_v17 = vadd.f32 %v6741_v16, %v6701_v12  ;;  %7067 = vmatprep.mubr.bf16.mxu0 %v9798_v22  ;;  %v6703_v7 = vadd.f32 %v6702_v59, %v3917_v36  ;;  %v6743_v15 = vpop.f32.mrf.mxu0  ;;  %6996 = vmatprep.subr.bf16.mxu1 %v8293_v19  ;;  %v8277_v22 = vcombine.high %v3423_v38, %v3427_v37  ;;  %v3391_v0 = vld [vmem:[#allocation4 + $0x18] sm:$0xff] }
 0x62e   :  { %v6704_v10 = vpop.f32.mrf.mxu1  ;;  %7037 = vmatprep.subr.bf16.mxu0 %v8421_v9  ;;  %v8260_v36 = vcombine.low %v3407_v50, %v3411_v48  ;;  %v8388_v19 = vcombine.low %v3535_v55, %v3539_v45  ;;  %v8381_v3 = vcombine.high %v3527_v63, %v3531_v1  ;;  %v3395_v9 = vld [vmem:[#allocation4 + $0x38] sm:$0xff]  ;;  %v8252_v12 = vcombine.low %v3399_v60, %v3403_v62 }
 0x62f   :  { %v9886_v29 = vadd.f32 %v6743_v15, %v6703_v7  ;;  %v6745_v18 = vpop.f32.mrf.mxu0  ;;  %6997 = vmatpush1.bf16.msra.mxu1 %v8292_v5  ;;  %v8380_v16 = vcombine.low %v3527_v63, %v3531_v1  ;;  %v8245_v5 = vcombine.high %v3391_v0, %v3395_v9  ;;  %v8373_v59 = vcombine.high %v3519_v56, %v3523_v33  ;;  %v3639_v7 = vld [vmem:[#allocation4 + $0x7d8] sm:$0xff] }
 0x630   :  { %7038 = vmatpush1.bf16.msra.mxu0 %v8420_v47  ;;  %v6705_v32 = vpop.f32.mrf.mxu1  ;;  %6998 = vmatprep.subr.bf16.mxu1 %v8285_v54  ;;  %v3511_v47 = vld [vmem:[#allocation4 + $0x3d8] sm:$0xff]  ;;  %v8372_v38 = vcombine.low %v3519_v56, %v3523_v33 }
 0x631   :  { %v6746_v39 = vpop.f32.mrf.mxu0  ;;  %7039 = vmatprep.subr.bf16.mxu0 %v8413_v8  ;;  %v3515_v54 = vld [vmem:[#allocation4 + $0x3f8] sm:$0xff]  ;;  %v8244_v8 = vcombine.low %v3391_v0, %v3395_v9 }
 0x632   :  { %v3643_v15 = vld [vmem:[#allocation4 + $0x7f8] sm:$0xff]  ;;  %v8365_v37 = vcombine.high %v3511_v47, %v3515_v54  ;;  %v8364_v32 = vcombine.low %v3511_v47, %v3515_v54 }
 0x633   :  { %6999 = vmatpush1.bf16.msra.mxu1 %v8284_v31  ;;  %v8493_v10 = vcombine.high %v3639_v7, %v3643_v15  ;;  %v3631_v18 = vld [vmem:[#allocation4 + $0x798] sm:$0xff] }
 0x634   :  { %7040 = vmatpush1.bf16.msra.mxu0 %v8412_v34  ;;  %7000 = vmatprep.subr.bf16.mxu1 %v8277_v22  ;;  %v3635_v31 = vld [vmem:[#allocation4 + $0x7b8] sm:$0xff]  ;;  %v8492_v34 = vcombine.low %v3639_v7, %v3643_v15  ;;  %v8357_v22 = vcombine.high %v3503_v4, %v3507_v14 }
 0x635   :  { %7041 = vmatprep.subr.bf16.mxu0 %v8405_v24  ;;  %v8485_v39 = vcombine.high %v3631_v18, %v3635_v31  ;;  %v3495_v24 = vld [vmem:[#allocation4 + $0x358] sm:$0xff] }
 0x636   :  { %v3623_v41 = vld [vmem:[#allocation4 + $0x758] sm:$0xff]  ;;  %v8348_v45 = vcombine.low %v3495_v24, %v3499_v40 }
 0x637   :  { %7001 = vmatpush1.bf16.msra.mxu1 %v8276_v49  ;;  %v8484_v49 = vcombine.low %v3631_v18, %v3635_v31  ;;  %v3491_v50 = vld [vmem:[#allocation4 + $0x338] sm:$0xff] }
 0x638   :  { %7042 = vmatpush1.bf16.msra.mxu0 %v8404_v44  ;;  %7002 = vmatprep.subr.bf16.mxu1 %v8269_v43  ;;  %v8349_v44 = vcombine.high %v3495_v24, %v3499_v40  ;;  %v8477_v43 = vcombine.high %v3623_v41, %v3627_v42  ;;  %v3615_v48 = vld [vmem:[#allocation4 + $0x718] sm:$0xff] }
 0x639   :  { %7043 = vmatprep.subr.bf16.mxu0 %v8397_v46  ;;  %v3487_v46 = vld [vmem:[#allocation4 + $0x318] sm:$0xff] }
 0x63a   :  { %v3619_v55 = vld [vmem:[#allocation4 + $0x738] sm:$0xff]  ;;  %v8340_v1 = vcombine.low %v3487_v46, %v3491_v50 }
 0x63b   :  { %7003 = vmatpush1.bf16.msra.mxu1 %v8268_v52  ;;  %v8476_v52 = vcombine.low %v3623_v41, %v3627_v42  ;;  %v3483_v60 = vld [vmem:[#allocation4 + $0x2f8] sm:$0xff] }
 0x63c   :  { %7044 = vmatpush1.bf16.msra.mxu0 %v8396_v35  ;;  %7004 = vmatprep.subr.bf16.mxu1 %v8261_v57  ;;  %v8341_v35 = vcombine.high %v3487_v46, %v3491_v50  ;;  %v8469_v57 = vcombine.high %v3615_v48, %v3619_v55  ;;  %v3607_v62 = vld [vmem:[#allocation4 + $0x6d8] sm:$0xff] }
 0x63d   :  { %7045 = vmatprep.subr.bf16.mxu0 %v8389_v58  ;;  %v3479_v58 = vld [vmem:[#allocation4 + $0x2d8] sm:$0xff] }
 0x63e   :  { %v3611_v63 = vld [vmem:[#allocation4 + $0x6f8] sm:$0xff]  ;;  %v8332_v33 = vcombine.low %v3479_v58, %v3483_v60 }
 0x63f   :  { %7005 = vmatpush1.bf16.msra.mxu1 %v8260_v36  ;;  %v8468_v36 = vcombine.low %v3615_v48, %v3619_v55  ;;  %v3475_v0 = vld [vmem:[#allocation4 + $0x2b8] sm:$0xff] }
 0x640   :  { %7046 = vmatpush1.bf16.msra.mxu0 %v8388_v19  ;;  %7006 = vmatprep.subr.bf16.mxu1 %v8253_v2  ;;  %v8333_v19 = vcombine.high %v3479_v58, %v3483_v60  ;;  %v8461_v2 = vcombine.high %v3607_v62, %v3611_v63  ;;  %v3599_v9 = vld [vmem:[#allocation4 + $0x698] sm:$0xff] }
 0x641   :  { %7047 = vmatprep.subr.bf16.mxu0 %v8381_v3  ;;  %v3471_v3 = vld [vmem:[#allocation4 + $0x298] sm:$0xff] }
 0x642   :  { %v3603_v56 = vld [vmem:[#allocation4 + $0x6b8] sm:$0xff]  ;;  %v8324_v15 = vcombine.low %v3471_v3, %v3475_v0 }
 0x643   :  { %7007 = vmatpush1.bf16.msra.mxu1 %v8252_v12  ;;  %v8460_v12 = vcombine.low %v3607_v62, %v3611_v63  ;;  %v3467_v47 = vld [vmem:[#allocation4 + $0x278] sm:$0xff] }
 0x644   :  { %7048 = vmatpush1.bf16.msra.mxu0 %v8380_v16  ;;  %7008 = vmatprep.subr.bf16.mxu1 %v8245_v5  ;;  %v8325_v16 = vcombine.high %v3471_v3, %v3475_v0  ;;  %v8453_v5 = vcombine.high %v3599_v9, %v3603_v56  ;;  %v3591_v54 = vld [vmem:[#allocation4 + $0x658] sm:$0xff] }
 0x645   :  { %7049 = vmatprep.subr.bf16.mxu0 %v8373_v59  ;;  %v3463_v59 = vld [vmem:[#allocation4 + $0x258] sm:$0xff] }
 0x646   :  { %v3595_v7 = vld [vmem:[#allocation4 + $0x678] sm:$0xff]  ;;  %v8316_v31 = vcombine.low %v3463_v59, %v3467_v47 }
 0x647   :  { %7009 = vmatpush1.bf16.msra.mxu1 %v8244_v8  ;;  %v8452_v8 = vcombine.low %v3599_v9, %v3603_v56  ;;  %v3459_v4 = vld [vmem:[#allocation4 + $0x238] sm:$0xff] }
 0x648   :  { %7050 = vmatpush1.bf16.msra.mxu0 %v8372_v38  ;;  %7010 = vmatprep.subr.bf16.mxu1 %v8365_v37  ;;  %v8317_v38 = vcombine.high %v3463_v59, %v3467_v47  ;;  %v8445_v37 = vcombine.high %v3591_v54, %v3595_v7  ;;  %v3583_v14 = vld [vmem:[#allocation4 + $0x618] sm:$0xff] }
 0x649   :  { %7051 = vmatprep.subr.bf16.mxu0 %v8493_v10  ;;  %v3455_v10 = vld [vmem:[#allocation4 + $0x218] sm:$0xff] }
 0x64a   :  { %v3587_v18 = vld [vmem:[#allocation4 + $0x638] sm:$0xff]  ;;  %v8308_v42 = vcombine.low %v3455_v10, %v3459_v4 }
 0x64b   :  { %7011 = vmatpush2.bf16.msra.mxu1 %v8364_v32  ;;  %v8444_v32 = vcombine.low %v3591_v54, %v3595_v7  ;;  %v3707_v24 = vld [vmem:[#allocation4 + $0x9f8] sm:$0xff] }
 0x64c   :  { %7052 = vmatpush2.bf16.msra.mxu0 %v8492_v34  ;;  %7012 = vmatprep.subr.bf16.mxu1 %v8357_v22  ;;  %v8309_v34 = vcombine.high %v3455_v10, %v3459_v4  ;;  %v8437_v22 = vcombine.high %v3583_v14, %v3587_v18  ;;  %v3831_v40 = vld [vmem:[#allocation4 + $0xdd8] sm:$0xff] }
 0x64d   :  { %7053 = vmatprep.subr.bf16.mxu0 %v8485_v39  ;;  %v3703_v39 = vld [vmem:[#allocation4 + $0x9d8] sm:$0xff] }
 0x64e   :  { %v3835_v41 = vld [vmem:[#allocation4 + $0xdf8] sm:$0xff]  ;;  %v8556_v50 = vcombine.low %v3703_v39, %v3707_v24 }
 0x64f   :  { %7013 = vmatpush2.bf16.msra.mxu1 %v8356_v21  ;;  %v8436_v21 = vcombine.low %v3583_v14, %v3587_v18  ;;  %v3699_v46 = vld [vmem:[#allocation4 + $0x9b8] sm:$0xff] }
 0x650   :  { %7054 = vmatpush2.bf16.msra.mxu0 %v8484_v49  ;;  %7014 = vmatprep.subr.bf16.mxu1 %v8349_v44  ;;  %v8557_v49 = vcombine.high %v3703_v39, %v3707_v24  ;;  %v8685_v44 = vcombine.high %v3831_v40, %v3835_v41  ;;  %v3823_v48 = vld [vmem:[#allocation4 + $0xd98] sm:$0xff] }
 0x651   :  { %7055 = vmatprep.subr.bf16.mxu0 %v8477_v43  ;;  %v3695_v43 = vld [vmem:[#allocation4 + $0x998] sm:$0xff] }
 0x652   :  { %v3827_v55 = vld [vmem:[#allocation4 + $0xdb8] sm:$0xff] }
 0x653   :  { %7015 = vmatpush2.bf16.msra.mxu1 %v8348_v45  ;;  %v8684_v45 = vcombine.low %v3831_v40, %v3835_v41  ;;  %v8677_v60 = vcombine.high %v3823_v48, %v3827_v55  ;;  %v3815_v62 = vld [vmem:[#allocation4 + $0xd58] sm:$0xff]  ;;  %v8676_v3 = vcombine.low %v3823_v48, %v3827_v55 }
 0x654   :  { %7056 = vmatpush2.bf16.msra.mxu0 %v8476_v52  ;;  %7016 = vmatprep.subr.bf16.mxu1 %v8341_v35  ;;  %v8549_v52 = vcombine.high %v3695_v43, %v3699_v46  ;;  %v3687_v35 = vld [vmem:[#allocation4 + $0x958] sm:$0xff] }
 0x655   :  { %7057 = vmatprep.subr.bf16.mxu0 %v8469_v57  ;;  %v3691_v57 = vld [vmem:[#allocation4 + $0x978] sm:$0xff] }
 0x656   :  { %v3819_v63 = vld [vmem:[#allocation4 + $0xd78] sm:$0xff]  ;;  %v8541_v0 = vcombine.high %v3687_v35, %v3691_v57 }
 0x657   :  { %7017 = vmatpush2.bf16.msra.mxu1 %v8340_v1  ;;  %v3679_v56 = vld [vmem:[#allocation4 + $0x918] sm:$0xff]  ;;  %v8668_v47 = vcombine.low %v3815_v62, %v3819_v63 }
 0x658   :  { %7058 = vmatpush2.bf16.msra.mxu0 %v8468_v36  ;;  %7018 = vmatprep.subr.bf16.mxu1 %v8333_v19  ;;  %v8548_v19 = vcombine.low %v3695_v43, %v3699_v46  ;;  %v3647_v55 = vld [vmem:[#allocation4 + $0x818] sm:$0xff] }
 0x659   :  { %7059 = vmatprep.subr.bf16.mxu0 %v8461_v2 }
 0x65b   :  { %7019 = vmatpush2.bf16.msra.mxu1 %v8332_v33  ;;  %v3683_v33 = vld [vmem:[#allocation4 + $0x938] sm:$0xff] }
 0x65c   :  { %7060 = vmatpush2.bf16.msra.mxu0 %v8460_v12  ;;  %7020 = vmatprep.subr.bf16.mxu1 %v8325_v16  ;;  %v3807_v12 = vld [vmem:[#allocation4 + $0xd18] sm:$0xff]  ;;  %v8533_v54 = vcombine.high %v3679_v56, %v3683_v33  ;;  %v8532_v10 = vcombine.low %v3679_v56, %v3683_v33 }
 0x65d   :  { %7061 = vmatprep.subr.bf16.mxu0 %v8453_v5  ;;  %v3811_v16 = vld [vmem:[#allocation4 + $0xd38] sm:$0xff]  ;;  %v8540_v5 = vcombine.low %v3687_v35, %v3691_v57 }
 0x65e   :  { %v8660_v4 = vcombine.low %v3807_v12, %v3811_v16  ;;  %v3779_v35 = vld [vmem:[#allocation4 + $0xc38] sm:$0xff] }
 0x65f   :  { %7021 = vmatpush2.bf16.msra.mxu1 %v8324_v15  ;;  %v3671_v15 = vld [vmem:[#allocation4 + $0x8d8] sm:$0xff] }
 0x660   :  { %7062 = vmatpush2.bf16.msra.mxu0 %v8452_v8  ;;  %7022 = vmatprep.subr.bf16.mxu1 %v8317_v38  ;;  %v3675_v8 = vld [vmem:[#allocation4 + $0x8f8] sm:$0xff] }
 0x661   :  { %7063 = vmatprep.subr.bf16.mxu0 %v8445_v37  ;;  %v3799_v38 = vld [vmem:[#allocation4 + $0xcd8] sm:$0xff]  ;;  %v8525_v14 = vcombine.high %v3671_v15, %v3675_v8  ;;  %v8524_v39 = vcombine.low %v3671_v15, %v3675_v8 }
 0x662   :  { %v3803_v37 = vld [vmem:[#allocation4 + $0xcf8] sm:$0xff] }
 0x663   :  { %7023 = vmatpush2.bf16.msra.mxu1 %v8316_v31  ;;  %v8653_v18 = vcombine.high %v3799_v38, %v3803_v37  ;;  %v3663_v31 = vld [vmem:[#allocation4 + $0x898] sm:$0xff]  ;;  %v8652_v24 = vcombine.low %v3799_v38, %v3803_v37 }
 0x664   :  { %7064 = vmatpush2.bf16.msra.mxu0 %v8444_v32  ;;  %7024 = vmatprep.subr.bf16.mxu1 %v8309_v34  ;;  %v3667_v32 = vld [vmem:[#allocation4 + $0x8b8] sm:$0xff] }
 0x665   :  { %7065 = vmatprep.subr.bf16.mxu0 %v8437_v22  ;;  %v3791_v34 = vld [vmem:[#allocation4 + $0xc98] sm:$0xff]  ;;  %v8517_v40 = vcombine.high %v3663_v31, %v3667_v32  ;;  %v8516_v43 = vcombine.low %v3663_v31, %v3667_v32 }
 0x666   :  { %v3795_v22 = vld [vmem:[#allocation4 + $0xcb8] sm:$0xff] }
 0x667   :  { %7025 = vmatpush2.bf16.msra.mxu1 %v8308_v42  ;;  %v8645_v41 = vcombine.high %v3791_v34, %v3795_v22  ;;  %v3655_v42 = vld [vmem:[#allocation4 + $0x858] sm:$0xff]  ;;  %v8644_v46 = vcombine.low %v3791_v34, %v3795_v22 }
 0x668   :  { %7066 = vmatpush2.bf16.msra.mxu0 %v8436_v21  ;;  %7076 = vmatprep.subr.bf16.mxu1 %v8557_v49  ;;  %v3659_v21 = vld [vmem:[#allocation4 + $0x878] sm:$0xff] }
 0x669   :  { %7117 = vmatprep.subr.bf16.mxu0 %v8685_v44  ;;  %v3783_v49 = vld [vmem:[#allocation4 + $0xc58] sm:$0xff]  ;;  %v8508_v57 = vcombine.low %v3655_v42, %v3659_v21 }
 0x66a   :  { %v6782_v58 = vpop.f32.mrf.mxu1  ;;  %7027 = vmatmul.mubr.bf16.vlgmr.msra.gmra.mxu1 %v9796_v20  ;;  %v3787_v44 = vld [vmem:[#allocation4 + $0xc78] sm:$0xff] }
 0x66b   :  { %v6783_v1 = vadd.f32 %v6782_v58, %v9883_v17  ;;  %v6823_v36 = vpop.f32.mrf.mxu0  ;;  %7068 = vmatmul.mubr.bf16.vlgmr.msra.gmra.mxu0 %v9800_v23  ;;  %7077 = vmatpush1.bf16.msra.mxu1 %v8556_v50  ;;  %v8669_v17 = vcombine.high %v3815_v62, %v3819_v63  ;;  %v8509_v50 = vcombine.high %v3655_v42, %v3659_v21  ;;  %v3767_v63 = vld [vmem:[#allocation4 + $0xbd8] sm:$0xff] }
 0x66c   :  { %7108 = vmatprep.mubr.bf16.mxu1 %v9832_v11  ;;  %7118 = vmatpush1.bf16.msra.mxu0 %v8684_v45  ;;  %v9892_v2 = vpop.f32.mrf.mxu1  ;;  %v8637_v48 = vcombine.high %v3783_v49, %v3787_v44  ;;  %v3651_v45 = vld [vmem:[#allocation4 + $0x838] sm:$0xff]  ;;  %v8636_v58 = vcombine.low %v3783_v49, %v3787_v44 }
 0x66d   :  { %v9894_v9 = vadd.f32 %v6823_v36, %v6783_v1  ;;  %7149 = vmatprep.mubr.bf16.mxu0 %v9836_v28  ;;  %v9897_v20 = vpop.f32.mrf.mxu0  ;;  %7078 = vmatprep.subr.bf16.mxu1 %v8549_v52  ;;  %v8661_v28 = vcombine.high %v3807_v12, %v3811_v16  ;;  %v3775_v52 = vld [vmem:[#allocation4 + $0xc18] sm:$0xff] }
 0x66e   :  { %v6786_v23 = vpop.f32.mrf.mxu1  ;;  %7119 = vmatprep.subr.bf16.mxu0 %v8677_v60  ;;  %v8501_v60 = vcombine.high %v3647_v55, %v3651_v45  ;;  %v8629_v62 = vcombine.high %v3775_v52, %v3779_v35  ;;  %v3771_v1 = vld [vmem:[#allocation4 + $0xbf8] sm:$0xff] }
 0x66f   :  { %v6827_v11 = vpop.f32.mrf.mxu0  ;;  %7079 = vmatpush1.bf16.msra.mxu1 %v8548_v19  ;;  %v3895_v36 = vld [vmem:[#allocation4 + $0xfd8] sm:$0xff] }
 0x670   :  { %7120 = vmatpush1.bf16.msra.mxu0 %v8676_v3  ;;  %v6787_v59 = vpop.f32.mrf.mxu1  ;;  %7080 = vmatprep.subr.bf16.mxu1 %v8541_v0  ;;  %v3899_v19 = vld [vmem:[#allocation4 + $0xff8] sm:$0xff]  ;;  %v8500_v3 = vcombine.low %v3647_v55, %v3651_v45  ;;  %v8628_v0 = vcombine.low %v3775_v52, %v3779_v35  ;;  %v8620_v11 = vcombine.low %v3767_v63, %v3771_v1 }
 0x671   :  { %v6828_v7 = vpop.f32.mrf.mxu0  ;;  %7121 = vmatprep.subr.bf16.mxu0 %v8669_v17  ;;  %v8621_v17 = vcombine.high %v3767_v63, %v3771_v1  ;;  %v8749_v56 = vcombine.high %v3895_v36, %v3899_v19  ;;  %v3759_v33 = vld [vmem:[#allocation4 + $0xb98] sm:$0xff] }
 0x672   :  { %v3763_v23 = vld [vmem:[#allocation4 + $0xbb8] sm:$0xff] }
 0x673   :  { %7081 = vmatpush1.bf16.msra.mxu1 %v8540_v5  ;;  %v3887_v12 = vld [vmem:[#allocation4 + $0xf98] sm:$0xff]  ;;  %v8748_v5 = vcombine.low %v3895_v36, %v3899_v19  ;;  %v8613_v59 = vcombine.high %v3759_v33, %v3763_v23  ;;  %v8612_v8 = vcombine.low %v3759_v33, %v3763_v23  ;;  %v6785_v23 = vadd.f32 %v9892_v2, %v9886_v29 }
 0x674   :  { %7122 = vmatpush1.bf16.msra.mxu0 %v8668_v47  ;;  %7082 = vmatprep.subr.bf16.mxu1 %v8533_v54  ;;  %v3891_v16 = vld [vmem:[#allocation4 + $0xfb8] sm:$0xff]  ;;  %v7159_v29 = vmax.f32 %v9872_v26, 0.0  ;;  %v9103_v26 = vld [vmem:[#allocation5 + $0x30] sm:$0xff]  }
 0x675   :  { %7123 = vmatprep.subr.bf16.mxu0 %v8661_v28  ;;  %v8741_v47 = vcombine.high %v3887_v12, %v3891_v16  ;;  %v3751_v54 = vld [vmem:[#allocation4 + $0xb58] sm:$0xff]  ;;  %v8740_v38 = vcombine.low %v3887_v12, %v3891_v16 }
 0x676   :  { %v3755_v7 = vld [vmem:[#allocation4 + $0xb78] sm:$0xff] }
 0x677   :  { %7083 = vmatpush1.bf16.msra.mxu1 %v8532_v10  ;;  %v3879_v28 = vld [vmem:[#allocation4 + $0xf58] sm:$0xff]  ;;  %v8605_v37 = vcombine.high %v3751_v54, %v3755_v7  ;;  %v8604_v32 = vcombine.low %v3751_v54, %v3755_v7 }
 0x678   :  { %7124 = vmatpush1.bf16.msra.mxu0 %v8660_v4  ;;  %7084 = vmatprep.subr.bf16.mxu1 %v8525_v14  ;;  %v3883_v15 = vld [vmem:[#allocation4 + $0xf78] sm:$0xff] }
 0x679   :  { %7125 = vmatprep.subr.bf16.mxu0 %v8653_v18  ;;  %v8733_v10 = vcombine.high %v3879_v28, %v3883_v15  ;;  %v3743_v4 = vld [vmem:[#allocation4 + $0xb18] sm:$0xff]  ;;  %v8732_v34 = vcombine.low %v3879_v28, %v3883_v15 }
 0x67a   :  { %v3747_v14 = vld [vmem:[#allocation4 + $0xb38] sm:$0xff] }
 0x67b   :  { %7085 = vmatpush1.bf16.msra.mxu1 %v8524_v39  ;;  %v3871_v18 = vld [vmem:[#allocation4 + $0xf18] sm:$0xff]  ;;  %v8597_v22 = vcombine.high %v3743_v4, %v3747_v14  ;;  %v8596_v21 = vcombine.low %v3743_v4, %v3747_v14 }
 0x67c   :  { %7126 = vmatpush1.bf16.msra.mxu0 %v8652_v24  ;;  %7086 = vmatprep.subr.bf16.mxu1 %v8517_v40  ;;  %v3875_v31 = vld [vmem:[#allocation4 + $0xf38] sm:$0xff] }
 0x67d   :  { %7127 = vmatprep.subr.bf16.mxu0 %v8645_v41  ;;  %v8725_v39 = vcombine.high %v3871_v18, %v3875_v31  ;;  %v3735_v24 = vld [vmem:[#allocation4 + $0xad8] sm:$0xff]  ;;  %v8724_v49 = vcombine.low %v3871_v18, %v3875_v31  ;;  %v9104_v31 = vld [vmem:[#allocation5 + $0xb0] sm:$0xff]  }
 0x67e   :  { %v3739_v40 = vld [vmem:[#allocation4 + $0xaf8] sm:$0xff] }
 0x67f   :  { %7087 = vmatpush1.bf16.msra.mxu1 %v8516_v43  ;;  %v3863_v41 = vld [vmem:[#allocation4 + $0xed8] sm:$0xff]  ;;  %v8589_v44 = vcombine.high %v3735_v24, %v3739_v40  ;;  %v8588_v45 = vcombine.low %v3735_v24, %v3739_v40  ;;  %v9107_v24 = vld [vmem:[#allocation5 + $0x28] sm:$0xff]  }
 0x680   :  { %7128 = vmatpush1.bf16.msra.mxu0 %v8644_v46  ;;  %7088 = vmatprep.subr.bf16.mxu1 %v8509_v50  ;;  %v3867_v42 = vld [vmem:[#allocation4 + $0xef8] sm:$0xff]  ;;  %v9108_v40 = vld [vmem:[#allocation5 + $0xa8] sm:$0xff]  }
 0x681   :  { %7129 = vmatprep.subr.bf16.mxu0 %v8637_v48  ;;  %v8717_v43 = vcombine.high %v3863_v41, %v3867_v42  ;;  %v3727_v46 = vld [vmem:[#allocation4 + $0xa98] sm:$0xff]  ;;  %v8716_v52 = vcombine.low %v3863_v41, %v3867_v42  ;;  %v9109_v41 = vld [vmem:[#allocation5 + $0x60] sm:$0xff]  }
 0x682   :  { %v3731_v50 = vld [vmem:[#allocation4 + $0xab8] sm:$0xff] }
 0x683   :  { %7089 = vmatpush1.bf16.msra.mxu1 %v8508_v57  ;;  %v3855_v48 = vld [vmem:[#allocation4 + $0xe98] sm:$0xff]  ;;  %v8581_v35 = vcombine.high %v3727_v46, %v3731_v50  ;;  %v8580_v1 = vcombine.low %v3727_v46, %v3731_v50 }
 0x684   :  { %7130 = vmatpush1.bf16.msra.mxu0 %v8636_v58  ;;  %7090 = vmatprep.subr.bf16.mxu1 %v8501_v60  ;;  %v3859_v55 = vld [vmem:[#allocation4 + $0xeb8] sm:$0xff] }
 0x685   :  { %7131 = vmatprep.subr.bf16.mxu0 %v8629_v62  ;;  %v8709_v57 = vcombine.high %v3855_v48, %v3859_v55  ;;  %v3719_v58 = vld [vmem:[#allocation4 + $0xa58] sm:$0xff]  ;;  %v8708_v36 = vcombine.low %v3855_v48, %v3859_v55  ;;  %v9117_v55 = vld [vmem:[#allocation5 + $0x50] sm:$0xff]  }
 0x686   :  { %v3723_v60 = vld [vmem:[#allocation4 + $0xa78] sm:$0xff] }
 0x687   :  { %7091 = vmatpush1.bf16.msra.mxu1 %v8500_v3  ;;  %v3847_v62 = vld [vmem:[#allocation4 + $0xe58] sm:$0xff]  ;;  %v8573_v19 = vcombine.high %v3719_v58, %v3723_v60  ;;  %v8572_v12 = vcombine.low %v3719_v58, %v3723_v60  ;;  %v9122_v58 = vld [vmem:[#allocation5 + $0xc8] sm:$0xff]  }
 0x688   :  { %7132 = vmatpush1.bf16.msra.mxu0 %v8628_v0  ;;  %7092 = vmatprep.subr.bf16.mxu1 %v8621_v17  ;;  %v3851_v63 = vld [vmem:[#allocation4 + $0xe78] sm:$0xff]  ;;  %v9123_v60 = vld [vmem:[#allocation5 + $0x8] sm:$0xff]  }
 0x689   :  { %7133 = vmatprep.subr.bf16.mxu0 %v8749_v56  ;;  %v8701_v3 = vcombine.high %v3847_v62, %v3851_v63  ;;  %v3711_v0 = vld [vmem:[#allocation4 + $0xa18] sm:$0xff]  ;;  %v8700_v16 = vcombine.low %v3847_v62, %v3851_v63  ;;  %v9124_v62 = vld [vmem:[#allocation5 + $0x88] sm:$0xff]   ;;  %v9125_v63 = vld [vmem:[#allocation5 + $0x40] sm:$0xff]  }
 0x68a   :  { %v3715_v17 = vld [vmem:[#allocation4 + $0xa38] sm:$0xff] }
 0x68b   :  { %7093 = vmatpush2.bf16.msra.mxu1 %v8620_v11  ;;  %v3839_v56 = vld [vmem:[#allocation4 + $0xe18] sm:$0xff]  ;;  %v8565_v11 = vcombine.high %v3711_v0, %v3715_v17 }
 0x68c   :  { %7134 = vmatpush2.bf16.msra.mxu0 %v8748_v5  ;;  %7094 = vmatprep.subr.bf16.mxu1 %v8613_v59  ;;  %v3843_v33 = vld [vmem:[#allocation4 + $0xe38] sm:$0xff]  ;;  %v6826_v59 = vadd.f32 %v9897_v20, %v6785_v23 }
 0x68d   :  { %7135 = vmatprep.subr.bf16.mxu0 %v8741_v47  ;;  %v8693_v5 = vcombine.high %v3839_v56, %v3843_v33  ;;  %v8564_v47 = vcombine.low %v3711_v0, %v3715_v17  ;;  %v8692_v54 = vcombine.low %v3839_v56, %v3843_v33  ;;  %v9097_v7 = vld [vmem:[#allocation5 + $0x78] sm:$0xff]   ;;  %v7160_v17 = vmax.f32 %v9894_v9, 0.0  ;;  %v9148_v9 = vld [vmem:[#allocation5 + $0x1b0] sm:$0xff]  }
 0x68e   :  { %v9098_v28 = vld [vmem:[#allocation5 + $0xf8] sm:$0xff]   ;;  %v7161_v2 = vmax.f32 %v6826_v59, 0.0  ;;  %v9133_v59 = vld [vmem:[#allocation5 + $0x168] sm:$0xff]  }
 0x68f   :  { %7095 = vmatpush2.bf16.msra.mxu1 %v8612_v8  ;;  %v9099_v15 = vld [vmem:[#allocation5 + $0x38] sm:$0xff]  }
 0x690   :  { %7136 = vmatpush2.bf16.msra.mxu0 %v8740_v38  ;;  %7096 = vmatprep.subr.bf16.mxu1 %v8605_v37  ;;  %v9100_v8 = vld [vmem:[#allocation5 + $0xb8] sm:$0xff]   ;;  %v9101_v38 = vld [vmem:[#allocation5 + $0x70] sm:$0xff]   ;;  %v7167_v37 = vpack.c.bf16 %v7159_v29, %v7159_v29  ;;  %v7169_v4 = vpack.c.bf16 %v7161_v2, %v7161_v2  ;;  %v9151_v29 = vld [vmem:[#allocation5 + $0x1e0] sm:$0xff]  }
 0x691   :  { %7137 = vmatprep.subr.bf16.mxu0 %v8733_v10  ;;  %v9102_v10 = vld [vmem:[#allocation5 + $0xf0] sm:$0xff]   ;;  %v9114_v46 = vld [vmem:[#allocation5 + $0xd8] sm:$0xff]   ;;  %v9136_v2 = vld [vmem:[#allocation5 + $0x120] sm:$0xff]  }
 0x692   :  { %v9115_v50 = vld [vmem:[#allocation5 + $0x18] sm:$0xff]  }
 0x693   :  { %7097 = vmatpush2.bf16.msra.mxu1 %v8604_v32  ;;  %v9105_v32 = vld [vmem:[#allocation5 + $0x68] sm:$0xff]   ;;  %v9116_v48 = vld [vmem:[#allocation5 + $0x98] sm:$0xff]  }
 0x694   :  { %7138 = vmatpush2.bf16.msra.mxu0 %v8732_v34  ;;  %7098 = vmatprep.subr.bf16.mxu1 %v8597_v22  ;;  %v9106_v22 = vld [vmem:[#allocation5 + $0xe8] sm:$0xff]   ;;  %v9129_v0 = vld [vmem:[#allocation5 + $0x178] sm:$0xff]  }
 0x695   :  { %7139 = vmatprep.subr.bf16.mxu0 %v8725_v39  ;;  %v9145_v56 = vld [vmem:[#allocation5 + $0x1f8] sm:$0xff]  }
 0x696   :  { %v9130_v33 = vld [vmem:[#allocation5 + $0x138] sm:$0xff]  }
 0x697   :  { %7099 = vmatpush2.bf16.msra.mxu1 %v8596_v21  ;;  %v9110_v21 = vld [vmem:[#allocation5 + $0xe0] sm:$0xff]  }
 0x698   :  { %7140 = vmatpush2.bf16.msra.mxu0 %v8724_v49  ;;  %7100 = vmatprep.subr.bf16.mxu1 %v8589_v44  ;;  %v9111_v49 = vld [vmem:[#allocation5 + $0x20] sm:$0xff]  }
 0x699   :  { %7141 = vmatprep.subr.bf16.mxu0 %v8717_v43  ;;  %v9112_v44 = vld [vmem:[#allocation5 + $0xa0] sm:$0xff]   ;;  %v9113_v43 = vld [vmem:[#allocation5 + $0x58] sm:$0xff]  }
 0x69b   :  { %7101 = vmatpush2.bf16.msra.mxu1 %v8588_v45  ;;  %v9118_v45 = vld [vmem:[#allocation5 + $0xd0] sm:$0xff]  }
 0x69c   :  { %7142 = vmatpush2.bf16.msra.mxu0 %v8716_v52  ;;  %7102 = vmatprep.subr.bf16.mxu1 %v8581_v35  ;;  %v9119_v52 = vld [vmem:[#allocation5 + $0x10] sm:$0xff]  }
 0x69d   :  { %7143 = vmatprep.subr.bf16.mxu0 %v8709_v57  ;;  %v9120_v35 = vld [vmem:[#allocation5 + $0x90] sm:$0xff]   ;;  %v9121_v57 = vld [vmem:[#allocation5 + $0x48] sm:$0xff]  }
 0x69f   :  { %7103 = vmatpush2.bf16.msra.mxu1 %v8580_v1  ;;  %v9126_v1 = vld [vmem:[#allocation5 + $0xc0] sm:$0xff]  }
 0x6a0   :  { %7144 = vmatpush2.bf16.msra.mxu0 %v8708_v36  ;;  %7104 = vmatprep.subr.bf16.mxu1 %v8573_v19  ;;  %v9127_v36 = vld [vmem:[#allocation5] sm:$0xff]   ;;  %v7158_v19 = vmax.f32 %v9868_v6, 0.0  ;;  %v9132_v6 = vld [vmem:[#allocation5 + $0x130] sm:$0xff]  }
 0x6a1   :  { %7145 = vmatprep.subr.bf16.mxu0 %v8701_v3  ;;  %v9128_v3 = vld [vmem:[#allocation5 + $0x80] sm:$0xff]  }
 0x6a2   :  { %v7166_v23 = vpack.c.bf16 %v7158_v19, %v7158_v19 }
 0x6a3   :  { %7105 = vmatpush2.bf16.msra.mxu1 %v8572_v12  ;;  %v9131_v12 = vld [vmem:[#allocation5 + $0x170] sm:$0xff]  }
 0x6a4   :  { %7146 = vmatpush2.bf16.msra.mxu0 %v8700_v16  ;;  %7106 = vmatprep.subr.bf16.mxu1 %v8565_v11  ;;  %v9146_v16 = vld [vmem:[#allocation5 + $0x1b8] sm:$0xff]   ;;  %v7168_v11 = vpack.c.bf16 %v7160_v17, %v7160_v17 }
 0x6a5   :  { %7147 = vmatprep.subr.bf16.mxu0 %v8693_v5  ;;  %v9147_v5 = vld [vmem:[#allocation5 + $0x1f0] sm:$0xff]  }
 0x6a7   :  { %7107 = vmatpush2.bf16.msra.mxu1 %v8564_v47  ;;  %v9149_v47 = vld [vmem:[#allocation5 + $0x1e8] sm:$0xff]  }
 0x6a8   :  { %7148 = vmatpush2.bf16.msra.mxu0 %v8692_v54  ;;  %8846 = vmatprep.subr.bf16.mxu1 %v9097_v7  ;;  %v9134_v54 = vld [vmem:[#allocation5 + $0x128] sm:$0xff]   ;;  %v9135_v7 = vld [vmem:[#allocation5 + $0x160] sm:$0xff]  }
 0x6a9   :  { %8868 = vmatprep.subr.bf16.mxu0 %v9098_v28  ;;  %v9150_v28 = vld [vmem:[#allocation5 + $0x1a8] sm:$0xff]  }
 0x6aa   :  { %v9903_v20 = vpop.f32.mrf.mxu1  ;;  %7109 = vmatmul.mubr.bf16.vlgmr.msra.gmra.mxu1 %v9834_v27 }
 0x6ab   :  { %v9906_v14 = vpop.f32.mrf.mxu0  ;;  %7150 = vmatmul.mubr.bf16.vlgmr.msra.gmra.mxu0 %v9838_v61  ;;  %8847 = vmatpush3.bf16.msra.mxu1 %v9099_v15  ;;  %v9137_v15 = vld [vmem:[#allocation5 + $0x158] sm:$0xff]  }
 0x6ac   :  { %7725 = vmatprep.mubr.bf16.mxu1 %v7167_v37  ;;  %8869 = vmatpush3.bf16.msra.mxu0 %v9100_v8  ;;  %v9909_v18 = vpop.f32.mrf.mxu1  ;;  %v9152_v8 = vld [vmem:[#allocation5 + $0x1a0] sm:$0xff]   ;;  %v9138_v37 = vld [vmem:[#allocation5 + $0x118] sm:$0xff]  }
 0x6ad   :  { %7765 = vmatprep.mubr.bf16.mxu0 %v7169_v4  ;;  %v9911_v34 = vpop.f32.mrf.mxu0  ;;  %8848 = vmatprep.subr.bf16.mxu1 %v9101_v38  ;;  %v9153_v38 = vld [vmem:[#allocation5 + $0x1d8] sm:$0xff]  }
 0x6ae   :  { %v6868_v27 = vpop.f32.mrf.mxu1  ;;  %8870 = vmatprep.subr.bf16.mxu0 %v9102_v10  ;;  %v9139_v10 = vld [vmem:[#allocation5 + $0x150] sm:$0xff]   ;;  %v9154_v4 = vld [vmem:[#allocation5 + $0x198] sm:$0xff]  }
 0x6af   :  { %v6909_v39 = vpop.f32.mrf.mxu0  ;;  %8849 = vmatpush3.bf16.msra.mxu1 %v9103_v26  ;;  %v9140_v26 = vld [vmem:[#allocation5 + $0x110] sm:$0xff]  }
 0x6b0   :  { %8871 = vmatpush3.bf16.msra.mxu0 %v9104_v31  ;;  %v6869_v61 = vpop.f32.mrf.mxu1  ;;  %8850 = vmatprep.subr.bf16.mxu1 %v9105_v32  ;;  %v9141_v31 = vld [vmem:[#allocation5 + $0x148] sm:$0xff]   ;;  %v9161_v27 = vld [vmem:[#allocation19] sm:$0xff] }
 0x6b1   :  { %v6910_v42 = vpop.f32.mrf.mxu0  ;;  %8872 = vmatprep.subr.bf16.mxu0 %v9106_v22  ;;  %v9142_v32 = vld [vmem:[#allocation5 + $0x108] sm:$0xff]   ;;  %v9143_v22 = vld [vmem:[#allocation5 + $0x140] sm:$0xff]   ;;  %v3921_v39 = vrot.slane %v9161_v27, %v3342_v13  ;;  %v9156_v13 = vld [vmem:[#allocation5 + $0x190] sm:$0xff]  }
 0x6b2   :  { %v9144_v61 = vld [vmem:[#allocation5 + $0x100] sm:$0xff]  }
 0x6b3   :  { %8851 = vmatpush3.bf16.msra.mxu1 %v9107_v24  ;;  %v3925_v24 = vrot.slane %v9161_v27, %v3346_v51 }
 0x6b4   :  { %8873 = vmatpush3.bf16.msra.mxu0 %v9108_v40  ;;  %8852 = vmatprep.subr.bf16.mxu1 %v9109_v41  ;;  %v6865_v40 = vadd.f32 %v9903_v20, %v3921_v39  ;;  %v9157_v20 = vld [vmem:[#allocation5 + $0x1c8] sm:$0xff]  }
 0x6b5   :  { %8874 = vmatprep.subr.bf16.mxu0 %v9110_v21  ;;  %v6867_v41 = vadd.f32 %v9909_v18, %v3925_v24 }
 0x6b6   :  { %v6906_v42 = vadd.f32 %v9906_v14, %v6865_v40 }
 0x6b7   :  { %8853 = vmatpush3.bf16.msra.mxu1 %v9111_v49  ;;  %v9155_v49 = vld [vmem:[#allocation5 + $0x1d0] sm:$0xff]  }
 0x6b8   :  { %8875 = vmatpush3.bf16.msra.mxu0 %v9112_v44  ;;  %8854 = vmatprep.subr.bf16.mxu1 %v9113_v43  ;;  %v6908_v44 = vadd.f32 %v9911_v34, %v6867_v41  ;;  %v9159_v34 = vld [vmem:[#allocation5 + $0x1c0] sm:$0xff]  }
 0x6b9   :  { %8876 = vmatprep.subr.bf16.mxu0 %v9114_v46 }
 0x6bb   :  { %8855 = vmatpush3.bf16.msra.mxu1 %v9115_v50 }
 0x6bc   :  { %8877 = vmatpush3.bf16.msra.mxu0 %v9116_v48  ;;  %8856 = vmatprep.subr.bf16.mxu1 %v9117_v55 }
 0x6bd   :  { %8878 = vmatprep.subr.bf16.mxu0 %v9118_v45 }
 0x6bf   :  { %8857 = vmatpush3.bf16.msra.mxu1 %v9119_v52 }
 0x6c0   :  { %8879 = vmatpush3.bf16.msra.mxu0 %v9120_v35  ;;  %8858 = vmatprep.subr.bf16.mxu1 %v9121_v57  ;;  %v9158_v35 = vld [vmem:[#allocation5 + $0x188] sm:$0xff]  }
 0x6c1   :  { %8880 = vmatprep.subr.bf16.mxu0 %v9122_v58 }
 0x6c3   :  { %8859 = vmatpush3.bf16.msra.mxu1 %v9123_v60 }
 0x6c4   :  { %8881 = vmatpush3.bf16.msra.mxu0 %v9124_v62  ;;  %8860 = vmatprep.subr.bf16.mxu1 %v9125_v63  ;;  %v9160_v63 = vld [vmem:[#allocation5 + $0x180] sm:$0xff]  }
 0x6c5   :  { %8882 = vmatprep.subr.bf16.mxu0 %v9126_v1 }
 0x6c7   :  { %8861 = vmatpush3.bf16.msra.mxu1 %v9127_v36 }
 0x6c8   :  { %8883 = vmatpush3.bf16.msra.mxu0 %v9128_v3  ;;  %8890 = vmatprep.subr.bf16.mxu1 %v9129_v0 }
 0x6c9   :  { %8912 = vmatprep.subr.bf16.mxu0 %v9145_v56 }
 0x6ca   :  { %7726 = vmatmul.mubr.bf16.vlgmr.msra.gmra.mxu1 %v7166_v23 }
 0x6cb   :  { %7766 = vmatmul.mubr.bf16.vlgmr.msra.gmra.mxu0 %v7168_v11  ;;  %8891 = vmatpush3.bf16.msra.mxu1 %v9130_v33 }
 0x6cc   :  { %8892 = vmatprep.subr.bf16.mxu1 %v9131_v12  ;;  %8913 = vmatpush3.bf16.msra.mxu0 %v9146_v16  ;;  %v3929_v12 = vrot.slane %v9161_v27, %v3350_v25  ;;  %v3933_v16 = vrot.slane %v9161_v27, %v3354_v30 }
 0x6cd   :  { %8914 = vmatprep.subr.bf16.mxu0 %v9147_v5 }
 0x6cf   :  { %8893 = vmatpush3.bf16.msra.mxu1 %v9132_v6 }
 0x6d0   :  { %8894 = vmatprep.subr.bf16.mxu1 %v9133_v59  ;;  %8915 = vmatpush3.bf16.msra.mxu0 %v9148_v9 }
 0x6d1   :  { %8916 = vmatprep.subr.bf16.mxu0 %v9149_v47 }
 0x6d3   :  { %8895 = vmatpush3.bf16.msra.mxu1 %v9134_v54 }
 0x6d4   :  { %8896 = vmatprep.subr.bf16.mxu1 %v9135_v7  ;;  %8917 = vmatpush3.bf16.msra.mxu0 %v9150_v28 }
 0x6d5   :  { %8918 = vmatprep.subr.bf16.mxu0 %v9151_v29 }
 0x6d7   :  { %8897 = vmatpush3.bf16.msra.mxu1 %v9136_v2 }
 0x6d8   :  { %8898 = vmatprep.subr.bf16.mxu1 %v9137_v15  ;;  %8919 = vmatpush3.bf16.msra.mxu0 %v9152_v8 }
 0x6d9   :  { %8920 = vmatprep.subr.bf16.mxu0 %v9153_v38 }
 0x6db   :  { %8899 = vmatpush3.bf16.msra.mxu1 %v9138_v37 }
 0x6dc   :  { %8900 = vmatprep.subr.bf16.mxu1 %v9139_v10  ;;  %8921 = vmatpush3.bf16.msra.mxu0 %v9154_v4 }
 0x6dd   :  { %8922 = vmatprep.subr.bf16.mxu0 %v9155_v49 }
 0x6df   :  { %8901 = vmatpush3.bf16.msra.mxu1 %v9140_v26 }
 0x6e0   :  { %8902 = vmatprep.subr.bf16.mxu1 %v9141_v31  ;;  %8923 = vmatpush3.bf16.msra.mxu0 %v9156_v13 }
 0x6e1   :  { %8924 = vmatprep.subr.bf16.mxu0 %v9157_v20 }
 0x6e3   :  { %8903 = vmatpush3.bf16.msra.mxu1 %v9142_v32  ;;  %v8750_v32 = vld [vmem:[#allocation21] ss:$0 sm:$0xff] }
 0x6e4   :  { %8904 = vmatprep.subr.bf16.mxu1 %v9143_v22  ;;  %8925 = vmatpush3.bf16.msra.mxu0 %v9158_v35 }
 0x6e5   :  { %8926 = vmatprep.subr.bf16.mxu0 %v9159_v34 }
 0x6e7   :  { %8905 = vmatpush3.bf16.msra.mxu1 %v9144_v61 }
 0x6e8   :  { %8927 = vmatpush3.bf16.msra.mxu0 %v9160_v63 }
 0x6ea   :  { %v6946_v21 = vpop.f32.mrf.mxu1 }
 0x6eb   :  { %v6947_v43 = vadd.f32 %v6946_v21, %v6906_v42  ;;  %v6987_v46 = vpop.f32.mrf.mxu0 }
 0x6ec   :  { %v6948_v50 = vpop.f32.mrf.mxu1 }
 0x6ed   :  { %v6988_v51 = vadd.f32 %v6987_v46, %v6947_v43  ;;  %v6949_v48 = vadd.f32 %v6948_v50, %v6908_v44  ;;  %v6989_v55 = vpop.f32.mrf.mxu0 }
 0x6ee   :  { %v6950_v45 = vpop.f32.mrf.mxu1 }
 0x6ef   :  { %v6990_v52 = vadd.f32 %v6989_v55, %v6949_v48  ;;  %v6991_v18 = vpop.f32.mrf.mxu0  ;;  %v7162_v57 = vmax.f32 %v6988_v51, 0.0 }
 0x6f0   :  { %v6951_v14 = vpop.f32.mrf.mxu1 }
 0x6f1   :  { %v7163_v58 = vmax.f32 %v6990_v52, 0.0  ;;  %v6992_v60 = vpop.f32.mrf.mxu0  ;;  %v7170_v1 = vpack.c.bf16 %v7162_v57, %v7162_v57 }
 0x6f3   :  { %v7171_v62 = vpack.c.bf16 %v7163_v58, %v7163_v58 }
 0x6f5   :  { %7805 = vmatprep.mubr.bf16.mxu1 %v7171_v62 }
 0x6f6   :  { %7806 = vmatmul.mubr.bf16.vlgmr.msra.gmra.mxu1 %v7170_v1 }
 0x72a   :  { %v7028_v36 = vpop.f32.mrf.mxu1 }
 0x72b   :  { %v7069_v19 = vpop.f32.mrf.mxu0  ;;  %v7029_v11 = vadd.f32 %v7028_v36, %v3929_v12 }
 0x72c   :  { %v7030_v3 = vpop.f32.mrf.mxu1 }
 0x72d   :  { %v7071_v0 = vpop.f32.mrf.mxu0  ;;  %v7031_v5 = vadd.f32 %v7030_v3, %v3933_v16  ;;  %v7070_v6 = vadd.f32 %v7069_v19, %v7029_v11 }
 0x72e   :  { %v7032_v17 = vpop.f32.mrf.mxu1 }
 0x72f   :  { %v7073_v56 = vpop.f32.mrf.mxu0  ;;  %v7072_v9 = vadd.f32 %v7071_v0, %v7031_v5 }
 0x730   :  { %v7033_v33 = vpop.f32.mrf.mxu1 }
 0x731   :  { %v7074_v23 = vpop.f32.mrf.mxu0 }
 0x76a   :  { %v7110_v59 = vpop.f32.mrf.mxu1 }
 0x76b   :  { %v7111_v47 = vadd.f32 %v7110_v59, %v7070_v6  ;;  %v7151_v54 = vpop.f32.mrf.mxu0 }
 0x76c   :  { %v7112_v7 = vpop.f32.mrf.mxu1 }
 0x76d   :  { %v7152_v28 = vadd.f32 %v7151_v54, %v7111_v47  ;;  %v7113_v29 = vadd.f32 %v7112_v7, %v7072_v9  ;;  %v7153_v2 = vpop.f32.mrf.mxu0 }
 0x76e   :  { %v7114_v15 = vpop.f32.mrf.mxu1 }
 0x76f   :  { %v7154_v8 = vadd.f32 %v7153_v2, %v7113_v29  ;;  %v7155_v38 = vpop.f32.mrf.mxu0  ;;  %v7164_v37 = vmax.f32 %v7152_v28, 0.0 }
 0x770   :  { %v7115_v10 = vpop.f32.mrf.mxu1 }
 0x771   :  { %v7165_v25 = vmax.f32 %v7154_v8, 0.0  ;;  %v7156_v4 = vpop.f32.mrf.mxu0  ;;  %v7172_v30 = vpack.c.bf16 %v7164_v37, %v7164_v37 }
 0x773   :  { %v7173_v53 = vpack.c.bf16 %v7165_v25, %v7165_v25 }
 0x775   :  { %7845 = vmatprep.mubr.bf16.mxu0 %v7173_v53 }
 0x776   :  { %7846 = vmatmul.mubr.bf16.vlgmr.msra.gmra.mxu0 %v7172_v30 }
 0x78a   :  { %v8862_v26 = vpop.f32.mrf.mxu1 }
 0x78b   :  { %v8884_v31 = vpop.f32.mrf.mxu0 }
 0x78c   :  { %v8863_v22 = vpop.f32.mrf.mxu1 }
 0x78d   :  { %v8864_v27 = vadd.f32 %v8863_v22, %v8862_v26  ;;  %v8885_v39 = vpop.f32.mrf.mxu0 }
 0x78e   :  { %v8886_v24 = vadd.f32 %v8885_v39, %v8884_v31  ;;  %v8865_v61 = vpop.f32.mrf.mxu1 }
 0x78f   :  { %v7728_v40 = vadd.f32 %v8864_v27, %v8750_v32  ;;  %v8887_v41 = vpop.f32.mrf.mxu0 }
 0x790   :  { %v8866_v42 = vpop.f32.mrf.mxu1 }
 0x791   :  { %v7768_v21 = vadd.f32 %v8886_v24, %v7728_v40  ;;  %v8888_v49 = vpop.f32.mrf.mxu0 }
 0x7b6   :  { %v8906_v44 = vpop.f32.mrf.mxu1 }
 0x7b8   :  { %v8907_v43 = vpop.f32.mrf.mxu1 }
 0x7b9   :  { %v8908_v46 = vadd.f32 %v8907_v43, %v8906_v44 }
 0x7ba   :  { %v8909_v13 = vpop.f32.mrf.mxu1 }
 0x7bb   :  { %v7808_v50 = vadd.f32 %v8908_v46, %v7768_v21 }
 0x7bc   :  { %v8910_v51 = vpop.f32.mrf.mxu1 }
 0x836   :  { %v8928_v48 = vpop.f32.mrf.mxu0 }
 0x838   :  { %v8929_v55 = vpop.f32.mrf.mxu0 }
 0x839   :  { %v8930_v45 = vadd.f32 %v8929_v55, %v8928_v48 }
 0x83a   :  { %v8931_v20 = vpop.f32.mrf.mxu0 }
 0x83b   :  { %v7848_v52 = vadd.f32 %v8930_v45, %v7808_v50 }
 0x83c   :  { %v8932_v18 = vpop.f32.mrf.mxu0 }
 0x83d   :  { %7853 = vst [vmem:[#allocation22] sm:$0x3] %v7848_v52 }
 0x83e   :  { %9433 = shalt.err (!%p9430_p13)
}
 0x83f   :  { %7863 = dma.vmem_to_hbm [thread:$0]  %s7861_s12, 32, %s9944_s14, [#allocation9]  }
 0x840   :  { %9460 = dma.done.wait [#allocation9], 32  }
 0x841   :  { %9461 = vsyncadd [#allocation9], 4294967264 }
 0x842   :  { %7867 = vsyncpa [#allocation8], 1 }
 0x843   :  { %7868 = vsyncpa [#allocation11], 1 }
 0x844   :  { %7869 = vsyncpa [#allocation14], 1 }
 0x845   :  { %7870 = vsyncpa [#allocation17], 1 }
 0x846   :  { %7871 = vsyncpa [#allocation20], 1 }
 0x847   :  { %7872 = vsyncpa [#allocation9], 1 }
 0x848   :  { %7873 = vsyncmov [#allocation6] }
 0x84b   :  { %s7874_s26 = vpop.sfrf %7873 }
 0x84c   :  { %p8815_p0 = scmp.ne.s32.totalorder %s7874_s26, 0 }
 0x84e   :  { %7878 = shalt.err (%p8815_p0)  }
 0x84f   :  { %7880 = vsyncmov [#allocation6 + $0x1] }
 0x852   :  { %s7881_s13 = vpop.sfrf %7880 }
 0x853   :  { %p8816_p1 = scmp.ne.s32.totalorder %s7881_s13, 0 }
 0x855   :  { %7885 = shalt.err (%p8816_p1)  }
 0x856   :  { %7887 = vsyncmov [#allocation6 + $0x2] }
 0x859   :  { %s7888_s27 = vpop.sfrf %7887 }
 0x85a   :  { %p8817_p2 = scmp.ne.s32.totalorder %s7888_s27, 0 }
 0x85c   :  { %7892 = shalt.err (%p8817_p2)  }
 0x85d   :  { %7894 = vsyncmov [#allocation6 + $0x3] }
 0x860   :  { %s7895_s14 = vpop.sfrf %7894 }
 0x861   :  { %p8818_p3 = scmp.ne.s32.totalorder %s7895_s14, 0 }
 0x863   :  { %7899 = shalt.err (%p8818_p3)  }

</bundles_post_ra>
